<compile_context>
chip_gen: v7x
topology: tpu7x:2x2x1
jax: 0.10.0
libtpu: 0.0.40
codegen_flags: <defaults>
</compile_context>

<pallas_src>
import jax
import jax.numpy as jnp
from jax.experimental import pallas as pl
from jax.experimental.pallas import tpu as pltpu

INPUT_DIM = 8
NUM_CLASSES = 3
NUM_HEADS = 4
NUM_LAYERS = 2
DIM_MODEL = 64
DIM_FF = 128
BATCH = 4
LN_EPS = 1e-5
CLS_PAD = 128            # lane-dense padded logits width
NEG_INF = -1e30


def _layer_norm(x, w, b):
    mean = jnp.mean(x, axis=-1, keepdims=True)
    var = jnp.mean((x - mean) ** 2, axis=-1, keepdims=True)
    return (x - mean) * jax.lax.rsqrt(var + LN_EPS) * w + b


# ---------------------------------------------------------------------------
# Single fused Pallas kernel: embedding + encoder layers + classifier head
# ---------------------------------------------------------------------------
def _transformer_kernel(xcol_ref, ew_ref, base_ref, bias_ref, hmask_ref, ones_ref,
                        wq_ref, bq_ref, wk_ref, bk_ref, wv_ref, bv_ref,
                        wo_ref, bo_ref, ln1w_ref, ln1b_ref,
                        w1_ref, b1_ref, w2_ref, b2_ref, ln2w_ref, ln2b_ref,
                        cw1_ref, cb1_ref, cw2_ref, cb2_ref, out_ref):
    """All B*S token rows processed together; everything resident in VMEM.

    Row ordering is s-major: row r = s*B + b holds feature position s of batch
    row b.  `bias_ref` (N, H*N) is the additive off-batch -1e30 bias tiled
    across heads; `hmask_ref` (H*N, D) masks sublane-block h to head h's lanes;
    `ones_ref` (H*N, H*N) is block-diagonal ones used to compute per-head
    softmax denominators with one matmul.  Weights are pre-transposed to
    (in, out); the 1/sqrt(hd) scale is folded into wq/bq (exact: 0.25).
    """
    N, D = ew_ref.shape                    # N = S*B tokens, D = dim_model
    L = wq_ref.shape[0]
    HN = hmask_ref.shape[0]
    H = HN // N
    S = cw1_ref.shape[0]
    B = N // S
    F = cb1_ref.shape[-1]

    # per-feature Linear(1, D) embedding + positional encoding, all rows at once
    x = xcol_ref[...] * ew_ref[...] + base_ref[...]          # (N, D)
    bias = bias_ref[...]                                      # (N, H*N)
    hmask = hmask_ref[...]                                    # (H*N, D)
    seg_ones = ones_ref[...]                                  # (H*N, H*N)

    for l in range(L):
        # ---- multi-head self-attention, all heads in one score matmul ----
        q = jnp.dot(x, wq_ref[l], preferred_element_type=jnp.float32) + bq_ref[l]
        k = jnp.dot(x, wk_ref[l], preferred_element_type=jnp.float32) + bk_ref[l]
        v = jnp.dot(x, wv_ref[l], preferred_element_type=jnp.float32) + bv_ref[l]
        # head-stacked, head-masked K / V: sublane block h = {k,v} * headmask_h
        k_exp = jnp.concatenate([k] * H, axis=0) * hmask      # (H*N, D)
        v_exp = jnp.concatenate([v] * H, axis=0) * hmask      # (H*N, D)

        # all head scores at once: s[:, h*N + m] = (q_h . k_h[m])
        s = jax.lax.dot_general(q, k_exp, (((1,), (1,)), ((), ())),
                                preferred_element_type=jnp.float32) + bias   # (N, H*N)
        s = s - jnp.max(s, axis=-1, keepdims=True)            # shared max (exact ratios)
        p = jnp.exp(s)
        # per-head denominators broadcast back across each head's 32 columns
        denom = jnp.dot(p, seg_ones, preferred_element_type=jnp.float32)
        # P @ V sums every head's output straight into its own lanes
        attn = jnp.dot(p / denom, v_exp, preferred_element_type=jnp.float32)  # (N, D)

        attn = jnp.dot(attn, wo_ref[l], preferred_element_type=jnp.float32) + bo_ref[l]
        x = _layer_norm(x + attn, ln1w_ref[l], ln1b_ref[l])

        # ---- feed-forward (batched over all N rows) ----
        h1 = jnp.dot(x, w1_ref[l], preferred_element_type=jnp.float32) + b1_ref[l]
        h1 = jnp.maximum(h1, 0.0)
        ff = jnp.dot(h1, w2_ref[l], preferred_element_type=jnp.float32) + b2_ref[l]
        x = _layer_norm(x + ff, ln2w_ref[l], ln2b_ref[l])

    # ---- classifier head: Linear(S*D, F) -> ReLU -> Linear(F, CLS_PAD) ----
    # flat[b] @ cw1 == sum_s x[s*B + b, :] @ cw1[s]  (s-major rows => the rows
    # for a given s across all batches are one contiguous static slice).
    acc = jnp.zeros((B, F), jnp.float32) + cb1_ref[...]
    for si in range(S):
        acc = acc + jnp.dot(x[si * B:(si + 1) * B, :], cw1_ref[si],
                            preferred_element_type=jnp.float32)
    cls = jnp.maximum(acc, 0.0)
    out_ref[...] = (jnp.dot(cls, cw2_ref[...], preferred_element_type=jnp.float32)
                    + cb2_ref[...])


# ---------------------------------------------------------------------------
# One-time parameter preparation (runs once, OUTSIDE the per-call path)
# ---------------------------------------------------------------------------
def prepare_params(p, batch=BATCH):
    S, D, H, L = INPUT_DIM, DIM_MODEL, NUM_HEADS, NUM_LAYERS
    F, C = DIM_FF, NUM_CLASSES
    B = batch
    hd = D // H
    N = S * B
    scale = 1.0 / float(hd) ** 0.5          # 0.25 — exact, folded into wq/bq

    kp = {}
    # embedding weights / (bias + positional encoding) repeated per batch row
    kp["ew"] = jnp.repeat(p["embed_w"], B, axis=0)                 # (N, D)
    kp["base"] = jnp.repeat(p["embed_b"] + p["pos"], B, axis=0)    # (N, D)

    # additive attention bias (off-batch -> -1e30), tiled across the H heads
    rows = jnp.arange(N)
    cols = jnp.arange(H * N)
    kp["bias"] = jnp.where((rows[:, None] % B) == (cols[None, :] % B),
                           0.0, NEG_INF).astype(jnp.float32)        # (N, H*N)

    # head mask for the sublane-stacked K/V: block h -> head h's lanes
    head_of_row = jnp.arange(H * N) // N
    head_of_lane = jnp.arange(D) // hd
    kp["hmask"] = (head_of_row[:, None] == head_of_lane[None, :]).astype(jnp.float32)

    # block-diagonal ones (per-head softmax denominator via one matmul)
    blk = jnp.arange(H * N) // N
    kp["seg_ones"] = (blk[:, None] == blk[None, :]).astype(jnp.float32)  # (H*N, H*N)

    # split fused QKV so q/k/v each start at lane 0; fold attention scale into q
    kp["wq"] = p["wqkv_t"][:, :, 0:D] * scale
    kp["wk"] = p["wqkv_t"][:, :, D:2 * D]
    kp["wv"] = p["wqkv_t"][:, :, 2 * D:3 * D]
    kp["bq"] = (p["bqkv"][:, 0:D] * scale)[:, None, :]
    kp["bk"] = p["bqkv"][:, D:2 * D][:, None, :]
    kp["bv"] = p["bqkv"][:, 2 * D:3 * D][:, None, :]
    kp["wo"] = p["wo_t"]
    kp["bo"] = p["bo"][:, None, :]
    kp["ln1w"], kp["ln1b"] = p["ln1w"][:, None, :], p["ln1b"][:, None, :]
    kp["w1"], kp["b1"] = p["w1_t"], p["b1"][:, None, :]
    kp["w2"], kp["b2"] = p["w2_t"], p["b2"][:, None, :]
    kp["ln2w"], kp["ln2b"] = p["ln2w"][:, None, :], p["ln2b"][:, None, :]

    # classifier weights: (S*D, F) -> (S, D, F); pad final layer to 128 lanes
    kp["cw1"] = p["cw1_t"].reshape(S, D, F)
    kp["cb1"] = p["cb1"]
    kp["cw2"] = jnp.zeros((F, CLS_PAD), jnp.float32).at[:, :C].set(p["cw2_t"])
    kp["cb2"] = jnp.zeros((1, CLS_PAD), jnp.float32).at[:, :C].set(p["cb2"])
    return kp


# ---------------------------------------------------------------------------
# Per-call wrapper: x transpose + ONE pallas_call + class slice
# ---------------------------------------------------------------------------
def transformer_forward(x, kp):
    B = x.shape[0]
    N = INPUT_DIM * B
    # features as an s-major column: xcol[s*B + b] = x[b, s]
    xcol = x.T.reshape(N, 1)

    vmem = pl.BlockSpec(memory_space=pltpu.MemorySpace.VMEM)
    args = (xcol, kp["ew"], kp["base"], kp["bias"], kp["hmask"], kp["seg_ones"],
            kp["wq"], kp["bq"], kp["wk"], kp["bk"], kp["wv"], kp["bv"],
            kp["wo"], kp["bo"], kp["ln1w"], kp["ln1b"],
            kp["w1"], kp["b1"], kp["w2"], kp["b2"], kp["ln2w"], kp["ln2b"],
            kp["cw1"], kp["cb1"], kp["cw2"], kp["cb2"])
    out = pl.pallas_call(
        _transformer_kernel,
        out_shape=jax.ShapeDtypeStruct((B, CLS_PAD), jnp.float32),
        in_specs=[vmem] * len(args),
        out_specs=vmem,
    )(*args)
    return out[:, :NUM_CLASSES]


# ---------------------------------------------------------------------------
# Deterministic parameter init (synthetic weights, not a checkpoint)
# ---------------------------------------------------------------------------
def init_params(key):
    ks = jax.random.split(key, 16)

    def nrm(k, shape, std=0.05):
        return std * jax.random.normal(k, shape, dtype=jnp.float32)

    L, D, F, S = NUM_LAYERS, DIM_MODEL, DIM_FF, INPUT_DIM
    p = {}
    # stacked per-feature Linear(1, D): weight column and bias per feature
    p["embed_w"] = nrm(ks[0], (S, D), 0.5)
    p["embed_b"] = nrm(ks[1], (S, D), 0.05)
    p["pos"] = nrm(ks[2], (S, D), 0.02)      # positional_encoding, std=0.02
    # encoder layers (weights stored pre-transposed: (in, out))
    p["wqkv_t"] = nrm(ks[3], (L, D, 3 * D))
    p["bqkv"] = nrm(ks[4], (L, 3 * D), 0.02)
    p["wo_t"] = nrm(ks[5], (L, D, D))
    p["bo"] = nrm(ks[6], (L, D), 0.02)
    p["ln1w"] = jnp.ones((L, D), jnp.float32)
    p["ln1b"] = jnp.zeros((L, D), jnp.float32)
    p["w1_t"] = nrm(ks[7], (L, D, F))
    p["b1"] = nrm(ks[8], (L, F), 0.02)
    p["w2_t"] = nrm(ks[9], (L, F, D))
    p["b2"] = nrm(ks[10], (L, D), 0.02)
    p["ln2w"] = jnp.ones((L, D), jnp.float32)
    p["ln2b"] = jnp.zeros((L, D), jnp.float32)
    # classifier head
    p["cw1_t"] = nrm(ks[11], (S * D, F))
    p["cb1"] = nrm(ks[12], (1, F), 0.02)
    p["cw2_t"] = nrm(ks[13], (F, NUM_CLASSES))
    p["cb2"] = nrm(ks[14], (1, NUM_CLASSES), 0.02)
    return p


# ---------------------------------------------------------------------------
# Pure-JAX reference (same math) for a correctness check
# ---------------------------------------------------------------------------
def reference_forward(x, p):
    B = x.shape[0]
    S, D, H, L = INPUT_DIM, DIM_MODEL, NUM_HEADS, NUM_LAYERS
    hd = D // H
    scale = 1.0 / float(hd) ** 0.5
    h = x[:, :, None] * p["embed_w"][None] + p["embed_b"][None] + p["pos"][None]
    for l in range(L):
        qkv = h @ p["wqkv_t"][l] + p["bqkv"][l]
        q, k, v = jnp.split(qkv, 3, axis=-1)
        sh = lambda t: t.reshape(B, S, H, hd).transpose(0, 2, 1, 3)
        qh, kh, vh = sh(q) * scale, sh(k), sh(v)
        s = jnp.einsum("bhqd,bhkd->bhqk", qh, kh)
        pr = jax.nn.softmax(s, axis=-1)
        a = jnp.einsum("bhqk,bhkd->bhqd", pr, vh)
        a = a.transpose(0, 2, 1, 3).reshape(B, S, D)
        a = a @ p["wo_t"][l] + p["bo"][l]
        h = _layer_norm(h + a, p["ln1w"][l], p["ln1b"][l])
        f = jnp.maximum(h @ p["w1_t"][l] + p["b1"][l], 0.0)
        f = f @ p["w2_t"][l] + p["b2"][l]
        h = _layer_norm(h + f, p["ln2w"][l], p["ln2b"][l])
    flat = h.reshape(B, S * D)
    c = jnp.maximum(flat @ p["cw1_t"] + p["cb1"], 0.0)
    return c @ p["cw2_t"] + p["cb2"]


if __name__ == "__main__":
    key = jax.random.PRNGKey(0)
    pkey, xkey = jax.random.split(key)
    params = init_params(pkey)
    x = jax.random.normal(xkey, (BATCH, INPUT_DIM), dtype=jnp.float32)

    kparams = prepare_params(params, batch=BATCH)     # one-time prep, off the hot path
    fwd = jax.jit(transformer_forward)
    logits = fwd(x, kparams)
    jax.block_until_ready(logits)
    assert logits.shape == (BATCH, NUM_CLASSES)

    ref = reference_forward(x, params)
    err = float(jnp.max(jnp.abs(logits - ref)))
    if not err < 2e-3:
        raise AssertionError(f"mismatch vs reference: max abs err = {err}")
    print("KERNEL_OK")
</pallas_src>

<mosaic_0001>
module attributes {stable_mosaic.version = 11 : i64} {
  func.func @_transformer_kernel(%arg0: memref<32x1xf32, #tpu.memory_space<vmem>>, %arg1: memref<32x64xf32, #tpu.memory_space<vmem>>, %arg2: memref<32x64xf32, #tpu.memory_space<vmem>>, %arg3: memref<32x128xf32, #tpu.memory_space<vmem>>, %arg4: memref<128x64xf32, #tpu.memory_space<vmem>>, %arg5: memref<128x128xf32, #tpu.memory_space<vmem>>, %arg6: memref<2x64x64xf32, #tpu.memory_space<vmem>>, %arg7: memref<2x1x64xf32, #tpu.memory_space<vmem>>, %arg8: memref<2x64x64xf32, #tpu.memory_space<vmem>>, %arg9: memref<2x1x64xf32, #tpu.memory_space<vmem>>, %arg10: memref<2x64x64xf32, #tpu.memory_space<vmem>>, %arg11: memref<2x1x64xf32, #tpu.memory_space<vmem>>, %arg12: memref<2x64x64xf32, #tpu.memory_space<vmem>>, %arg13: memref<2x1x64xf32, #tpu.memory_space<vmem>>, %arg14: memref<2x1x64xf32, #tpu.memory_space<vmem>>, %arg15: memref<2x1x64xf32, #tpu.memory_space<vmem>>, %arg16: memref<2x64x128xf32, #tpu.memory_space<vmem>>, %arg17: memref<2x1x128xf32, #tpu.memory_space<vmem>>, %arg18: memref<2x128x64xf32, #tpu.memory_space<vmem>>, %arg19: memref<2x1x64xf32, #tpu.memory_space<vmem>>, %arg20: memref<2x1x64xf32, #tpu.memory_space<vmem>>, %arg21: memref<2x1x64xf32, #tpu.memory_space<vmem>>, %arg22: memref<8x64x128xf32, #tpu.memory_space<vmem>>, %arg23: memref<1x128xf32, #tpu.memory_space<vmem>>, %arg24: memref<128x128xf32, #tpu.memory_space<vmem>>, %arg25: memref<1x128xf32, #tpu.memory_space<vmem>>, %arg26: memref<4x128xf32, #tpu.memory_space<vmem>>) attributes {dimension_semantics = [], scalar_prefetch = 0 : i64, scratch_operands = 0 : i64, tpu.core_type = #tpu.core_type<tc>} {
    %c0 = arith.constant 0 : index
    %c0_0 = arith.constant 0 : index
    %0 = vector.load %arg0[%c0, %c0_0] : memref<32x1xf32, #tpu.memory_space<vmem>>, vector<32x1xf32>
    %c0_1 = arith.constant 0 : index
    %c0_2 = arith.constant 0 : index
    %1 = vector.load %arg1[%c0_1, %c0_2] : memref<32x64xf32, #tpu.memory_space<vmem>>, vector<32x64xf32>
    %2 = vector.broadcast %0 : vector<32x1xf32> to vector<32x64xf32>
    %3 = arith.mulf %2, %1 : vector<32x64xf32>
    %c0_3 = arith.constant 0 : index
    %c0_4 = arith.constant 0 : index
    %4 = vector.load %arg2[%c0_3, %c0_4] : memref<32x64xf32, #tpu.memory_space<vmem>>, vector<32x64xf32>
    %5 = arith.addf %3, %4 : vector<32x64xf32>
    %c0_5 = arith.constant 0 : index
    %c0_6 = arith.constant 0 : index
    %6 = vector.load %arg3[%c0_5, %c0_6] : memref<32x128xf32, #tpu.memory_space<vmem>>, vector<32x128xf32>
    %c0_7 = arith.constant 0 : index
    %c0_8 = arith.constant 0 : index
    %7 = vector.load %arg4[%c0_7, %c0_8] : memref<128x64xf32, #tpu.memory_space<vmem>>, vector<128x64xf32>
    %c0_9 = arith.constant 0 : index
    %c0_10 = arith.constant 0 : index
    %8 = vector.load %arg5[%c0_9, %c0_10] : memref<128x128xf32, #tpu.memory_space<vmem>>, vector<128x128xf32>
    %c0_11 = arith.constant 0 : index
    %c0_12 = arith.constant 0 : index
    %c0_13 = arith.constant 0 : index
    %9 = vector.load %arg6[%c0_11, %c0_12, %c0_13] : memref<2x64x64xf32, #tpu.memory_space<vmem>>, vector<1x64x64xf32>
    %10 = vector.shape_cast %9 : vector<1x64x64xf32> to vector<64x64xf32>
    %cst = arith.constant dense<0.000000e+00> : vector<32x64xf32>
    %11 = tpu.matmul %5, %10, %cst {dimension_numbers = #tpu.dot_dimension_numbers<[1], [0], [0], [1], [0, 0, 1, 1], [], []>} : vector<32x64xf32>, vector<64x64xf32>, vector<32x64xf32> -> vector<32x64xf32>
    %c0_14 = arith.constant 0 : index
    %c0_15 = arith.constant 0 : index
    %c0_16 = arith.constant 0 : index
    %12 = vector.load %arg7[%c0_14, %c0_15, %c0_16] : memref<2x1x64xf32, #tpu.memory_space<vmem>>, vector<1x1x64xf32>
    %13 = vector.shape_cast %12 : vector<1x1x64xf32> to vector<1x64xf32>
    %14 = vector.broadcast %13 : vector<1x64xf32> to vector<32x64xf32>
    %15 = arith.addf %11, %14 : vector<32x64xf32>
    %c0_17 = arith.constant 0 : index
    %c0_18 = arith.constant 0 : index
    %c0_19 = arith.constant 0 : index
    %16 = vector.load %arg8[%c0_17, %c0_18, %c0_19] : memref<2x64x64xf32, #tpu.memory_space<vmem>>, vector<1x64x64xf32>
    %17 = vector.shape_cast %16 : vector<1x64x64xf32> to vector<64x64xf32>
    %cst_20 = arith.constant dense<0.000000e+00> : vector<32x64xf32>
    %18 = tpu.matmul %5, %17, %cst_20 {dimension_numbers = #tpu.dot_dimension_numbers<[1], [0], [0], [1], [0, 0, 1, 1], [], []>} : vector<32x64xf32>, vector<64x64xf32>, vector<32x64xf32> -> vector<32x64xf32>
    %c0_21 = arith.constant 0 : index
    %c0_22 = arith.constant 0 : index
    %c0_23 = arith.constant 0 : index
    %19 = vector.load %arg9[%c0_21, %c0_22, %c0_23] : memref<2x1x64xf32, #tpu.memory_space<vmem>>, vector<1x1x64xf32>
    %20 = vector.shape_cast %19 : vector<1x1x64xf32> to vector<1x64xf32>
    %21 = vector.broadcast %20 : vector<1x64xf32> to vector<32x64xf32>
    %22 = arith.addf %18, %21 : vector<32x64xf32>
    %c0_24 = arith.constant 0 : index
    %c0_25 = arith.constant 0 : index
    %c0_26 = arith.constant 0 : index
    %23 = vector.load %arg10[%c0_24, %c0_25, %c0_26] : memref<2x64x64xf32, #tpu.memory_space<vmem>>, vector<1x64x64xf32>
    %24 = vector.shape_cast %23 : vector<1x64x64xf32> to vector<64x64xf32>
    %cst_27 = arith.constant dense<0.000000e+00> : vector<32x64xf32>
    %25 = tpu.matmul %5, %24, %cst_27 {dimension_numbers = #tpu.dot_dimension_numbers<[1], [0], [0], [1], [0, 0, 1, 1], [], []>} : vector<32x64xf32>, vector<64x64xf32>, vector<32x64xf32> -> vector<32x64xf32>
    %c0_28 = arith.constant 0 : index
    %c0_29 = arith.constant 0 : index
    %c0_30 = arith.constant 0 : index
    %26 = vector.load %arg11[%c0_28, %c0_29, %c0_30] : memref<2x1x64xf32, #tpu.memory_space<vmem>>, vector<1x1x64xf32>
    %27 = vector.shape_cast %26 : vector<1x1x64xf32> to vector<1x64xf32>
    %28 = vector.broadcast %27 : vector<1x64xf32> to vector<32x64xf32>
    %29 = arith.addf %25, %28 : vector<32x64xf32>
    %30 = tpu.concatenate %22, %22, %22, %22 in 0 : vector<32x64xf32>, vector<32x64xf32>, vector<32x64xf32>, vector<32x64xf32> -> vector<128x64xf32>
    %31 = arith.mulf %30, %7 : vector<128x64xf32>
    %32 = tpu.concatenate %29, %29, %29, %29 in 0 : vector<32x64xf32>, vector<32x64xf32>, vector<32x64xf32>, vector<32x64xf32> -> vector<128x64xf32>
    %33 = arith.mulf %32, %7 : vector<128x64xf32>
    %cst_31 = arith.constant dense<0.000000e+00> : vector<32x128xf32>
    %34 = tpu.matmul %15, %31, %cst_31 {dimension_numbers = #tpu.dot_dimension_numbers<[1], [1], [0], [0], [0, 0, 1, 0], [], []>} : vector<32x64xf32>, vector<128x64xf32>, vector<32x128xf32> -> vector<32x128xf32>
    %35 = arith.addf %34, %6 : vector<32x128xf32>
    %cst_32 = arith.constant dense<0xFF800000> : vector<32xf32>
    %36 = vector.multi_reduction <maximumf>, %35, %cst_32 [1] : vector<32x128xf32> to vector<32xf32>
    %37 = vector.shape_cast %36 : vector<32xf32> to vector<32x1xf32>
    %38 = vector.broadcast %37 : vector<32x1xf32> to vector<32x128xf32>
    %39 = arith.subf %35, %38 : vector<32x128xf32>
    %40 = math.exp %39 : vector<32x128xf32>
    %cst_33 = arith.constant dense<0.000000e+00> : vector<32x128xf32>
    %41 = tpu.matmul %40, %8, %cst_33 {dimension_numbers = #tpu.dot_dimension_numbers<[1], [0], [0], [1], [0, 0, 1, 1], [], []>} : vector<32x128xf32>, vector<128x128xf32>, vector<32x128xf32> -> vector<32x128xf32>
    %42 = arith.divf %40, %41 : vector<32x128xf32>
    %cst_34 = arith.constant dense<0.000000e+00> : vector<32x64xf32>
    %43 = tpu.matmul %42, %33, %cst_34 {dimension_numbers = #tpu.dot_dimension_numbers<[1], [0], [0], [1], [0, 0, 1, 1], [], []>} : vector<32x128xf32>, vector<128x64xf32>, vector<32x64xf32> -> vector<32x64xf32>
    %c0_35 = arith.constant 0 : index
    %c0_36 = arith.constant 0 : index
    %c0_37 = arith.constant 0 : index
    %44 = vector.load %arg12[%c0_35, %c0_36, %c0_37] : memref<2x64x64xf32, #tpu.memory_space<vmem>>, vector<1x64x64xf32>
    %45 = vector.shape_cast %44 : vector<1x64x64xf32> to vector<64x64xf32>
    %cst_38 = arith.constant dense<0.000000e+00> : vector<32x64xf32>
    %46 = tpu.matmul %43, %45, %cst_38 {dimension_numbers = #tpu.dot_dimension_numbers<[1], [0], [0], [1], [0, 0, 1, 1], [], []>} : vector<32x64xf32>, vector<64x64xf32>, vector<32x64xf32> -> vector<32x64xf32>
    %c0_39 = arith.constant 0 : index
    %c0_40 = arith.constant 0 : index
    %c0_41 = arith.constant 0 : index
    %47 = vector.load %arg13[%c0_39, %c0_40, %c0_41] : memref<2x1x64xf32, #tpu.memory_space<vmem>>, vector<1x1x64xf32>
    %48 = vector.shape_cast %47 : vector<1x1x64xf32> to vector<1x64xf32>
    %49 = vector.broadcast %48 : vector<1x64xf32> to vector<32x64xf32>
    %50 = arith.addf %46, %49 : vector<32x64xf32>
    %51 = arith.addf %5, %50 : vector<32x64xf32>
    %c0_42 = arith.constant 0 : index
    %c0_43 = arith.constant 0 : index
    %c0_44 = arith.constant 0 : index
    %52 = vector.load %arg14[%c0_42, %c0_43, %c0_44] : memref<2x1x64xf32, #tpu.memory_space<vmem>>, vector<1x1x64xf32>
    %53 = vector.shape_cast %52 : vector<1x1x64xf32> to vector<1x64xf32>
    %c0_45 = arith.constant 0 : index
    %c0_46 = arith.constant 0 : index
    %c0_47 = arith.constant 0 : index
    %54 = vector.load %arg15[%c0_45, %c0_46, %c0_47] : memref<2x1x64xf32, #tpu.memory_space<vmem>>, vector<1x1x64xf32>
    %55 = vector.shape_cast %54 : vector<1x1x64xf32> to vector<1x64xf32>
    %cst_48 = arith.constant dense<0.000000e+00> : vector<32xf32>
    %56 = vector.multi_reduction <add>, %51, %cst_48 [1] : vector<32x64xf32> to vector<32xf32>
    %57 = vector.shape_cast %56 : vector<32xf32> to vector<32x1xf32>
    %cst_49 = arith.constant 6.400000e+01 : f32
    %58 = vector.broadcast %cst_49 : f32 to vector<32x1xf32>
    %59 = arith.divf %57, %58 : vector<32x1xf32>
    %60 = vector.broadcast %59 : vector<32x1xf32> to vector<32x64xf32>
    %61 = arith.subf %51, %60 : vector<32x64xf32>
    %62 = arith.mulf %61, %61 : vector<32x64xf32>
    %cst_50 = arith.constant dense<0.000000e+00> : vector<32xf32>
    %63 = vector.multi_reduction <add>, %62, %cst_50 [1] : vector<32x64xf32> to vector<32xf32>
    %64 = vector.shape_cast %63 : vector<32xf32> to vector<32x1xf32>
    %cst_51 = arith.constant 6.400000e+01 : f32
    %65 = vector.broadcast %cst_51 : f32 to vector<32x1xf32>
    %66 = arith.divf %64, %65 : vector<32x1xf32>
    %67 = vector.broadcast %59 : vector<32x1xf32> to vector<32x64xf32>
    %68 = arith.subf %51, %67 : vector<32x64xf32>
    %cst_52 = arith.constant 9.99999974E-6 : f32
    %69 = vector.broadcast %cst_52 : f32 to vector<32x1xf32>
    %70 = arith.addf %66, %69 : vector<32x1xf32>
    %71 = math.rsqrt %70 : vector<32x1xf32>
    %72 = vector.broadcast %71 : vector<32x1xf32> to vector<32x64xf32>
    %73 = arith.mulf %68, %72 : vector<32x64xf32>
    %74 = vector.broadcast %53 : vector<1x64xf32> to vector<32x64xf32>
    %75 = arith.mulf %73, %74 : vector<32x64xf32>
    %76 = vector.broadcast %55 : vector<1x64xf32> to vector<32x64xf32>
    %77 = arith.addf %75, %76 : vector<32x64xf32>
    %c0_53 = arith.constant 0 : index
    %c0_54 = arith.constant 0 : index
    %c0_55 = arith.constant 0 : index
    %78 = vector.load %arg16[%c0_53, %c0_54, %c0_55] : memref<2x64x128xf32, #tpu.memory_space<vmem>>, vector<1x64x128xf32>
    %79 = vector.shape_cast %78 : vector<1x64x128xf32> to vector<64x128xf32>
    %cst_56 = arith.constant dense<0.000000e+00> : vector<32x128xf32>
    %80 = tpu.matmul %77, %79, %cst_56 {dimension_numbers = #tpu.dot_dimension_numbers<[1], [0], [0], [1], [0, 0, 1, 1], [], []>} : vector<32x64xf32>, vector<64x128xf32>, vector<32x128xf32> -> vector<32x128xf32>
    %c0_57 = arith.constant 0 : index
    %c0_58 = arith.constant 0 : index
    %c0_59 = arith.constant 0 : index
    %81 = vector.load %arg17[%c0_57, %c0_58, %c0_59] : memref<2x1x128xf32, #tpu.memory_space<vmem>>, vector<1x1x128xf32>
    %82 = vector.shape_cast %81 : vector<1x1x128xf32> to vector<1x128xf32>
    %83 = vector.broadcast %82 : vector<1x128xf32> to vector<32x128xf32>
    %84 = arith.addf %80, %83 : vector<32x128xf32>
    %cst_60 = arith.constant 0.000000e+00 : f32
    %85 = vector.broadcast %cst_60 : f32 to vector<32x128xf32>
    %86 = arith.maximumf %84, %85 : vector<32x128xf32>
    %c0_61 = arith.constant 0 : index
    %c0_62 = arith.constant 0 : index
    %c0_63 = arith.constant 0 : index
    %87 = vector.load %arg18[%c0_61, %c0_62, %c0_63] : memref<2x128x64xf32, #tpu.memory_space<vmem>>, vector<1x128x64xf32>
    %88 = vector.shape_cast %87 : vector<1x128x64xf32> to vector<128x64xf32>
    %cst_64 = arith.constant dense<0.000000e+00> : vector<32x64xf32>
    %89 = tpu.matmul %86, %88, %cst_64 {dimension_numbers = #tpu.dot_dimension_numbers<[1], [0], [0], [1], [0, 0, 1, 1], [], []>} : vector<32x128xf32>, vector<128x64xf32>, vector<32x64xf32> -> vector<32x64xf32>
    %c0_65 = arith.constant 0 : index
    %c0_66 = arith.constant 0 : index
    %c0_67 = arith.constant 0 : index
    %90 = vector.load %arg19[%c0_65, %c0_66, %c0_67] : memref<2x1x64xf32, #tpu.memory_space<vmem>>, vector<1x1x64xf32>
    %91 = vector.shape_cast %90 : vector<1x1x64xf32> to vector<1x64xf32>
    %92 = vector.broadcast %91 : vector<1x64xf32> to vector<32x64xf32>
    %93 = arith.addf %89, %92 : vector<32x64xf32>
    %94 = arith.addf %77, %93 : vector<32x64xf32>
    %c0_68 = arith.constant 0 : index
    %c0_69 = arith.constant 0 : index
    %c0_70 = arith.constant 0 : index
    %95 = vector.load %arg20[%c0_68, %c0_69, %c0_70] : memref<2x1x64xf32, #tpu.memory_space<vmem>>, vector<1x1x64xf32>
    %96 = vector.shape_cast %95 : vector<1x1x64xf32> to vector<1x64xf32>
    %c0_71 = arith.constant 0 : index
    %c0_72 = arith.constant 0 : index
    %c0_73 = arith.constant 0 : index
    %97 = vector.load %arg21[%c0_71, %c0_72, %c0_73] : memref<2x1x64xf32, #tpu.memory_space<vmem>>, vector<1x1x64xf32>
    %98 = vector.shape_cast %97 : vector<1x1x64xf32> to vector<1x64xf32>
    %cst_74 = arith.constant dense<0.000000e+00> : vector<32xf32>
    %99 = vector.multi_reduction <add>, %94, %cst_74 [1] : vector<32x64xf32> to vector<32xf32>
    %100 = vector.shape_cast %99 : vector<32xf32> to vector<32x1xf32>
    %cst_75 = arith.constant 6.400000e+01 : f32
    %101 = vector.broadcast %cst_75 : f32 to vector<32x1xf32>
    %102 = arith.divf %100, %101 : vector<32x1xf32>
    %103 = vector.broadcast %102 : vector<32x1xf32> to vector<32x64xf32>
    %104 = arith.subf %94, %103 : vector<32x64xf32>
    %105 = arith.mulf %104, %104 : vector<32x64xf32>
    %cst_76 = arith.constant dense<0.000000e+00> : vector<32xf32>
    %106 = vector.multi_reduction <add>, %105, %cst_76 [1] : vector<32x64xf32> to vector<32xf32>
    %107 = vector.shape_cast %106 : vector<32xf32> to vector<32x1xf32>
    %cst_77 = arith.constant 6.400000e+01 : f32
    %108 = vector.broadcast %cst_77 : f32 to vector<32x1xf32>
    %109 = arith.divf %107, %108 : vector<32x1xf32>
    %110 = vector.broadcast %102 : vector<32x1xf32> to vector<32x64xf32>
    %111 = arith.subf %94, %110 : vector<32x64xf32>
    %cst_78 = arith.constant 9.99999974E-6 : f32
    %112 = vector.broadcast %cst_78 : f32 to vector<32x1xf32>
    %113 = arith.addf %109, %112 : vector<32x1xf32>
    %114 = math.rsqrt %113 : vector<32x1xf32>
    %115 = vector.broadcast %114 : vector<32x1xf32> to vector<32x64xf32>
    %116 = arith.mulf %111, %115 : vector<32x64xf32>
    %117 = vector.broadcast %96 : vector<1x64xf32> to vector<32x64xf32>
    %118 = arith.mulf %116, %117 : vector<32x64xf32>
    %119 = vector.broadcast %98 : vector<1x64xf32> to vector<32x64xf32>
    %120 = arith.addf %118, %119 : vector<32x64xf32>
    %c1 = arith.constant 1 : index
    %c0_79 = arith.constant 0 : index
    %c0_80 = arith.constant 0 : index
    %121 = vector.load %arg6[%c1, %c0_79, %c0_80] : memref<2x64x64xf32, #tpu.memory_space<vmem>>, vector<1x64x64xf32>
    %122 = vector.shape_cast %121 : vector<1x64x64xf32> to vector<64x64xf32>
    %cst_81 = arith.constant dense<0.000000e+00> : vector<32x64xf32>
    %123 = tpu.matmul %120, %122, %cst_81 {dimension_numbers = #tpu.dot_dimension_numbers<[1], [0], [0], [1], [0, 0, 1, 1], [], []>} : vector<32x64xf32>, vector<64x64xf32>, vector<32x64xf32> -> vector<32x64xf32>
    %c1_82 = arith.constant 1 : index
    %c0_83 = arith.constant 0 : index
    %c0_84 = arith.constant 0 : index
    %124 = vector.load %arg7[%c1_82, %c0_83, %c0_84] : memref<2x1x64xf32, #tpu.memory_space<vmem>>, vector<1x1x64xf32>
    %125 = vector.shape_cast %124 : vector<1x1x64xf32> to vector<1x64xf32>
    %126 = vector.broadcast %125 : vector<1x64xf32> to vector<32x64xf32>
    %127 = arith.addf %123, %126 : vector<32x64xf32>
    %c1_85 = arith.constant 1 : index
    %c0_86 = arith.constant 0 : index
    %c0_87 = arith.constant 0 : index
    %128 = vector.load %arg8[%c1_85, %c0_86, %c0_87] : memref<2x64x64xf32, #tpu.memory_space<vmem>>, vector<1x64x64xf32>
    %129 = vector.shape_cast %128 : vector<1x64x64xf32> to vector<64x64xf32>
    %cst_88 = arith.constant dense<0.000000e+00> : vector<32x64xf32>
    %130 = tpu.matmul %120, %129, %cst_88 {dimension_numbers = #tpu.dot_dimension_numbers<[1], [0], [0], [1], [0, 0, 1, 1], [], []>} : vector<32x64xf32>, vector<64x64xf32>, vector<32x64xf32> -> vector<32x64xf32>
    %c1_89 = arith.constant 1 : index
    %c0_90 = arith.constant 0 : index
    %c0_91 = arith.constant 0 : index
    %131 = vector.load %arg9[%c1_89, %c0_90, %c0_91] : memref<2x1x64xf32, #tpu.memory_space<vmem>>, vector<1x1x64xf32>
    %132 = vector.shape_cast %131 : vector<1x1x64xf32> to vector<1x64xf32>
    %133 = vector.broadcast %132 : vector<1x64xf32> to vector<32x64xf32>
    %134 = arith.addf %130, %133 : vector<32x64xf32>
    %c1_92 = arith.constant 1 : index
    %c0_93 = arith.constant 0 : index
    %c0_94 = arith.constant 0 : index
    %135 = vector.load %arg10[%c1_92, %c0_93, %c0_94] : memref<2x64x64xf32, #tpu.memory_space<vmem>>, vector<1x64x64xf32>
    %136 = vector.shape_cast %135 : vector<1x64x64xf32> to vector<64x64xf32>
    %cst_95 = arith.constant dense<0.000000e+00> : vector<32x64xf32>
    %137 = tpu.matmul %120, %136, %cst_95 {dimension_numbers = #tpu.dot_dimension_numbers<[1], [0], [0], [1], [0, 0, 1, 1], [], []>} : vector<32x64xf32>, vector<64x64xf32>, vector<32x64xf32> -> vector<32x64xf32>
    %c1_96 = arith.constant 1 : index
    %c0_97 = arith.constant 0 : index
    %c0_98 = arith.constant 0 : index
    %138 = vector.load %arg11[%c1_96, %c0_97, %c0_98] : memref<2x1x64xf32, #tpu.memory_space<vmem>>, vector<1x1x64xf32>
    %139 = vector.shape_cast %138 : vector<1x1x64xf32> to vector<1x64xf32>
    %140 = vector.broadcast %139 : vector<1x64xf32> to vector<32x64xf32>
    %141 = arith.addf %137, %140 : vector<32x64xf32>
    %142 = tpu.concatenate %134, %134, %134, %134 in 0 : vector<32x64xf32>, vector<32x64xf32>, vector<32x64xf32>, vector<32x64xf32> -> vector<128x64xf32>
    %143 = arith.mulf %142, %7 : vector<128x64xf32>
    %144 = tpu.concatenate %141, %141, %141, %141 in 0 : vector<32x64xf32>, vector<32x64xf32>, vector<32x64xf32>, vector<32x64xf32> -> vector<128x64xf32>
    %145 = arith.mulf %144, %7 : vector<128x64xf32>
    %cst_99 = arith.constant dense<0.000000e+00> : vector<32x128xf32>
    %146 = tpu.matmul %127, %143, %cst_99 {dimension_numbers = #tpu.dot_dimension_numbers<[1], [1], [0], [0], [0, 0, 1, 0], [], []>} : vector<32x64xf32>, vector<128x64xf32>, vector<32x128xf32> -> vector<32x128xf32>
    %147 = arith.addf %146, %6 : vector<32x128xf32>
    %cst_100 = arith.constant dense<0xFF800000> : vector<32xf32>
    %148 = vector.multi_reduction <maximumf>, %147, %cst_100 [1] : vector<32x128xf32> to vector<32xf32>
    %149 = vector.shape_cast %148 : vector<32xf32> to vector<32x1xf32>
    %150 = vector.broadcast %149 : vector<32x1xf32> to vector<32x128xf32>
    %151 = arith.subf %147, %150 : vector<32x128xf32>
    %152 = math.exp %151 : vector<32x128xf32>
    %cst_101 = arith.constant dense<0.000000e+00> : vector<32x128xf32>
    %153 = tpu.matmul %152, %8, %cst_101 {dimension_numbers = #tpu.dot_dimension_numbers<[1], [0], [0], [1], [0, 0, 1, 1], [], []>} : vector<32x128xf32>, vector<128x128xf32>, vector<32x128xf32> -> vector<32x128xf32>
    %154 = arith.divf %152, %153 : vector<32x128xf32>
    %cst_102 = arith.constant dense<0.000000e+00> : vector<32x64xf32>
    %155 = tpu.matmul %154, %145, %cst_102 {dimension_numbers = #tpu.dot_dimension_numbers<[1], [0], [0], [1], [0, 0, 1, 1], [], []>} : vector<32x128xf32>, vector<128x64xf32>, vector<32x64xf32> -> vector<32x64xf32>
    %c1_103 = arith.constant 1 : index
    %c0_104 = arith.constant 0 : index
    %c0_105 = arith.constant 0 : index
    %156 = vector.load %arg12[%c1_103, %c0_104, %c0_105] : memref<2x64x64xf32, #tpu.memory_space<vmem>>, vector<1x64x64xf32>
    %157 = vector.shape_cast %156 : vector<1x64x64xf32> to vector<64x64xf32>
    %cst_106 = arith.constant dense<0.000000e+00> : vector<32x64xf32>
    %158 = tpu.matmul %155, %157, %cst_106 {dimension_numbers = #tpu.dot_dimension_numbers<[1], [0], [0], [1], [0, 0, 1, 1], [], []>} : vector<32x64xf32>, vector<64x64xf32>, vector<32x64xf32> -> vector<32x64xf32>
    %c1_107 = arith.constant 1 : index
    %c0_108 = arith.constant 0 : index
    %c0_109 = arith.constant 0 : index
    %159 = vector.load %arg13[%c1_107, %c0_108, %c0_109] : memref<2x1x64xf32, #tpu.memory_space<vmem>>, vector<1x1x64xf32>
    %160 = vector.shape_cast %159 : vector<1x1x64xf32> to vector<1x64xf32>
    %161 = vector.broadcast %160 : vector<1x64xf32> to vector<32x64xf32>
    %162 = arith.addf %158, %161 : vector<32x64xf32>
    %163 = arith.addf %120, %162 : vector<32x64xf32>
    %c1_110 = arith.constant 1 : index
    %c0_111 = arith.constant 0 : index
    %c0_112 = arith.constant 0 : index
    %164 = vector.load %arg14[%c1_110, %c0_111, %c0_112] : memref<2x1x64xf32, #tpu.memory_space<vmem>>, vector<1x1x64xf32>
    %165 = vector.shape_cast %164 : vector<1x1x64xf32> to vector<1x64xf32>
    %c1_113 = arith.constant 1 : index
    %c0_114 = arith.constant 0 : index
    %c0_115 = arith.constant 0 : index
    %166 = vector.load %arg15[%c1_113, %c0_114, %c0_115] : memref<2x1x64xf32, #tpu.memory_space<vmem>>, vector<1x1x64xf32>
    %167 = vector.shape_cast %166 : vector<1x1x64xf32> to vector<1x64xf32>
    %cst_116 = arith.constant dense<0.000000e+00> : vector<32xf32>
    %168 = vector.multi_reduction <add>, %163, %cst_116 [1] : vector<32x64xf32> to vector<32xf32>
    %169 = vector.shape_cast %168 : vector<32xf32> to vector<32x1xf32>
    %cst_117 = arith.constant 6.400000e+01 : f32
    %170 = vector.broadcast %cst_117 : f32 to vector<32x1xf32>
    %171 = arith.divf %169, %170 : vector<32x1xf32>
    %172 = vector.broadcast %171 : vector<32x1xf32> to vector<32x64xf32>
    %173 = arith.subf %163, %172 : vector<32x64xf32>
    %174 = arith.mulf %173, %173 : vector<32x64xf32>
    %cst_118 = arith.constant dense<0.000000e+00> : vector<32xf32>
    %175 = vector.multi_reduction <add>, %174, %cst_118 [1] : vector<32x64xf32> to vector<32xf32>
    %176 = vector.shape_cast %175 : vector<32xf32> to vector<32x1xf32>
    %cst_119 = arith.constant 6.400000e+01 : f32
    %177 = vector.broadcast %cst_119 : f32 to vector<32x1xf32>
    %178 = arith.divf %176, %177 : vector<32x1xf32>
    %179 = vector.broadcast %171 : vector<32x1xf32> to vector<32x64xf32>
    %180 = arith.subf %163, %179 : vector<32x64xf32>
    %cst_120 = arith.constant 9.99999974E-6 : f32
    %181 = vector.broadcast %cst_120 : f32 to vector<32x1xf32>
    %182 = arith.addf %178, %181 : vector<32x1xf32>
    %183 = math.rsqrt %182 : vector<32x1xf32>
    %184 = vector.broadcast %183 : vector<32x1xf32> to vector<32x64xf32>
    %185 = arith.mulf %180, %184 : vector<32x64xf32>
    %186 = vector.broadcast %165 : vector<1x64xf32> to vector<32x64xf32>
    %187 = arith.mulf %185, %186 : vector<32x64xf32>
    %188 = vector.broadcast %167 : vector<1x64xf32> to vector<32x64xf32>
    %189 = arith.addf %187, %188 : vector<32x64xf32>
    %c1_121 = arith.constant 1 : index
    %c0_122 = arith.constant 0 : index
    %c0_123 = arith.constant 0 : index
    %190 = vector.load %arg16[%c1_121, %c0_122, %c0_123] : memref<2x64x128xf32, #tpu.memory_space<vmem>>, vector<1x64x128xf32>
    %191 = vector.shape_cast %190 : vector<1x64x128xf32> to vector<64x128xf32>
    %cst_124 = arith.constant dense<0.000000e+00> : vector<32x128xf32>
    %192 = tpu.matmul %189, %191, %cst_124 {dimension_numbers = #tpu.dot_dimension_numbers<[1], [0], [0], [1], [0, 0, 1, 1], [], []>} : vector<32x64xf32>, vector<64x128xf32>, vector<32x128xf32> -> vector<32x128xf32>
    %c1_125 = arith.constant 1 : index
    %c0_126 = arith.constant 0 : index
    %c0_127 = arith.constant 0 : index
    %193 = vector.load %arg17[%c1_125, %c0_126, %c0_127] : memref<2x1x128xf32, #tpu.memory_space<vmem>>, vector<1x1x128xf32>
    %194 = vector.shape_cast %193 : vector<1x1x128xf32> to vector<1x128xf32>
    %195 = vector.broadcast %194 : vector<1x128xf32> to vector<32x128xf32>
    %196 = arith.addf %192, %195 : vector<32x128xf32>
    %cst_128 = arith.constant 0.000000e+00 : f32
    %197 = vector.broadcast %cst_128 : f32 to vector<32x128xf32>
    %198 = arith.maximumf %196, %197 : vector<32x128xf32>
    %c1_129 = arith.constant 1 : index
    %c0_130 = arith.constant 0 : index
    %c0_131 = arith.constant 0 : index
    %199 = vector.load %arg18[%c1_129, %c0_130, %c0_131] : memref<2x128x64xf32, #tpu.memory_space<vmem>>, vector<1x128x64xf32>
    %200 = vector.shape_cast %199 : vector<1x128x64xf32> to vector<128x64xf32>
    %cst_132 = arith.constant dense<0.000000e+00> : vector<32x64xf32>
    %201 = tpu.matmul %198, %200, %cst_132 {dimension_numbers = #tpu.dot_dimension_numbers<[1], [0], [0], [1], [0, 0, 1, 1], [], []>} : vector<32x128xf32>, vector<128x64xf32>, vector<32x64xf32> -> vector<32x64xf32>
    %c1_133 = arith.constant 1 : index
    %c0_134 = arith.constant 0 : index
    %c0_135 = arith.constant 0 : index
    %202 = vector.load %arg19[%c1_133, %c0_134, %c0_135] : memref<2x1x64xf32, #tpu.memory_space<vmem>>, vector<1x1x64xf32>
    %203 = vector.shape_cast %202 : vector<1x1x64xf32> to vector<1x64xf32>
    %204 = vector.broadcast %203 : vector<1x64xf32> to vector<32x64xf32>
    %205 = arith.addf %201, %204 : vector<32x64xf32>
    %206 = arith.addf %189, %205 : vector<32x64xf32>
    %c1_136 = arith.constant 1 : index
    %c0_137 = arith.constant 0 : index
    %c0_138 = arith.constant 0 : index
    %207 = vector.load %arg20[%c1_136, %c0_137, %c0_138] : memref<2x1x64xf32, #tpu.memory_space<vmem>>, vector<1x1x64xf32>
    %208 = vector.shape_cast %207 : vector<1x1x64xf32> to vector<1x64xf32>
    %c1_139 = arith.constant 1 : index
    %c0_140 = arith.constant 0 : index
    %c0_141 = arith.constant 0 : index
    %209 = vector.load %arg21[%c1_139, %c0_140, %c0_141] : memref<2x1x64xf32, #tpu.memory_space<vmem>>, vector<1x1x64xf32>
    %210 = vector.shape_cast %209 : vector<1x1x64xf32> to vector<1x64xf32>
    %cst_142 = arith.constant dense<0.000000e+00> : vector<32xf32>
    %211 = vector.multi_reduction <add>, %206, %cst_142 [1] : vector<32x64xf32> to vector<32xf32>
    %212 = vector.shape_cast %211 : vector<32xf32> to vector<32x1xf32>
    %cst_143 = arith.constant 6.400000e+01 : f32
    %213 = vector.broadcast %cst_143 : f32 to vector<32x1xf32>
    %214 = arith.divf %212, %213 : vector<32x1xf32>
    %215 = vector.broadcast %214 : vector<32x1xf32> to vector<32x64xf32>
    %216 = arith.subf %206, %215 : vector<32x64xf32>
    %217 = arith.mulf %216, %216 : vector<32x64xf32>
    %cst_144 = arith.constant dense<0.000000e+00> : vector<32xf32>
    %218 = vector.multi_reduction <add>, %217, %cst_144 [1] : vector<32x64xf32> to vector<32xf32>
    %219 = vector.shape_cast %218 : vector<32xf32> to vector<32x1xf32>
    %cst_145 = arith.constant 6.400000e+01 : f32
    %220 = vector.broadcast %cst_145 : f32 to vector<32x1xf32>
    %221 = arith.divf %219, %220 : vector<32x1xf32>
    %222 = vector.broadcast %214 : vector<32x1xf32> to vector<32x64xf32>
    %223 = arith.subf %206, %222 : vector<32x64xf32>
    %cst_146 = arith.constant 9.99999974E-6 : f32
    %224 = vector.broadcast %cst_146 : f32 to vector<32x1xf32>
    %225 = arith.addf %221, %224 : vector<32x1xf32>
    %226 = math.rsqrt %225 : vector<32x1xf32>
    %227 = vector.broadcast %226 : vector<32x1xf32> to vector<32x64xf32>
    %228 = arith.mulf %223, %227 : vector<32x64xf32>
    %229 = vector.broadcast %208 : vector<1x64xf32> to vector<32x64xf32>
    %230 = arith.mulf %228, %229 : vector<32x64xf32>
    %231 = vector.broadcast %210 : vector<1x64xf32> to vector<32x64xf32>
    %232 = arith.addf %230, %231 : vector<32x64xf32>
    %cst_147 = arith.constant 0.000000e+00 : f32
    %233 = vector.broadcast %cst_147 : f32 to vector<4x128xf32>
    %c0_148 = arith.constant 0 : index
    %c0_149 = arith.constant 0 : index
    %234 = vector.load %arg23[%c0_148, %c0_149] : memref<1x128xf32, #tpu.memory_space<vmem>>, vector<1x128xf32>
    %235 = vector.broadcast %234 : vector<1x128xf32> to vector<4x128xf32>
    %236 = arith.addf %233, %235 : vector<4x128xf32>
    %237 = vector.extract_strided_slice %232 {offsets = [0, 0], sizes = [4, 64], strides = [1, 1]} : vector<32x64xf32> to vector<4x64xf32>
    %c0_150 = arith.constant 0 : index
    %c0_151 = arith.constant 0 : index
    %c0_152 = arith.constant 0 : index
    %238 = vector.load %arg22[%c0_150, %c0_151, %c0_152] : memref<8x64x128xf32, #tpu.memory_space<vmem>>, vector<1x64x128xf32>
    %239 = vector.shape_cast %238 : vector<1x64x128xf32> to vector<64x128xf32>
    %cst_153 = arith.constant dense<0.000000e+00> : vector<4x128xf32>
    %240 = tpu.matmul %237, %239, %cst_153 {dimension_numbers = #tpu.dot_dimension_numbers<[1], [0], [0], [1], [0, 0, 1, 1], [], []>} : vector<4x64xf32>, vector<64x128xf32>, vector<4x128xf32> -> vector<4x128xf32>
    %241 = arith.addf %236, %240 : vector<4x128xf32>
    %242 = vector.extract_strided_slice %232 {offsets = [4, 0], sizes = [4, 64], strides = [1, 1]} : vector<32x64xf32> to vector<4x64xf32>
    %c1_154 = arith.constant 1 : index
    %c0_155 = arith.constant 0 : index
    %c0_156 = arith.constant 0 : index
    %243 = vector.load %arg22[%c1_154, %c0_155, %c0_156] : memref<8x64x128xf32, #tpu.memory_space<vmem>>, vector<1x64x128xf32>
    %244 = vector.shape_cast %243 : vector<1x64x128xf32> to vector<64x128xf32>
    %cst_157 = arith.constant dense<0.000000e+00> : vector<4x128xf32>
    %245 = tpu.matmul %242, %244, %cst_157 {dimension_numbers = #tpu.dot_dimension_numbers<[1], [0], [0], [1], [0, 0, 1, 1], [], []>} : vector<4x64xf32>, vector<64x128xf32>, vector<4x128xf32> -> vector<4x128xf32>
    %246 = arith.addf %241, %245 : vector<4x128xf32>
    %247 = vector.extract_strided_slice %232 {offsets = [8, 0], sizes = [4, 64], strides = [1, 1]} : vector<32x64xf32> to vector<4x64xf32>
    %c2 = arith.constant 2 : index
    %c0_158 = arith.constant 0 : index
    %c0_159 = arith.constant 0 : index
    %248 = vector.load %arg22[%c2, %c0_158, %c0_159] : memref<8x64x128xf32, #tpu.memory_space<vmem>>, vector<1x64x128xf32>
    %249 = vector.shape_cast %248 : vector<1x64x128xf32> to vector<64x128xf32>
    %cst_160 = arith.constant dense<0.000000e+00> : vector<4x128xf32>
    %250 = tpu.matmul %247, %249, %cst_160 {dimension_numbers = #tpu.dot_dimension_numbers<[1], [0], [0], [1], [0, 0, 1, 1], [], []>} : vector<4x64xf32>, vector<64x128xf32>, vector<4x128xf32> -> vector<4x128xf32>
    %251 = arith.addf %246, %250 : vector<4x128xf32>
    %252 = vector.extract_strided_slice %232 {offsets = [12, 0], sizes = [4, 64], strides = [1, 1]} : vector<32x64xf32> to vector<4x64xf32>
    %c3 = arith.constant 3 : index
    %c0_161 = arith.constant 0 : index
    %c0_162 = arith.constant 0 : index
    %253 = vector.load %arg22[%c3, %c0_161, %c0_162] : memref<8x64x128xf32, #tpu.memory_space<vmem>>, vector<1x64x128xf32>
    %254 = vector.shape_cast %253 : vector<1x64x128xf32> to vector<64x128xf32>
    %cst_163 = arith.constant dense<0.000000e+00> : vector<4x128xf32>
    %255 = tpu.matmul %252, %254, %cst_163 {dimension_numbers = #tpu.dot_dimension_numbers<[1], [0], [0], [1], [0, 0, 1, 1], [], []>} : vector<4x64xf32>, vector<64x128xf32>, vector<4x128xf32> -> vector<4x128xf32>
    %256 = arith.addf %251, %255 : vector<4x128xf32>
    %257 = vector.extract_strided_slice %232 {offsets = [16, 0], sizes = [4, 64], strides = [1, 1]} : vector<32x64xf32> to vector<4x64xf32>
    %c4 = arith.constant 4 : index
    %c0_164 = arith.constant 0 : index
    %c0_165 = arith.constant 0 : index
    %258 = vector.load %arg22[%c4, %c0_164, %c0_165] : memref<8x64x128xf32, #tpu.memory_space<vmem>>, vector<1x64x128xf32>
    %259 = vector.shape_cast %258 : vector<1x64x128xf32> to vector<64x128xf32>
    %cst_166 = arith.constant dense<0.000000e+00> : vector<4x128xf32>
    %260 = tpu.matmul %257, %259, %cst_166 {dimension_numbers = #tpu.dot_dimension_numbers<[1], [0], [0], [1], [0, 0, 1, 1], [], []>} : vector<4x64xf32>, vector<64x128xf32>, vector<4x128xf32> -> vector<4x128xf32>
    %261 = arith.addf %256, %260 : vector<4x128xf32>
    %262 = vector.extract_strided_slice %232 {offsets = [20, 0], sizes = [4, 64], strides = [1, 1]} : vector<32x64xf32> to vector<4x64xf32>
    %c5 = arith.constant 5 : index
    %c0_167 = arith.constant 0 : index
    %c0_168 = arith.constant 0 : index
    %263 = vector.load %arg22[%c5, %c0_167, %c0_168] : memref<8x64x128xf32, #tpu.memory_space<vmem>>, vector<1x64x128xf32>
    %264 = vector.shape_cast %263 : vector<1x64x128xf32> to vector<64x128xf32>
    %cst_169 = arith.constant dense<0.000000e+00> : vector<4x128xf32>
    %265 = tpu.matmul %262, %264, %cst_169 {dimension_numbers = #tpu.dot_dimension_numbers<[1], [0], [0], [1], [0, 0, 1, 1], [], []>} : vector<4x64xf32>, vector<64x128xf32>, vector<4x128xf32> -> vector<4x128xf32>
    %266 = arith.addf %261, %265 : vector<4x128xf32>
    %267 = vector.extract_strided_slice %232 {offsets = [24, 0], sizes = [4, 64], strides = [1, 1]} : vector<32x64xf32> to vector<4x64xf32>
    %c6 = arith.constant 6 : index
    %c0_170 = arith.constant 0 : index
    %c0_171 = arith.constant 0 : index
    %268 = vector.load %arg22[%c6, %c0_170, %c0_171] : memref<8x64x128xf32, #tpu.memory_space<vmem>>, vector<1x64x128xf32>
    %269 = vector.shape_cast %268 : vector<1x64x128xf32> to vector<64x128xf32>
    %cst_172 = arith.constant dense<0.000000e+00> : vector<4x128xf32>
    %270 = tpu.matmul %267, %269, %cst_172 {dimension_numbers = #tpu.dot_dimension_numbers<[1], [0], [0], [1], [0, 0, 1, 1], [], []>} : vector<4x64xf32>, vector<64x128xf32>, vector<4x128xf32> -> vector<4x128xf32>
    %271 = arith.addf %266, %270 : vector<4x128xf32>
    %272 = vector.extract_strided_slice %232 {offsets = [28, 0], sizes = [4, 64], strides = [1, 1]} : vector<32x64xf32> to vector<4x64xf32>
    %c7 = arith.constant 7 : index
    %c0_173 = arith.constant 0 : index
    %c0_174 = arith.constant 0 : index
    %273 = vector.load %arg22[%c7, %c0_173, %c0_174] : memref<8x64x128xf32, #tpu.memory_space<vmem>>, vector<1x64x128xf32>
    %274 = vector.shape_cast %273 : vector<1x64x128xf32> to vector<64x128xf32>
    %cst_175 = arith.constant dense<0.000000e+00> : vector<4x128xf32>
    %275 = tpu.matmul %272, %274, %cst_175 {dimension_numbers = #tpu.dot_dimension_numbers<[1], [0], [0], [1], [0, 0, 1, 1], [], []>} : vector<4x64xf32>, vector<64x128xf32>, vector<4x128xf32> -> vector<4x128xf32>
    %276 = arith.addf %271, %275 : vector<4x128xf32>
    %cst_176 = arith.constant 0.000000e+00 : f32
    %277 = vector.broadcast %cst_176 : f32 to vector<4x128xf32>
    %278 = arith.maximumf %276, %277 : vector<4x128xf32>
    %c0_177 = arith.constant 0 : index
    %c0_178 = arith.constant 0 : index
    %279 = vector.load %arg24[%c0_177, %c0_178] : memref<128x128xf32, #tpu.memory_space<vmem>>, vector<128x128xf32>
    %cst_179 = arith.constant dense<0.000000e+00> : vector<4x128xf32>
    %280 = tpu.matmul %278, %279, %cst_179 {dimension_numbers = #tpu.dot_dimension_numbers<[1], [0], [0], [1], [0, 0, 1, 1], [], []>} : vector<4x128xf32>, vector<128x128xf32>, vector<4x128xf32> -> vector<4x128xf32>
    %c0_180 = arith.constant 0 : index
    %c0_181 = arith.constant 0 : index
    %281 = vector.load %arg25[%c0_180, %c0_181] : memref<1x128xf32, #tpu.memory_space<vmem>>, vector<1x128xf32>
    %282 = vector.broadcast %281 : vector<1x128xf32> to vector<4x128xf32>
    %283 = arith.addf %280, %282 : vector<4x128xf32>
    %c0_182 = arith.constant 0 : index
    %c0_183 = arith.constant 0 : index
    %284 = vector.load %arg26[%c0_182, %c0_183] : memref<4x128xf32, #tpu.memory_space<vmem>>, vector<4x128xf32>
    tpu.vector_store %arg26[%c0_182, %c0_183], %283 {strides = array<i32>} : memref<4x128xf32, #tpu.memory_space<vmem>>, vector<4x128xf32>,
    return
  }
}

</mosaic_0001>

<bundles_post_ra>
// kernel: transformer_forward.1
= control target key start
LH: loop header
LB: loop body
LE: loop exit
PB: predicated region body
PF: predicated region fallthrough
CT: control target
= control target key end

     0   :  { %s7196_s0 = inlined_call_operand.vmem [shape: f32[32,1], index: 0, kind: input, shape index: {}]   ;;  %s7197_s1 = inlined_call_operand.vmem [shape: f32[32,64], index: 1, kind: input, shape index: {}]   ;;  %s7198_s2 = inlined_call_operand.hbm [shape: f32[32,64], index: 2, kind: input, shape index: {}]   ;;  %s7199_s3 = inlined_call_operand.hbm [shape: f32[32,128], index: 3, kind: input, shape index: {}]   ;;  %s7200_s4 = inlined_call_operand.vmem [shape: f32[128,64], index: 4, kind: input, shape index: {}]   ;;  %s7201_s5 = inlined_call_operand.hbm [shape: f32[128,128], index: 5, kind: input, shape index: {}]   ;;  %s7202_s6 = inlined_call_operand.hbm [shape: f32[2,64,64], index: 6, kind: input, shape index: {}]   ;;  %s7203_s7 = inlined_call_operand.vmem [shape: f32[2,1,64], index: 7, kind: input, shape index: {}]   ;;  %s7204_s8 = inlined_call_operand.hbm [shape: f32[2,64,64], index: 8, kind: input, shape index: {}]   ;;  %s7205_s9 = inlined_call_operand.vmem [shape: f32[2,1,64], index: 9, kind: input, shape index: {}]   ;;  %s7206_s10 = inlined_call_operand.hbm [shape: f32[2,64,64], index: 10, kind: input, shape index: {}]   ;;  %s7207_s11 = inlined_call_operand.hbm [shape: f32[2,1,64], index: 11, kind: input, shape index: {}]   ;;  %s7208_s12 = inlined_call_operand.hbm [shape: f32[2,64,64], index: 12, kind: input, shape index: {}]   ;;  %s7209_s13 = inlined_call_operand.hbm [shape: f32[2,1,64], index: 13, kind: input, shape index: {}]   ;;  %s7210_s14 = inlined_call_operand.vmem [shape: f32[2,1,64], index: 14, kind: input, shape index: {}]   ;;  %s7211_s15 = inlined_call_operand.vmem [shape: f32[2,1,64], index: 15, kind: input, shape index: {}]   ;;  %s7212_s16 = inlined_call_operand.hbm [shape: f32[2,64,128], index: 16, kind: input, shape index: {}]   ;;  %s7213_s17 = inlined_call_operand.hbm [shape: f32[2,1,128], index: 17, kind: input, shape index: {}]   ;;  %s7214_s18 = inlined_call_operand.vmem [shape: f32[2,128,64], index: 18, kind: input, shape index: {}]   ;;  %s7215_s19 = inlined_call_operand.hbm [shape: f32[2,1,64], index: 19, kind: input, shape index: {}]   ;;  %s7216_s20 = inlined_call_operand.vmem [shape: f32[2,1,64], index: 20, kind: input, shape index: {}]   ;;  %s7217_s21 = inlined_call_operand.vmem [shape: f32[2,1,64], index: 21, kind: input, shape index: {}]   ;;  %s7218_s22 = inlined_call_operand.vmem [shape: f32[8,64,128], index: 22, kind: input, shape index: {}]   ;;  %s7219_s23 = inlined_call_operand.vmem [shape: f32[1,128], index: 23, kind: input, shape index: {}]   ;;  %s7220_s24 = inlined_call_operand.hbm [shape: f32[128,128], index: 24, kind: input, shape index: {}]   ;;  %s7221_s25 = inlined_call_operand.hbm [shape: f32[1,128], index: 25, kind: input, shape index: {}]   ;;  %s7222_s26 = inlined_call_operand.hbm [shape: f32[4,128], index: 26, kind: output, shape index: {}]  }
   0x1   :  { %7236 = sst [smem:[#allocation35_spill]] %s7196_s0 }
   0x2   :  { %7237 = sst [smem:[#allocation36_spill]] %s7197_s1 }
   0x3   :  { %7238 = sst [smem:[#allocation37_spill]] %s7198_s2 }
   0x4   :  { %7239 = sst [smem:[#allocation38_spill]] %s7199_s3 }
   0x5   :  { %7240 = sst [smem:[#allocation39_spill]] %s7200_s4 }
   0x6   :  { %7241 = sst [smem:[#allocation40_spill]] %s7201_s5 }
   0x7   :  { %7242 = sst [smem:[#allocation41_spill]] %s7202_s6 }
   0x8   :  { %7243 = sst [smem:[#allocation42_spill]] %s7203_s7 }
   0x9   :  { %7244 = sst [smem:[#allocation43_spill]] %s7204_s8 }
   0xa   :  { %7245 = sst [smem:[#allocation44_spill]] %s7205_s9 }
   0xb   :  { %7246 = sst [smem:[#allocation45_spill]] %s7206_s10 }
   0xc   :  { %7247 = sst [smem:[#allocation46_spill]] %s7218_s22 }
   0xd   :  { %7248 = sst [smem:[#allocation47_spill]] %s7219_s23 }
   0xe   :  { %7249 = sst [smem:[#allocation48_spill]] %s7222_s26 }
   0xf   :  { %31 = vsyncpa [#allocation3], 0 }
  0x10   :  { %32 = vsyncpa [#allocation6], 0 }
  0x11   :  { %33 = vsyncpa [#allocation9], 0 }
  0x12   :  { %34 = vsyncpa [#allocation12], 0 }
  0x13   :  { %35 = vsyncpa [#allocation15], 0 }
  0x14   :  { %36 = vsyncpa [#allocation18], 0 }
  0x15   :  { %37 = vsyncpa [#allocation21], 0 }
  0x16   :  { %38 = vsyncpa [#allocation24], 0 }
  0x17   :  { %39 = vsyncpa [#allocation4], 0  ;;  %s5820_s27 = smov [#allocation5]   ;;  %s5821_s7 = smov [#allocation8]  }
  0x18   :  { %s61_s3 = sshll.u32 %s5820_s27, 4  ;;  %s87_s28 = sshll.u32 %s5821_s7, 4  ;;  %s62_s3 = int_to_ptr.vmem [resolvable:$true] %s61_s3  ;;  %s5978_s28 = int_to_ptr.vmem [resolvable:$true] %s87_s28 }
  0x19   :  { %s7250_s29 = sld [smem:[#allocation38_spill]] }
  0x1f   :  { %s5472_s0 = scalar_lea.hbm %s7250_s29, 512 }
  0x20   :  { %p5473_p0 = scmp.ne.s32.totalorder %s7250_s29, %s5472_s0  ;;  %p5476_p1 = scmp.lt.u32.totalorder %s5472_s0, %s7250_s29 }
  0x22   :  { %p5478_p2 = pnand %p5476_p1, %p5473_p0 }
  0x24   :  { %5481 = shalt.err (!%p5478_p2)
}
  0x25   :  { %s5482_s10 = scalar_lea.vmem %s62_s3, 512  ;;  %p5487_p4 = scmp.lt.s32.totalorder %s62_s3, %s62_s3 }
  0x26   :  { %p5483_p3 = scmp.ne.s32.totalorder %s62_s3, %s5482_s10  ;;  %p5488_p5 = scmp.lt.s32.totalorder %s5482_s10, %s5482_s10 }
  0x28   :  { %p5489_p6 = por %p5488_p5, %p5487_p4 }
  0x2a   :  { %p5490_p7 = pnand %p5489_p6, %p5483_p3 }
  0x2c   :  { %5493 = shalt.err (!%p5490_p7)
}
  0x2d   :  { %s5822_s6 = smov 128   ;;  %s5823_s1 = smov 8  }
  0x2e   :  { %67 = dma.hbm_to_vmem [thread:$0]  %s7250_s29, 512, %s62_s3, [#allocation6], %s5822_s6, %s5822_s6, %s5823_s1  }
  0x2f   :  { %s7251_s0 = sld [smem:[#allocation41_spill]] }
  0x35   :  { %s5494_s9 = scalar_lea.hbm %s7251_s0, 2048 }
  0x36   :  { %p5495_p8 = scmp.ne.s32.totalorder %s7251_s0, %s5494_s9  ;;  %p5498_p9 = scmp.lt.u32.totalorder %s5494_s9, %s7251_s0 }
  0x38   :  { %p5500_p10 = pnand %p5498_p9, %p5495_p8 }
  0x3a   :  { %5503 = shalt.err (!%p5500_p10)
}
  0x3b   :  { %s5504_s26 = scalar_lea.vmem %s5978_s28, 2048  ;;  %p5509_p12 = scmp.lt.s32.totalorder %s5978_s28, %s5978_s28 }
  0x3c   :  { %p5505_p11 = scmp.ne.s32.totalorder %s5978_s28, %s5504_s26  ;;  %p5510_p13 = scmp.lt.s32.totalorder %s5504_s26, %s5504_s26 }
  0x3e   :  { %p5511_p0 = por %p5510_p13, %p5509_p12 }
  0x40   :  { %p5512_p1 = pnand %p5511_p0, %p5505_p11 }
  0x42   :  { %5515 = shalt.err (!%p5512_p1)
}
  0x43   :  { %93 = dma.hbm_to_vmem [thread:$0]  %s7251_s0, 2048, %s5978_s28, [#allocation9], %s5822_s6, %s5822_s6, %s5823_s1  }
  0x44   :  { %s5824_s27 = smov [#allocation11]   ;;  %s5825_s8 = smov [#allocation14]  }
  0x45   :  { %s115_s7 = sshll.u32 %s5824_s27, 4  ;;  %s139_s4 = sshll.u32 %s5825_s8, 4  ;;  %s116_s7 = int_to_ptr.vmem [resolvable:$true] %s115_s7  ;;  %s6015_s4 = int_to_ptr.vmem [resolvable:$true] %s139_s4 }
  0x46   :  { %s7252_s30 = sld [smem:[#allocation45_spill]] }
  0x4c   :  { %s5516_s2 = scalar_lea.hbm %s7252_s30, 2048 }
  0x4d   :  { %p5517_p2 = scmp.ne.s32.totalorder %s7252_s30, %s5516_s2  ;;  %p5520_p3 = scmp.lt.u32.totalorder %s5516_s2, %s7252_s30 }
  0x4f   :  { %p5522_p4 = pnand %p5520_p3, %p5517_p2 }
  0x51   :  { %5525 = shalt.err (!%p5522_p4)
}
  0x52   :  { %s5526_s28 = scalar_lea.vmem %s116_s7, 2048  ;;  %p5531_p6 = scmp.lt.s32.totalorder %s116_s7, %s116_s7 }
  0x53   :  { %p5527_p5 = scmp.ne.s32.totalorder %s116_s7, %s5526_s28  ;;  %p5532_p7 = scmp.lt.s32.totalorder %s5526_s28, %s5526_s28 }
  0x55   :  { %p5533_p8 = por %p5532_p7, %p5531_p6 }
  0x57   :  { %p5534_p9 = pnand %p5533_p8, %p5527_p5 }
  0x59   :  { %5537 = shalt.err (!%p5534_p9)
}
  0x5a   :  { %121 = dma.hbm_to_vmem [thread:$0]  %s7252_s30, 2048, %s116_s7, [#allocation12], %s5822_s6, %s5822_s6, %s5823_s1  }
  0x5b   :  { %s5538_s22 = scalar_lea.hbm %s7208_s12, 2048 }
  0x5c   :  { %p5539_p10 = scmp.ne.s32.totalorder %s7208_s12, %s5538_s22  ;;  %p5542_p11 = scmp.lt.u32.totalorder %s5538_s22, %s7208_s12 }
  0x5e   :  { %p5544_p12 = pnand %p5542_p11, %p5539_p10 }
  0x60   :  { %5547 = shalt.err (!%p5544_p12)
}
  0x61   :  { %s5548_s2 = scalar_lea.vmem %s6015_s4, 2048  ;;  %p5553_p0 = scmp.lt.s32.totalorder %s6015_s4, %s6015_s4 }
  0x62   :  { %p5549_p13 = scmp.ne.s32.totalorder %s6015_s4, %s5548_s2  ;;  %p5554_p1 = scmp.lt.s32.totalorder %s5548_s2, %s5548_s2 }
  0x64   :  { %p5555_p2 = por %p5554_p1, %p5553_p0 }
  0x66   :  { %p5556_p3 = pnand %p5555_p2, %p5549_p13 }
  0x68   :  { %5559 = shalt.err (!%p5556_p3)
}
  0x69   :  { %145 = dma.hbm_to_vmem [thread:$0]  %s7208_s12, 2048, %s6015_s4, [#allocation15], %s5822_s6, %s5822_s6, %s5823_s1  }
  0x6a   :  { %s5826_s5 = smov [#allocation17]   ;;  %s5560_s3 = scalar_lea.hbm %s7212_s16, 2048 }
  0x6b   :  { %s167_s10 = sshll.u32 %s5826_s5, 4  ;;  %p5561_p4 = scmp.ne.s32.totalorder %s7212_s16, %s5560_s3  ;;  %s168_s10 = int_to_ptr.vmem [resolvable:$true] %s167_s10 }
  0x6c   :  { %p5564_p5 = scmp.lt.u32.totalorder %s5560_s3, %s7212_s16 }
  0x6e   :  { %p5566_p6 = pnand %p5564_p5, %p5561_p4 }
  0x70   :  { %5569 = shalt.err (!%p5566_p6)
}
  0x71   :  { %s5570_s8 = scalar_lea.vmem %s168_s10, 2048  ;;  %p5575_p8 = scmp.lt.s32.totalorder %s168_s10, %s168_s10 }
  0x72   :  { %p5571_p7 = scmp.ne.s32.totalorder %s168_s10, %s5570_s8  ;;  %p5576_p9 = scmp.lt.s32.totalorder %s5570_s8, %s5570_s8 }
  0x74   :  { %p5577_p10 = por %p5576_p9, %p5575_p8 }
  0x76   :  { %p5578_p11 = pnand %p5577_p10, %p5571_p7 }
  0x78   :  { %5581 = shalt.err (!%p5578_p11)
}
  0x79   :  { %173 = dma.hbm_to_vmem [thread:$0]  %s7212_s16, 2048, %s168_s10, [#allocation18], %s5822_s6, %s5822_s6, %s5823_s1  }
  0x7a   :  { %s5827_s9 = smov [#allocation20]   ;;  %s5828_s2 = smov [#allocation2]  }
  0x7b   :  { %s193_s26 = sshll.u32 %s5827_s9, 4  ;;  %s49_s7 = sshll.u32 %s5828_s2, 4  ;;  %s194_s26 = int_to_ptr.vmem [resolvable:$true] %s193_s26  ;;  %s50_s7 = int_to_ptr.vmem [resolvable:$true] %s49_s7 }
  0x7c   :  { %s5582_s28 = scalar_lea.hbm %s7215_s19, 32 }
  0x7d   :  { %p5583_p12 = scmp.ne.s32.totalorder %s7215_s19, %s5582_s28  ;;  %p5586_p13 = scmp.lt.u32.totalorder %s5582_s28, %s7215_s19 }
  0x7f   :  { %p5588_p0 = pnand %p5586_p13, %p5583_p12 }
  0x81   :  { %5591 = shalt.err (!%p5588_p0)
}
  0x82   :  { %s5592_s16 = scalar_lea.vmem %s194_s26, 32  ;;  %p5597_p2 = scmp.lt.s32.totalorder %s194_s26, %s194_s26 }
  0x83   :  { %p5593_p1 = scmp.ne.s32.totalorder %s194_s26, %s5592_s16  ;;  %p5598_p3 = scmp.lt.s32.totalorder %s5592_s16, %s5592_s16 }
  0x85   :  { %p5599_p4 = por %p5598_p3, %p5597_p2 }
  0x87   :  { %p5600_p5 = pnand %p5599_p4, %p5593_p1 }
  0x89   :  { %5603 = shalt.err (!%p5600_p5)
}
  0x8a   :  { %s5829_s10 = smov 16   ;;  %s5830_s22 = smov 1  }
  0x8b   :  { %199 = dma.hbm_to_vmem [thread:$0]  %s7215_s19, 32, %s194_s26, [#allocation21], %s5829_s10, %s5829_s10, %s5830_s22  }
  0x8c   :  { %s7253_s9 = sld [smem:[#allocation37_spill]] }
  0x92   :  { %s5604_s2 = scalar_lea.hbm %s7253_s9, 512 }
  0x93   :  { %p5605_p6 = scmp.ne.s32.totalorder %s7253_s9, %s5604_s2  ;;  %p5608_p7 = scmp.lt.u32.totalorder %s5604_s2, %s7253_s9 }
  0x95   :  { %p5610_p8 = pnand %p5608_p7, %p5605_p6 }
  0x97   :  { %5613 = shalt.err (!%p5610_p8)
}
  0x98   :  { %s5614_s3 = scalar_lea.vmem %s50_s7, 512  ;;  %p5619_p10 = scmp.lt.s32.totalorder %s50_s7, %s50_s7 }
  0x99   :  { %p5615_p9 = scmp.ne.s32.totalorder %s50_s7, %s5614_s3  ;;  %p5620_p11 = scmp.lt.s32.totalorder %s5614_s3, %s5614_s3 }
  0x9b   :  { %p5621_p12 = por %p5620_p11, %p5619_p10 }
  0x9d   :  { %p5622_p13 = pnand %p5621_p12, %p5615_p9 }
  0x9f   :  { %5625 = shalt.err (!%p5622_p13)
}
  0xa0   :  { %55 = dma.hbm_to_vmem [thread:$0]  %s7253_s9, 512, %s50_s7, [#allocation3], %s5822_s6, %s5822_s6, %s5823_s1  }
  0xa1   :  { %s5831_s29 = smov [#allocation7]   ;;  %s5832_s16 = smov [#allocation10]  }
  0xa2   :  { %s75_s27 = sshll.u32 %s5831_s29, 4  ;;  %s101_s23 = sshll.u32 %s5832_s16, 4  ;;  %s76_s27 = int_to_ptr.vmem [resolvable:$true] %s75_s27  ;;  %s102_s23 = int_to_ptr.vmem [resolvable:$true] %s101_s23 }
  0xa3   :  { %s7254_s4 = sld [smem:[#allocation40_spill]] }
  0xa9   :  { %s5626_s2 = scalar_lea.hbm %s7254_s4, 2048 }
  0xaa   :  { %p5627_p0 = scmp.ne.s32.totalorder %s7254_s4, %s5626_s2  ;;  %p5630_p1 = scmp.lt.u32.totalorder %s5626_s2, %s7254_s4 }
  0xac   :  { %p5632_p2 = pnand %p5630_p1, %p5627_p0 }
  0xae   :  { %5635 = shalt.err (!%p5632_p2)
}
  0xaf   :  { %s5636_s7 = scalar_lea.vmem %s76_s27, 2048  ;;  %p5641_p4 = scmp.lt.s32.totalorder %s76_s27, %s76_s27 }
  0xb0   :  { %p5637_p3 = scmp.ne.s32.totalorder %s76_s27, %s5636_s7  ;;  %p5642_p5 = scmp.lt.s32.totalorder %s5636_s7, %s5636_s7 }
  0xb2   :  { %p5643_p6 = por %p5642_p5, %p5641_p4 }
  0xb4   :  { %p5644_p7 = pnand %p5643_p6, %p5637_p3 }
  0xb6   :  { %5647 = shalt.err (!%p5644_p7)
}
  0xb7   :  { %81 = dma.hbm_to_vmem [thread:$0]  %s7254_s4, 2048, %s76_s27, [#allocation6], %s5822_s6, %s5822_s6, %s5823_s1  }
  0xb8   :  { %s7255_s29 = sld [smem:[#allocation43_spill]] }
  0xbe   :  { %s5648_s16 = scalar_lea.hbm %s7255_s29, 2048 }
  0xbf   :  { %p5649_p8 = scmp.ne.s32.totalorder %s7255_s29, %s5648_s16  ;;  %p5652_p9 = scmp.lt.u32.totalorder %s5648_s16, %s7255_s29 }
  0xc1   :  { %p5654_p10 = pnand %p5652_p9, %p5649_p8 }
  0xc3   :  { %5657 = shalt.err (!%p5654_p10)
}
  0xc4   :  { %s5658_s5 = scalar_lea.vmem %s102_s23, 2048  ;;  %p5663_p12 = scmp.lt.s32.totalorder %s102_s23, %s102_s23 }
  0xc5   :  { %p5659_p11 = scmp.ne.s32.totalorder %s102_s23, %s5658_s5  ;;  %p5664_p13 = scmp.lt.s32.totalorder %s5658_s5, %s5658_s5 }
  0xc7   :  { %p5665_p0 = por %p5664_p13, %p5663_p12 }
  0xc9   :  { %p5666_p1 = pnand %p5665_p0, %p5659_p11 }
  0xcb   :  { %5669 = shalt.err (!%p5666_p1)
}
  0xcc   :  { %107 = dma.hbm_to_vmem [thread:$0]  %s7255_s29, 2048, %s102_s23, [#allocation9], %s5822_s6, %s5822_s6, %s5823_s1  }
  0xcd   :  { %s5833_s28 = smov [#allocation13]   ;;  %s5834_s7 = smov [#allocation16]  }
  0xce   :  { %s127_s0 = sshll.u32 %s5833_s28, 4  ;;  %s151_s9 = sshll.u32 %s5834_s7, 4  ;;  %s128_s0 = int_to_ptr.vmem [resolvable:$true] %s127_s0  ;;  %s152_s9 = int_to_ptr.vmem [resolvable:$true] %s151_s9 }
  0xcf   :  { %s5670_s26 = scalar_lea.hbm %s7207_s11, 32 }
  0xd0   :  { %p5671_p2 = scmp.ne.s32.totalorder %s7207_s11, %s5670_s26  ;;  %p5674_p3 = scmp.lt.u32.totalorder %s5670_s26, %s7207_s11 }
  0xd2   :  { %p5676_p4 = pnand %p5674_p3, %p5671_p2 }
  0xd4   :  { %5679 = shalt.err (!%p5676_p4)
}
  0xd5   :  { %s5680_s23 = scalar_lea.vmem %s128_s0, 32  ;;  %p5685_p6 = scmp.lt.s32.totalorder %s128_s0, %s128_s0 }
  0xd6   :  { %p5681_p5 = scmp.ne.s32.totalorder %s128_s0, %s5680_s23  ;;  %p5686_p7 = scmp.lt.s32.totalorder %s5680_s23, %s5680_s23 }
  0xd8   :  { %p5687_p8 = por %p5686_p7, %p5685_p6 }
  0xda   :  { %p5688_p9 = pnand %p5687_p8, %p5681_p5 }
  0xdc   :  { %5691 = shalt.err (!%p5688_p9)
}
  0xdd   :  { %133 = dma.hbm_to_vmem [thread:$0]  %s7207_s11, 32, %s128_s0, [#allocation12], %s5829_s10, %s5829_s10, %s5830_s22  }
  0xde   :  { %s5692_s4 = scalar_lea.hbm %s7209_s13, 32 }
  0xdf   :  { %p5693_p10 = scmp.ne.s32.totalorder %s7209_s13, %s5692_s4  ;;  %p5696_p11 = scmp.lt.u32.totalorder %s5692_s4, %s7209_s13 }
  0xe1   :  { %p5698_p12 = pnand %p5696_p11, %p5693_p10 }
  0xe3   :  { %5701 = shalt.err (!%p5698_p12)
}
  0xe4   :  { %s5702_s26 = scalar_lea.vmem %s152_s9, 32  ;;  %p5707_p0 = scmp.lt.s32.totalorder %s152_s9, %s152_s9 }
  0xe5   :  { %p5703_p13 = scmp.ne.s32.totalorder %s152_s9, %s5702_s26  ;;  %p5708_p1 = scmp.lt.s32.totalorder %s5702_s26, %s5702_s26 }
  0xe7   :  { %p5709_p2 = por %p5708_p1, %p5707_p0 }
  0xe9   :  { %p5710_p3 = pnand %p5709_p2, %p5703_p13 }
  0xeb   :  { %5713 = shalt.err (!%p5710_p3)
}
  0xec   :  { %157 = dma.hbm_to_vmem [thread:$0]  %s7209_s13, 32, %s152_s9, [#allocation15], %s5829_s10, %s5829_s10, %s5830_s22  }
  0xed   :  { %s5835_s16 = smov [#allocation19]   ;;  %s5836_s12 = smov [#allocation22]  }
  0xee   :  { %s179_s8 = sshll.u32 %s5835_s16, 4  ;;  %s213_s2 = sshll.u32 %s5836_s12, 4  ;;  %s180_s8 = int_to_ptr.vmem [resolvable:$true] %s179_s8  ;;  %s214_s2 = int_to_ptr.vmem [resolvable:$true] %s213_s2 }
  0xef   :  { %s5714_s30 = scalar_lea.hbm %s7213_s17, 32 }
  0xf0   :  { %p5715_p4 = scmp.ne.s32.totalorder %s7213_s17, %s5714_s30  ;;  %p5718_p5 = scmp.lt.u32.totalorder %s5714_s30, %s7213_s17 }
  0xf2   :  { %p5720_p6 = pnand %p5718_p5, %p5715_p4 }
  0xf4   :  { %5723 = shalt.err (!%p5720_p6)
}
  0xf5   :  { %s5724_s13 = scalar_lea.vmem %s180_s8, 32  ;;  %p5729_p8 = scmp.lt.s32.totalorder %s180_s8, %s180_s8 }
  0xf6   :  { %p5725_p7 = scmp.ne.s32.totalorder %s180_s8, %s5724_s13  ;;  %p5730_p9 = scmp.lt.s32.totalorder %s5724_s13, %s5724_s13 }
  0xf8   :  { %p5731_p10 = por %p5730_p9, %p5729_p8 }
  0xfa   :  { %p5732_p11 = pnand %p5731_p10, %p5725_p7 }
  0xfc   :  { %5735 = shalt.err (!%p5732_p11)
}
  0xfd   :  { %185 = dma.hbm_to_vmem [thread:$0]  %s7213_s17, 32, %s180_s8, [#allocation18], %s5829_s10, %s5829_s10, %s5830_s22  }
  0xfe   :  { %s5736_s26 = scalar_lea.hbm %s7220_s24, 2048 }
  0xff   :  { %p5737_p12 = scmp.ne.s32.totalorder %s7220_s24, %s5736_s26  ;;  %p5740_p13 = scmp.lt.u32.totalorder %s5736_s26, %s7220_s24 }
 0x101   :  { %p5742_p0 = pnand %p5740_p13, %p5737_p12 }
 0x103   :  { %5745 = shalt.err (!%p5742_p0)
}
 0x104   :  { %s5746_s23 = scalar_lea.vmem %s214_s2, 2048  ;;  %p5751_p2 = scmp.lt.s32.totalorder %s214_s2, %s214_s2 }
 0x105   :  { %p5747_p1 = scmp.ne.s32.totalorder %s214_s2, %s5746_s23  ;;  %p5752_p3 = scmp.lt.s32.totalorder %s5746_s23, %s5746_s23 }
 0x107   :  { %p5753_p4 = por %p5752_p3, %p5751_p2 }
 0x109   :  { %p5754_p5 = pnand %p5753_p4, %p5747_p1 }
 0x10b   :  { %5757 = shalt.err (!%p5754_p5)
}
 0x10c   :  { %219 = dma.hbm_to_vmem [thread:$0]  %s7220_s24, 2048, %s214_s2, [#allocation21], %s5822_s6, %s5822_s6, %s5823_s1  }
 0x10d   :  { %s5837_s22 = smov [#allocation23]   ;;  %s5758_s5 = scalar_lea.hbm %s7221_s25, 16 }
 0x10e   :  { %s226_s8 = sshll.u32 %s5837_s22, 4  ;;  %p5759_p6 = scmp.ne.s32.totalorder %s7221_s25, %s5758_s5  ;;  %s227_s8 = int_to_ptr.vmem [resolvable:$true] %s226_s8 }
 0x10f   :  { %p5762_p7 = scmp.lt.u32.totalorder %s5758_s5, %s7221_s25 }
 0x111   :  { %p5764_p8 = pnand %p5762_p7, %p5759_p6 }
 0x113   :  { %5767 = shalt.err (!%p5764_p8)
}
 0x114   :  { %s5768_s9 = scalar_lea.vmem %s227_s8, 16  ;;  %s5772_s24 = scalar_lea.vmem %s227_s8, 32 }
 0x115   :  { %p5769_p9 = scmp.ne.s32.totalorder %s227_s8, %s5768_s9  ;;  %p5773_p10 = scmp.lt.s32.totalorder %s227_s8, %s227_s8 }
 0x116   :  { %p5774_p11 = scmp.lt.s32.totalorder %s5772_s24, %s5768_s9 }
 0x118   :  { %p5775_p12 = por %p5774_p11, %p5773_p10 }
 0x11a   :  { %p5776_p13 = pnand %p5775_p12, %p5769_p9 }
 0x11c   :  { %5779 = shalt.err (!%p5776_p13)
}
 0x11d   :  { %229 = dma.hbm_to_vmem [thread:$0]  %s7221_s25, 16, %s227_s8, [#allocation24]  }
 0x11e   :  { %5802 = dma.done.wait [#allocation3], 512  }
 0x11f   :  { %5803 = vsyncadd [#allocation3], 4294966784 }
 0x120   :  { %5804 = dma.done.wait [#allocation6], 2560  }
 0x121   :  { %5805 = vsyncadd [#allocation6], 4294964736 }
 0x122   :  { %5806 = dma.done.wait [#allocation9], 4096  }
 0x123   :  { %5807 = vsyncadd [#allocation9], 4294963200 }
 0x124   :  { %5808 = dma.done.wait [#allocation12], 2080  }
 0x125   :  { %5809 = vsyncadd [#allocation12], 4294965216 }
 0x126   :  { %5810 = dma.done.wait [#allocation15], 2080  }
 0x127   :  { %5811 = vsyncadd [#allocation15], 4294965216 }
 0x128   :  { %5812 = dma.done.wait [#allocation18], 2080  }
 0x129   :  { %5813 = vsyncadd [#allocation18], 4294965216 }
 0x12a   :  { %5814 = dma.done.wait [#allocation21], 2080  }
 0x12b   :  { %5815 = vsyncadd [#allocation21], 4294965216 }
 0x12c   :  { %5816 = dma.done.wait [#allocation24], 16  }
 0x12d   :  { %5817 = vsyncadd [#allocation24], 4294967280  ;;  %v5838_v0 = vmov 0   ;;  %s7256_s7 = sld [smem:[#allocation35_spill]]  ;;  %v348_v5 = vld [vmem:[#allocation8] sm:$0xff]  ;;  %v349_v6 = vld [vmem:[#allocation8 + $0x8] sm:$0xff] }
 0x12e   :  { %5386 = vset.pattern.permute.xlu0 %v5838_v0  ;;  %5387 = vset.pattern.permute.xlu1 %v5838_v0  ;;  %v4780_v7 = vpack.c.bf16 %v349_v6, %v348_v5  ;;  %v461_v8 = vld [vmem:[#allocation10] sm:$0xff]  ;;  %v462_v9 = vld [vmem:[#allocation10 + $0x8] sm:$0xff]  ;;  %v350_v10 = vld [vmem:[#allocation8 + $0x10] sm:$0xff]  ;;  %s7257_s17 = sld [smem:[#allocation36_spill]]  ;;  %vm363_vm0 = vcmask 523264   ;;  %s7258_s28 = sld [smem:[#allocation42_spill]] }
 0x12f   :  { %v4796_v11 = vpack.c.bf16 %v462_v9, %v461_v8  ;;  %v351_v12 = vld [vmem:[#allocation8 + $0x18] sm:$0xff]  ;;  %v463_v13 = vld [vmem:[#allocation10 + $0x10] sm:$0xff]  ;;  %v352_v17 = vld [vmem:[#allocation8 + $0x20] sm:$0xff]  ;;  %s7259_s24 = sld [smem:[#allocation44_spill]]  ;;  %s7260_s25 = sld [smem:[#allocation39_spill]]  ;;  %vm5840_vm2 = vmmov 0  }
 0x130   :  { %v464_v14 = vld [vmem:[#allocation10 + $0x18] sm:$0xff]  ;;  %4781 = vmatprep.subr.bf16.mxu0 %v4780_v7  ;;  %v4784_v15 = vpack.c.bf16 %v351_v12, %v350_v10  ;;  %v353_v18 = vld [vmem:[#allocation8 + $0x28] sm:$0xff]  ;;  %v465_v19 = vld [vmem:[#allocation10 + $0x20] sm:$0xff]  ;;  %s7263_s13 = sld [smem:[#allocation46_spill]]  ;;  %s7264_s12 = sld [smem:[#allocation47_spill]] }
 0x131   :  { %v4800_v16 = vpack.c.bf16 %v464_v14, %v463_v13  ;;  %v466_v20 = vld [vmem:[#allocation10 + $0x28] sm:$0xff]  ;;  %4783 = vmatpush3.bf16.msra.mxu0 %v4780_v7  ;;  %4797 = vmatprep.subr.bf16.mxu1 %v4796_v11  ;;  %v4788_v21 = vpack.c.bf16 %v353_v18, %v352_v17  ;;  %v354_v23 = vld [vmem:[#allocation8 + $0x30] sm:$0xff]  ;;  %v355_v24 = vld [vmem:[#allocation8 + $0x38] sm:$0xff] }
 0x132   :  { %4799 = vmatpush3.bf16.msra.mxu1 %v4796_v11  ;;  %4785 = vmatprep.subr.bf16.mxu0 %v4784_v15  ;;  %v4804_v22 = vpack.c.bf16 %v466_v20, %v465_v19  ;;  %v467_v25 = vld [vmem:[#allocation10 + $0x30] sm:$0xff]  ;;  %v468_v26 = vld [vmem:[#allocation10 + $0x38] sm:$0xff]  ;;  %v4792_v27 = vpack.c.bf16 %v355_v24, %v354_v23  ;;  %v561_v29 = vld [vmem:[#allocation11] sm:$0xff] }
 0x133   :  { %v272_v1 = vld [vmem:[%s7256_s7] sm:$0xff]  ;;  %v274_v2 = vld [vmem:[%s7256_s7 + $0x10] sm:$0xff]  ;;  %v273_v3 = vld [vmem:[%s7256_s7 + $0x8] sm:$0xff]  ;;  %4801 = vmatprep.subr.bf16.mxu1 %v4800_v16  ;;  %v4808_v28 = vpack.c.bf16 %v468_v26, %v467_v25 }
 0x134   :  { %282 = vperm.xlu0 %5386, %v272_v1   ;;  %292 = vperm.xlu1 %5387, %v274_v2   ;;  %v275_v4 = vld [vmem:[%s7256_s7 + $0x18] sm:$0xff]  ;;  %v562_v30 = vld [vmem:[#allocation11 + $0x8] sm:$0xff]  ;;  %v276_v32 = vld [vmem:[%s7257_s17] sm:$0xff] }
 0x135   :  { %4787 = vmatpush3.bf16.msra.mxu0 %v4784_v15  ;;  %v4812_v31 = vpack.c.bf16 %v562_v30, %v561_v29  ;;  %v278_v33 = vld [vmem:[%s7257_s17 + $0x10] sm:$0xff]  ;;  %v304_v34 = vld [vmem:[#allocation2] sm:$0xff]  ;;  %v277_v39 = vld [vmem:[%s7257_s17 + $0x8] sm:$0xff] }
 0x136   :  { %4803 = vmatpush3.bf16.msra.mxu1 %v4800_v16  ;;  %4789 = vmatprep.subr.bf16.mxu0 %v4788_v21  ;;  %v279_v40 = vld [vmem:[%s7257_s17 + $0x18] sm:$0xff]  ;;  %v306_v42 = vld [vmem:[#allocation2 + $0x10] sm:$0xff]  ;;  %v305_v43 = vld [vmem:[#allocation2 + $0x8] sm:$0xff] }
 0x137   :  { %4805 = vmatprep.subr.bf16.mxu1 %v4804_v22  ;;  %v563_v46 = vld [vmem:[#allocation11 + $0x10] sm:$0xff]  ;;  %v564_v47 = vld [vmem:[#allocation11 + $0x18] sm:$0xff]  ;;  %v565_v54 = vld [vmem:[#allocation11 + $0x20] sm:$0xff] }
 0x138   :  { %287 = vperm.xlu0 %5386, %v273_v3   ;;  %297 = vperm.xlu1 %5387, %v275_v4   ;;  %v307_v51 = vld [vmem:[#allocation2 + $0x18] sm:$0xff]  ;;  %v4816_v53 = vpack.c.bf16 %v564_v47, %v563_v46  ;;  %v566_v55 = vld [vmem:[#allocation11 + $0x28] sm:$0xff]  ;;  %v567_v58 = vld [vmem:[#allocation11 + $0x30] sm:$0xff] }
 0x139   :  { %4791 = vmatpush3.bf16.msra.mxu0 %v4788_v21  ;;  %v4820_v57 = vpack.c.bf16 %v566_v55, %v565_v54  ;;  %v568_v59 = vld [vmem:[#allocation11 + $0x38] sm:$0xff]  ;;  %v332_v61 = vld [vmem:[#allocation7] sm:$0xff]  ;;  %v333_v62 = vld [vmem:[#allocation7 + $0x8] sm:$0xff] }
 0x13a   :  { %4807 = vmatpush3.bf16.msra.mxu1 %v4804_v22  ;;  %4793 = vmatprep.subr.bf16.mxu0 %v4792_v27  ;;  %v4824_v60 = vpack.c.bf16 %v568_v59, %v567_v58  ;;  %v6249_v63 = vpack.c.bf16 %v333_v62, %v332_v61  ;;  %v334_v0 = vld [vmem:[#allocation7 + $0x10] sm:$0xff]  ;;  %v335_v1 = vld [vmem:[#allocation7 + $0x18] sm:$0xff]  ;;  %v336_v3 = vld [vmem:[#allocation7 + $0x20] sm:$0xff] }
 0x13b   :  { %4809 = vmatprep.subr.bf16.mxu1 %v4808_v28  ;;  %v6252_v2 = vpack.c.bf16 %v335_v1, %v334_v0  ;;  %v337_v4 = vld [vmem:[#allocation7 + $0x28] sm:$0xff]  ;;  %v338_v6 = vld [vmem:[#allocation7 + $0x30] sm:$0xff]  ;;  %v339_v7 = vld [vmem:[#allocation7 + $0x38] sm:$0xff] }
 0x13c   :  { %v6263_v5 = vpack.c.bf16 %v337_v4, %v336_v3  ;;  %v6267_v8 = vpack.c.bf16 %v339_v7, %v338_v6  ;;  %v340_v9 = vld [vmem:[#allocation7 + $0x40] sm:$0xff]  ;;  %v341_v10 = vld [vmem:[#allocation7 + $0x48] sm:$0xff]  ;;  %v342_v12 = vld [vmem:[#allocation7 + $0x50] sm:$0xff] }
 0x13d   :  { %4795 = vmatpush3.bf16.msra.mxu0 %v4792_v27  ;;  %v6271_v11 = vpack.c.bf16 %v341_v10, %v340_v9  ;;  %v343_v13 = vld [vmem:[#allocation7 + $0x58] sm:$0xff]  ;;  %v344_v15 = vld [vmem:[#allocation7 + $0x60] sm:$0xff]  ;;  %v345_v16 = vld [vmem:[#allocation7 + $0x68] sm:$0xff] }
 0x13e   :  { %4811 = vmatpush3.bf16.msra.mxu1 %v4808_v28  ;;  %4813 = vmatprep.subr.bf16.mxu0 %v4812_v31  ;;  %v6274_v14 = vpack.c.bf16 %v343_v13, %v342_v12  ;;  %v6278_v17 = vpack.c.bf16 %v345_v16, %v344_v15  ;;  %v346_v18 = vld [vmem:[#allocation7 + $0x70] sm:$0xff]  ;;  %v347_v19 = vld [vmem:[#allocation7 + $0x78] sm:$0xff]  ;;  %v3512_v21 = vld [vmem:[%s7258_s28] ss:$0 sm:$0xff] }
 0x13f   :  { %v6282_v20 = vpack.c.bf16 %v347_v19, %v346_v18  ;;  %v3517_v22 = vld [vmem:[%s7259_s24] ss:$0 sm:$0xff]  ;;  %v6296_v24 = vld [vmem:[%s7260_s25 + $0x8] sm:$0xff]  ;;  %v318_v54 = vld [vmem:[%s7260_s25 + $0x10] sm:$0xff] }
 0x140   :  { %v6301_v25 = vld [vmem:[%s7260_s25 + $0x28] sm:$0xff]  ;;  %v322_v55 = vld [vmem:[%s7260_s25 + $0x30] sm:$0xff]  ;;  %vm6374_vm1 = vmpackc.low %vm363_vm0, %vm363_vm0 }
 0x141   :  { %v6306_v26 = vld [vmem:[%s7260_s25 + $0x48] sm:$0xff]  ;;  %v326_v62 = vld [vmem:[%s7260_s25 + $0x50] sm:$0xff]  ;;  %v5470_v3 = vld [vmem:[#allocation5 + $0x18] sm:$0xff] }
 0x142   :  { %v6313_v29 = vld [vmem:[%s7260_s25 + $0x68] sm:$0xff]  ;;  %v330_v0 = vld [vmem:[%s7260_s25 + $0x70] sm:$0xff] }
 0x1b3   :  { %v283_v35 = vpop.permute.xlu0 %282  ;;  %v293_v36 = vpop.permute.xlu1 %292 }
 0x1b4   :  { %v300_v37 = vmul.f32 %v283_v35, %v276_v32  ;;  %v302_v38 = vmul.f32 %v293_v36, %v278_v33  ;;  %v6318_v32 = vld [vmem:[%s7260_s25] sm:$0xff] }
 0x1b5   :  { %v6323_v33 = vld [vmem:[%s7260_s25 + $0x20] sm:$0xff] }
 0x1b6   :  { %v6223_v41 = vadd.f32 %v304_v34, %v300_v37  ;;  %v6229_v50 = vadd.f32 %v306_v42, %v302_v38  ;;  %v324_v36 = vld [vmem:[%s7260_s25 + $0x40] sm:$0xff]  ;;  %v6336_v42 = vld [vmem:[%s7260_s25 + $0x18] sm:$0xff] }
 0x1b7   :  { %v288_v44 = vpop.permute.xlu0 %287  ;;  %v298_v45 = vpop.permute.xlu1 %297  ;;  %v328_v37 = vld [vmem:[%s7260_s25 + $0x60] sm:$0xff] }
 0x1b8   :  { %v301_v48 = vmul.f32 %v288_v44, %v277_v39  ;;  %4085 = vmatprep.mubr.msk.f32.mxu0 %vm363_vm0, %v6223_v41  ;;  %4107 = vmatprep.mubr.msk.f32.mxu1 %vm363_vm0, %v6223_v41  ;;  %v303_v49 = vmul.f32 %v298_v45, %v279_v40  ;;  %v6346_v44 = vld [vmem:[%s7260_s25 + $0x58] sm:$0xff] }
 0x1ba   :  { %v6231_v52 = vadd.f32 %v305_v43, %v301_v48  ;;  %v6233_v56 = vadd.f32 %v307_v51, %v303_v49  ;;  %v6341_v43 = vld [vmem:[%s7260_s25 + $0x38] sm:$0xff] }
 0x1bb   :  { %v6355_v51 = vld [vmem:[%s7260_s25 + $0x78] sm:$0xff] }
 0x1bc   :  { %4086 = vmatmul.mubr.msk.f32.vlgmr.msra.gmra.mrb[0].mxu0 %vm363_vm0, %v6231_v52  ;;  %4108 = vmatmul.mubr.msk.f32.vlgmr.msra.gmra.mrb[0].mxu1 %vm363_vm0, %v6231_v52 }
 0x1bd   :  { %4815 = vmatpush3.bf16.msra.mxu0 %v4812_v31  ;;  %4088 = vmatprep.mubr.msk.f32.mxu0 %vm363_vm0, %v6229_v50 }
 0x1be   :  { %4110 = vmatprep.mubr.msk.f32.mxu1 %vm363_vm0, %v6229_v50  ;;  %4817 = vmatprep.subr.bf16.mxu0 %v4816_v53 }
 0x1c0   :  { %4089 = vmatmul.mubr.msk.f32.gmra.mrb[2].mxu0 %vm363_vm0, %v6233_v56  ;;  %4111 = vmatmul.mubr.msk.f32.gmra.mrb[2].mxu1 %vm363_vm0, %v6233_v56 }
 0x1c1   :  { %4819 = vmatpush3.bf16.msra.mxu0 %v4816_v53  ;;  %4129 = vmatprep.mubr.msk.f32.mxu0 %vm363_vm0, %v6223_v41 }
 0x1c2   :  { %4821 = vmatprep.subr.bf16.mxu0 %v4820_v57 }
 0x1c5   :  { %4823 = vmatpush3.bf16.msra.mxu0 %v4820_v57 }
 0x1c6   :  { %4825 = vmatprep.subr.bf16.mxu0 %v4824_v60 }
 0x1c9   :  { %4827 = vmatpush3.bf16.msra.mxu0 %v4824_v60 }
 0x1ca   :  { %4877 = vmatprep.subr.bf16.mxu0 %v6249_v63 }
 0x1cc   :  { %4130 = vmatmul.mubr.msk.f32.vlgmr.msra.gmra.mrb[4].mxu0 %vm363_vm0, %v6231_v52 }
 0x1cd   :  { %4132 = vmatprep.mubr.msk.f32.mxu0 %vm363_vm0, %v6229_v50  ;;  %4879 = vmatpush3.bf16.msra.mxu0 %v6249_v63 }
 0x1ce   :  { %4881 = vmatprep.subr.bf16.mxu0 %v6252_v2 }
 0x1d0   :  { %4133 = vmatmul.mubr.msk.f32.gmra.mrb[6].mxu0 %vm363_vm0, %v6233_v56 }
 0x1d1   :  { %4883 = vmatpush3.bf16.msra.mxu0 %v6252_v2 }
 0x1d2   :  { %4885 = vmatprep.subr.bf16.mxu0 %v6263_v5 }
 0x1d5   :  { %4887 = vmatpush3.bf16.msra.mxu0 %v6263_v5 }
 0x1d6   :  { %4889 = vmatprep.subr.bf16.mxu0 %v6267_v8 }
 0x1d9   :  { %4891 = vmatpush3.bf16.msra.mxu0 %v6267_v8 }
 0x1da   :  { %4893 = vmatprep.subr.bf16.mxu0 %v6271_v11 }
 0x1dd   :  { %4895 = vmatpush3.bf16.msra.mxu0 %v6271_v11 }
 0x1de   :  { %4897 = vmatprep.subr.bf16.mxu0 %v6274_v14 }
 0x1e1   :  { %4899 = vmatpush3.bf16.msra.mxu0 %v6274_v14 }
 0x1e2   :  { %4901 = vmatprep.subr.bf16.mxu0 %v6278_v17 }
 0x1e5   :  { %4903 = vmatpush3.bf16.msra.mxu0 %v6278_v17 }
 0x1e6   :  { %4905 = vmatprep.subr.bf16.mxu0 %v6282_v20 }
 0x1e9   :  { %4907 = vmatpush3.bf16.msra.mxu0 %v6282_v20 }
 0x28f   :  { %v4087_v23 = vpop.f32.mrb[0].mxu0  ;;  %v4109_v27 = vpop.f32.mrb[0].mxu1 }
 0x290   :  { %v6308_v28 = vadd.f32 %v4087_v23, %v3512_v21  ;;  %v548_v30 = vadd.f32 %v4109_v27, %v3517_v22  ;;  %v442_v31 = vpop.f32.mrb[1].mxu0  ;;  %v542_v34 = vpop.f32.mrb[1].mxu1 }
 0x291   :  { %v443_v35 = vadd.f32 %v3512_v21, %v442_v31  ;;  %v543_v38 = vadd.f32 %v3517_v22, %v542_v34 }
 0x292   :  { %v662_v39 = vmul.f32 %v548_v30, %v6296_v24  ;;  %v666_v40 = vmul.f32 %v548_v30, %v6301_v25  ;;  %v670_v45 = vmul.f32 %v548_v30, %v6306_v26  ;;  %v674_v46 = vmul.f32 %v548_v30, %v6313_v29 }
 0x293   :  { %v661_v47 = vmul.f32 %v543_v38, %v6318_v32  ;;  %v665_v48 = vmul.f32 %v543_v38, %v6323_v33  ;;  %v4090_v49 = vpop.f32.mrb[2].mxu0  ;;  %v4112_v53 = vpop.f32.mrb[2].mxu1  ;;  %4167 = vmatprep.mubr.msk.f32.mxu1 %vm363_vm0, %v443_v35  ;;  %v669_v57 = vmul.f32 %v543_v38, %v324_v36  ;;  %v673_v58 = vmul.f32 %v543_v38, %v328_v37  ;;  %v3522_v35 = vld [vmem:[#allocation13] ss:$0 sm:$0xff] }
 0x294   :  { %v6364_v59 = vadd.f32 %v4090_v49, %v3512_v21  ;;  %v558_v60 = vadd.f32 %v4112_v53, %v3517_v22  ;;  %v452_v61 = vpop.f32.mrb[3].mxu0  ;;  %v552_v1 = vpop.f32.mrb[3].mxu1 }
 0x295   :  { %v6378_v4 = vadd.f32 %v3512_v21, %v452_v61  ;;  %v553_v6 = vadd.f32 %v3517_v22, %v552_v1  ;;  %v4828_v7 = vpack.c.bf16 %v662_v39, %v661_v47  ;;  %v4840_v9 = vpack.c.bf16 %v666_v40, %v665_v48 }
 0x296   :  { %v664_v10 = vmul.f32 %v558_v60, %v6336_v42  ;;  %v668_v12 = vmul.f32 %v558_v60, %v6341_v43  ;;  %v672_v13 = vmul.f32 %v558_v60, %v6346_v44  ;;  %v676_v15 = vmul.f32 %v558_v60, %v6355_v51 }
 0x297   :  { %v663_v16 = vmul.f32 %v553_v6, %v318_v54  ;;  %v667_v18 = vmul.f32 %v553_v6, %v322_v55  ;;  %v671_v19 = vmul.f32 %v553_v6, %v326_v62  ;;  %v675_v23 = vmul.f32 %v553_v6, %v330_v0  ;;  %4830 = vmatprep.subr.msk.bf16.mxu1 %vm6374_vm1, %v4828_v7 }
 0x298   :  { %4833 = vmatpush3.bf16.xpose.msk.msra.mxu1 %vm6374_vm1, %v4828_v7  ;;  %v4852_v21 = vpack.c.bf16 %v670_v45, %v669_v57  ;;  %v4864_v22 = vpack.c.bf16 %v674_v46, %v673_v58 }
 0x299   :  { %v4834_v27 = vpack.c.bf16 %v664_v10, %v663_v16  ;;  %v4846_v30 = vpack.c.bf16 %v668_v12, %v667_v18  ;;  %v4858_v31 = vpack.c.bf16 %v672_v13, %v671_v19  ;;  %v4870_v34 = vpack.c.bf16 %v676_v15, %v675_v23  ;;  %v314_v18 = vld [vmem:[#allocation5 + $0x10] sm:$0xff] }
 0x29b   :  { %4836 = vmatprep.subr.msk.bf16.mxu1 %vm6374_vm1, %v4834_v27 }
 0x29f   :  { %v4131_v38 = vpop.f32.mrb[4].mxu0 }
 0x2a0   :  { %v648_v39 = vadd.f32 %v4131_v38, %v3522_v35  ;;  %v642_v40 = vpop.f32.mrb[5].mxu0  ;;  %4839 = vmatpush3.bf16.xpose.msk.msra.mxu1 %vm6374_vm1, %v4834_v27 }
 0x2a1   :  { %v643_v47 = vadd.f32 %v3522_v35, %v642_v40  ;;  %4842 = vmatprep.subr.msk.bf16.mxu1 %vm6374_vm1, %v4840_v9 }
 0x2a2   :  { %v678_v45 = vmul.f32 %v648_v39, %v6296_v24  ;;  %v682_v46 = vmul.f32 %v648_v39, %v6301_v25  ;;  %v686_v48 = vmul.f32 %v648_v39, %v6306_v26  ;;  %v690_v49 = vmul.f32 %v648_v39, %v6313_v29 }
 0x2a3   :  { %v4134_v53 = vpop.f32.mrb[6].mxu0  ;;  %v677_v57 = vmul.f32 %v643_v47, %v6318_v32  ;;  %v681_v58 = vmul.f32 %v643_v47, %v6323_v33  ;;  %v685_v60 = vmul.f32 %v643_v47, %v324_v36  ;;  %v689_v61 = vmul.f32 %v643_v47, %v328_v37 }
 0x2a4   :  { %v658_v1 = vadd.f32 %v4134_v53, %v3522_v35  ;;  %v652_v6 = vpop.f32.mrb[7].mxu0 }
 0x2a5   :  { %v653_v7 = vadd.f32 %v3522_v35, %v652_v6  ;;  %v6400_v10 = vpack.c.bf16 %v678_v45, %v677_v57  ;;  %v6402_v12 = vpack.c.bf16 %v682_v46, %v681_v58  ;;  %v6404_v24 = vpack.c.bf16 %v686_v48, %v685_v60  ;;  %v1036_v57 = vld [vmem:[#allocation14] sm:$0xff]  ;;  %v1037_v58 = vld [vmem:[#allocation14 + $0x8] sm:$0xff]  ;;  %v1038_v60 = vld [vmem:[#allocation14 + $0x10] sm:$0xff] }
 0x2a6   :  { %v680_v25 = vmul.f32 %v658_v1, %v6336_v42  ;;  %v684_v26 = vmul.f32 %v658_v1, %v6341_v43  ;;  %v688_v29 = vmul.f32 %v658_v1, %v6346_v44  ;;  %v6409_v32 = vpack.c.bf16 %v690_v49, %v689_v61 }
 0x2a7   :  { %4909 = vmatprep.subr.bf16.mxu0 %v6400_v10  ;;  %v679_v33 = vmul.f32 %v653_v7, %v318_v54  ;;  %v683_v36 = vmul.f32 %v653_v7, %v322_v55  ;;  %v687_v37 = vmul.f32 %v653_v7, %v326_v62  ;;  %v691_v13 = vmul.f32 %v653_v7, %v330_v0  ;;  %v312_v54 = vld [vmem:[#allocation5] sm:$0xff] }
 0x2a8   :  { %4845 = vmatpush3.bf16.xpose.msk.msra.mxu1 %vm6374_vm1, %v4840_v9  ;;  %v692_v15 = vmul.f32 %v658_v1, %v6355_v51  ;;  %v313_v51 = vld [vmem:[#allocation5 + $0x8] sm:$0xff]  ;;  %v4940_v61 = vpack.c.bf16 %v1037_v58, %v1036_v57  ;;  %v1039_v1 = vld [vmem:[#allocation14 + $0x18] sm:$0xff] }
 0x2a9   :  { %4848 = vmatprep.subr.msk.bf16.mxu1 %vm6374_vm1, %v4846_v30  ;;  %v4912_v42 = vpack.c.bf16 %v680_v25, %v679_v33  ;;  %v4920_v43 = vpack.c.bf16 %v684_v26, %v683_v36  ;;  %v6417_v16 = vpack.c.bf16 %v688_v29, %v687_v37  ;;  %v4944_v6 = vpack.c.bf16 %v1039_v1, %v1038_v60  ;;  %v1040_v7 = vld [vmem:[#allocation14 + $0x20] sm:$0xff]  ;;  %v1043_v25 = vld [vmem:[#allocation14 + $0x38] sm:$0xff] }
 0x2aa   :  { %v6419_v44 = vpack.c.bf16 %v692_v15, %v691_v13 }
 0x2b0   :  { %4851 = vmatpush3.bf16.xpose.msk.msra.mxu1 %vm6374_vm1, %v4846_v30 }
 0x2b1   :  { %4854 = vmatprep.subr.msk.bf16.mxu1 %vm6374_vm1, %v4852_v21 }
 0x2b8   :  { %4857 = vmatpush3.bf16.xpose.msk.msra.mxu1 %vm6374_vm1, %v4852_v21 }
 0x2b9   :  { %4860 = vmatprep.subr.msk.bf16.mxu1 %vm6374_vm1, %v4858_v31 }
 0x2c0   :  { %4863 = vmatpush3.bf16.xpose.msk.msra.mxu1 %vm6374_vm1, %v4858_v31 }
 0x2c1   :  { %4866 = vmatprep.subr.msk.bf16.mxu1 %vm6374_vm1, %v4864_v22 }
 0x2c8   :  { %4869 = vmatpush3.bf16.xpose.msk.msra.mxu1 %vm6374_vm1, %v4864_v22  ;;  %v315_v22 = vld [vmem:[#allocation5 + $0x18] sm:$0xff] }
 0x2c9   :  { %4872 = vmatprep.subr.msk.bf16.mxu1 %vm6374_vm1, %v4870_v34 }
 0x2d0   :  { %4875 = vmatpush3.bf16.xpose.msk.msra.mxu1 %vm6374_vm1, %v4870_v34 }
 0x2d1   :  { %4941 = vmatprep.subr.bf16.mxu1 %v4940_v61 }
 0x2d7   :  { %4168 = vmatmul.mubr.msk.f32.vlgmr.msra.gmra.mrb[4].mxu1 %vm363_vm0, %v6308_v28 }
 0x2d8   :  { %4170 = vmatprep.mubr.msk.f32.mxu1 %vm363_vm0, %v6378_v4  ;;  %4943 = vmatpush3.bf16.msra.mxu1 %v4940_v61 }
 0x2d9   :  { %4945 = vmatprep.subr.bf16.mxu1 %v4944_v6 }
 0x2db   :  { %4171 = vmatmul.mubr.msk.f32.gmra.mrb[6].mxu1 %vm363_vm0, %v6364_v59 }
 0x2dc   :  { %4947 = vmatpush3.bf16.msra.mxu1 %v4944_v6 }
 0x3aa   :  { %v4169_v55 = vpop.f32.mrb[4].mxu1 }
 0x3ab   :  { %v825_v62 = vadd.f32 %v4169_v55, %v313_v51  ;;  %v819_v0 = vpop.f32.mrb[5].mxu1 }
 0x3ac   :  { %v820_v9 = vadd.f32 %v819_v0, %v312_v54 }
 0x3ad   :  { %840 = vmax.xlane.f32.xlu1 %v825_v62 }
 0x3ae   :  { %v4172_v19 = vpop.f32.mrb[6].mxu1  ;;  %838 = vmax.xlane.f32.xlu0 %v820_v9 }
 0x3af   :  { %v829_v23 = vpop.f32.mrb[7].mxu1  ;;  %v835_v28 = vadd.f32 %v4172_v19, %v315_v22 }
 0x3b0   :  { %v830_v21 = vadd.f32 %v829_v23, %v314_v18 }
 0x3b2   :  { %842 = vmax.xlane.f32.xlu0 %v830_v21 }
 0x3b6   :  { %844 = vmax.xlane.f32.xlu0 %v835_v28 }
 0x43a   :  { %v841_v4 = vpop.xlane.xlu1 %840 }
 0x43b   :  { %v847_v27 = vsub.f32 %v825_v62, %v841_v4  ;;  %v839_v30 = vpop.xlane.xlu0 %838 }
 0x43c   :  { %v846_v59 = vsub.f32 %v820_v9, %v839_v30  ;;  %v3547_v9 = vld [vmem:[#allocation16] ss:$0 sm:$0xff] }
 0x43d   :  { %v852_v31 = vmul.f32 1.442695, %v847_v27 }
 0x43e   :  { %v850_v34 = vmul.f32 1.442695, %v846_v59 }
 0x43f   :  { %v843_v35 = vpop.xlane.xlu0 %842 }
 0x440   :  { %5388 = vpow2.f32 %v850_v34  ;;  %v848_v38 = vsub.f32 %v830_v21, %v843_v35 }
 0x441   :  { %5390 = vpow2.f32 %v852_v31 }
 0x442   :  { %v854_v39 = vmul.f32 1.442695, %v848_v38 }
 0x443   :  { %v845_v40 = vpop.xlane.xlu0 %844 }
 0x444   :  { %5392 = vpow2.f32 %v854_v39  ;;  %v849_v47 = vsub.f32 %v835_v28, %v845_v40 }
 0x446   :  { %v856_v45 = vmul.f32 1.442695, %v849_v47 }
 0x448   :  { %5394 = vpow2.f32 %v856_v45 }
 0x44a   :  { %v5389_v46 = vpop.eup %5388 }
 0x44b   :  { %v5391_v48 = vpop.eup %5390  ;;  %4205 = vmatprep.mubr.f32.mxu0 %v5389_v46 }
 0x44c   :  { %4206 = vmatmul.mubr.f32.vlgmr.msra.gmra.mrb[8].mxu0 %v5391_v48 }
 0x44d   :  { %4911 = vmatpush3.bf16.msra.mxu0 %v6400_v10  ;;  %v1041_v10 = vld [vmem:[#allocation14 + $0x28] sm:$0xff] }
 0x44e   :  { %v5393_v49 = vpop.eup %5392  ;;  %4913 = vmatprep.subr.bf16.mxu0 %v4912_v42 }
 0x44f   :  { %4208 = vmatprep.mubr.f32.mxu0 %v5393_v49 }
 0x451   :  { %4915 = vmatpush3.bf16.msra.mxu0 %v4912_v42 }
 0x452   :  { %v5395_v53 = vpop.eup %5394  ;;  %4917 = vmatprep.subr.bf16.mxu0 %v6402_v12 }
 0x453   :  { %4209 = vmatmul.mubr.f32.gmra.mrb[10].mxu0 %v5395_v53 }
 0x455   :  { %4919 = vmatpush3.bf16.msra.mxu0 %v6402_v12  ;;  %v4948_v12 = vpack.c.bf16 %v1041_v10, %v1040_v7 }
 0x456   :  { %4921 = vmatprep.subr.bf16.mxu0 %v4920_v43 }
 0x457   :  { %4949 = vmatprep.subr.bf16.mxu1 %v4948_v12 }
 0x458   :  { %4951 = vmatpush3.bf16.msra.mxu1 %v4948_v12 }
 0x459   :  { %4923 = vmatpush3.bf16.msra.mxu0 %v4920_v43 }
 0x45a   :  { %4925 = vmatprep.subr.bf16.mxu0 %v6404_v24 }
 0x45d   :  { %4927 = vmatpush3.bf16.msra.mxu0 %v6404_v24  ;;  %v1042_v24 = vld [vmem:[#allocation14 + $0x30] sm:$0xff] }
 0x45e   :  { %4929 = vmatprep.subr.bf16.mxu0 %v6417_v16  ;;  %v4952_v26 = vpack.c.bf16 %v1043_v25, %v1042_v24  ;;  %v1227_v25 = vld [vmem:[#allocation17] sm:$0xff] }
 0x460   :  { %4953 = vmatprep.subr.bf16.mxu1 %v4952_v26 }
 0x461   :  { %4931 = vmatpush3.bf16.msra.mxu0 %v6417_v16  ;;  %4955 = vmatpush3.bf16.msra.mxu1 %v4952_v26  ;;  %v1228_v26 = vld [vmem:[#allocation17 + $0x8] sm:$0xff] }
 0x462   :  { %4933 = vmatprep.subr.bf16.mxu0 %v6409_v32 }
 0x465   :  { %4935 = vmatpush3.bf16.msra.mxu0 %v6409_v32 }
 0x466   :  { %4937 = vmatprep.subr.bf16.mxu0 %v6419_v44 }
 0x469   :  { %4939 = vmatpush3.bf16.msra.mxu0 %v6419_v44 }
 0x51f   :  { %v4207_v29 = vpop.f32.mrb[8].mxu0 }
 0x520   :  { %5396 = vrcp.f32 %v4207_v29  ;;  %v924_v32 = vpop.f32.mrb[9].mxu0  ;;  %v4956_v29 = vpack.c.bf16 %v1228_v26, %v1227_v25  ;;  %v1352_v25 = vld [vmem:[%s7214_s18 + $0x48] sm:$0xff] }
 0x521   :  { %5398 = vrcp.f32 %v924_v32  ;;  %v1229_v32 = vld [vmem:[#allocation17 + $0x10] sm:$0xff] }
 0x522   :  { %4957 = vmatprep.subr.bf16.mxu0 %v4956_v29 }
 0x526   :  { %v4210_v33 = vpop.f32.mrb[10].mxu0 }
 0x527   :  { %5400 = vrcp.f32 %v4210_v33  ;;  %v934_v36 = vpop.f32.mrb[11].mxu0  ;;  %v1230_v33 = vld [vmem:[#allocation17 + $0x18] sm:$0xff] }
 0x528   :  { %5402 = vrcp.f32 %v934_v36  ;;  %v4960_v36 = vpack.c.bf16 %v1230_v33, %v1229_v32  ;;  %v1354_v32 = vld [vmem:[%s7214_s18 + $0x58] sm:$0xff] }
 0x52a   :  { %v5397_v37 = vpop.eup %5396 }
 0x52b   :  { %v5399_v13 = vpop.eup %5398  ;;  %v946_v42 = vmul.f32 %v5397_v37, %v5391_v48  ;;  %v1231_v37 = vld [vmem:[#allocation17 + $0x20] sm:$0xff] }
 0x52c   :  { %v944_v15 = vmul.f32 %v5399_v13, %v5389_v46  ;;  %v1232_v13 = vld [vmem:[#allocation17 + $0x28] sm:$0xff] }
 0x52e   :  { %4243 = vmatprep.mubr.f32.mxu0 %v944_v15  ;;  %v1233_v15 = vld [vmem:[#allocation17 + $0x30] sm:$0xff] }
 0x52f   :  { %4244 = vmatmul.mubr.f32.vlgmr.msra.gmra.mrb[12].mxu0 %v946_v42  ;;  %v4964_v42 = vpack.c.bf16 %v1232_v13, %v1231_v37  ;;  %v1356_v37 = vld [vmem:[%s7214_s18 + $0x68] sm:$0xff] }
 0x530   :  { %4959 = vmatpush3.bf16.msra.mxu0 %v4956_v29  ;;  %v1353_v29 = vld [vmem:[%s7214_s18 + $0x50] sm:$0xff] }
 0x531   :  { %v5401_v43 = vpop.eup %5400  ;;  %4961 = vmatprep.subr.bf16.mxu0 %v4960_v36  ;;  %v4992_v33 = vpack.c.bf16 %v1354_v32, %v1353_v29 }
 0x532   :  { %v5403_v16 = vpop.eup %5402  ;;  %v950_v51 = vmul.f32 %v5401_v43, %v5395_v53  ;;  %v1234_v43 = vld [vmem:[#allocation17 + $0x38] sm:$0xff] }
 0x533   :  { %v948_v44 = vmul.f32 %v5403_v16, %v5393_v49  ;;  %v4968_v16 = vpack.c.bf16 %v1234_v43, %v1233_v15  ;;  %v1357_v15 = vld [vmem:[%s7214_s18 + $0x70] sm:$0xff] }
 0x534   :  { %4963 = vmatpush3.bf16.msra.mxu0 %v4960_v36  ;;  %v1355_v36 = vld [vmem:[%s7214_s18 + $0x60] sm:$0xff] }
 0x535   :  { %4246 = vmatprep.mubr.f32.mxu0 %v948_v44  ;;  %4965 = vmatprep.subr.bf16.mxu0 %v4964_v42  ;;  %v1343_v44 = vld [vmem:[%s7214_s18] sm:$0xff]  ;;  %v4996_v13 = vpack.c.bf16 %v1356_v37, %v1355_v36 }
 0x536   :  { %4247 = vmatmul.mubr.f32.gmra.mrb[14].mxu0 %v950_v51  ;;  %v1344_v51 = vld [vmem:[%s7214_s18 + $0x8] sm:$0xff]  ;;  %v1530_v37 = vld [vmem:[#allocation8 + $0x40] sm:$0xff] }
 0x538   :  { %4967 = vmatpush3.bf16.msra.mxu0 %v4964_v42  ;;  %v1358_v42 = vld [vmem:[%s7214_s18 + $0x78] sm:$0xff] }
 0x539   :  { %4969 = vmatprep.subr.bf16.mxu0 %v4968_v16  ;;  %v5000_v43 = vpack.c.bf16 %v1358_v42, %v1357_v15  ;;  %v1746_v42 = vld [vmem:[#allocation11 + $0x40] sm:$0xff] }
 0x53c   :  { %4971 = vmatpush3.bf16.msra.mxu0 %v4968_v16  ;;  %v3554_v16 = vld [vmem:[#allocation19] ss:$0 sm:$0xff] }
 0x602   :  { %v4245_v54 = vpop.f32.mrb[12].mxu0 }
 0x603   :  { %v1017_v55 = vpop.f32.mrb[13].mxu0 }
 0x604   :  { %4265 = vmatprep.mubr.msk.f32.mxu1 %vm363_vm0, %v1017_v55 }
 0x605   :  { %4266 = vmatmul.mubr.msk.f32.vlgmr.msra.gmra.mrb[8].mxu1 %vm363_vm0, %v4245_v54  ;;  %v4972_v54 = vpack.c.bf16 %v1344_v51, %v1343_v44 }
 0x607   :  { %4973 = vmatprep.subr.bf16.mxu0 %v4972_v54 }
 0x609   :  { %v4248_v62 = vpop.f32.mrb[14].mxu0 }
 0x60a   :  { %v1027_v0 = vpop.f32.mrb[15].mxu0 }
 0x60b   :  { %4268 = vmatprep.mubr.msk.f32.mxu1 %vm363_vm0, %v1027_v0 }
 0x60c   :  { %4269 = vmatmul.mubr.msk.f32.gmra.mrb[10].mxu1 %vm363_vm0, %v4248_v62 }
 0x6d8   :  { %v4267_v18 = vpop.f32.mrb[8].mxu1 }
 0x6d9   :  { %v1135_v19 = vadd.f32 %v4267_v18, %v3547_v9  ;;  %v1129_v23 = vpop.f32.mrb[9].mxu1 }
 0x6da   :  { %v1130_v21 = vadd.f32 %v3547_v9, %v1129_v23 }
 0x6db   :  { %v1149_v22 = vadd.f32 %v1135_v19, %v6231_v52 }
 0x6dc   :  { %v1148_v28 = vadd.f32 %v1130_v21, %v6223_v41 }
 0x6dd   :  { %v1157_v4 = vsel %vm363_vm0, %v1149_v22, 0.0 }
 0x6de   :  { %1158 = vadd.xlane.f32.xlu0 %v1157_v4  ;;  %v1154_v27 = vsel %vm363_vm0, %v1148_v28, 0.0 }
 0x6df   :  { %1155 = vadd.xlane.f32.xlu1 %v1154_v27  ;;  %v4270_v30 = vpop.f32.mrb[10].mxu1 }
 0x6e0   :  { %v1145_v59 = vadd.f32 %v4270_v30, %v3547_v9  ;;  %v1139_v31 = vpop.f32.mrb[11].mxu1 }
 0x6e1   :  { %v1140_v34 = vadd.f32 %v3547_v9, %v1139_v31 }
 0x6e2   :  { %v1151_v35 = vadd.f32 %v1145_v59, %v6233_v56  ;;  %v3552_v59 = vld [vmem:[%s7210_s14] ss:$0 sm:$0xff] }
 0x6e3   :  { %v1150_v38 = vadd.f32 %v1140_v34, %v6229_v50 }
 0x6e4   :  { %v1163_v39 = vsel %vm363_vm0, %v1151_v35, 0.0 }
 0x6e5   :  { %1164 = vadd.xlane.f32.xlu0 %v1163_v39  ;;  %v1160_v52 = vsel %vm363_vm0, %v1150_v38, 0.0 }
 0x6e6   :  { %1161 = vadd.xlane.f32.xlu1 %v1160_v52 }
 0x76b   :  { %v1159_v41 = vpop.xlane.xlu0 %1158 }
 0x76c   :  { %v1168_v40 = vmul.f32 0.015625, %v1159_v41  ;;  %v1156_v47 = vpop.xlane.xlu1 %1155  ;;  %v1345_v41 = vld [vmem:[%s7214_s18 + $0x10] sm:$0xff] }
 0x76d   :  { %v1167_v45 = vmul.f32 0.015625, %v1156_v47 }
 0x76e   :  { %v6468_v46 = vsub.f32 %v1149_v22, %v1168_v40  ;;  %v1346_v40 = vld [vmem:[%s7214_s18 + $0x18] sm:$0xff] }
 0x76f   :  { %v6470_v48 = vsub.f32 %v1148_v28, %v1167_v45 }
 0x770   :  { %v1176_v49 = vmul.f32 %v6468_v46, %v6468_v46 }
 0x771   :  { %v1175_v50 = vmul.f32 %v6470_v48, %v6470_v48 }
 0x772   :  { %v1165_v56 = vpop.xlane.xlu0 %1164  ;;  %v1182_v53 = vsel %vm363_vm0, %v1176_v49, 0.0 }
 0x773   :  { %v1170_v57 = vmul.f32 0.015625, %v1165_v56  ;;  %1183 = vadd.xlane.f32.xlu0 %v1182_v53  ;;  %v1162_v58 = vpop.xlane.xlu1 %1161  ;;  %v1179_v60 = vsel %vm363_vm0, %v1175_v50, 0.0  ;;  %v1347_v56 = vld [vmem:[%s7214_s18 + $0x20] sm:$0xff]  ;;  %v1348_v53 = vld [vmem:[%s7214_s18 + $0x28] sm:$0xff] }
 0x774   :  { %v1169_v61 = vmul.f32 0.015625, %v1162_v58  ;;  %1180 = vadd.xlane.f32.xlu1 %v1179_v60 }
 0x775   :  { %v6478_v1 = vsub.f32 %v1151_v35, %v1170_v57 }
 0x776   :  { %v6480_v6 = vsub.f32 %v1150_v38, %v1169_v61  ;;  %v3553_v38 = vld [vmem:[%s7211_s15] ss:$0 sm:$0xff]  ;;  %v4980_v61 = vpack.c.bf16 %v1348_v53, %v1347_v56 }
 0x777   :  { %v1178_v7 = vmul.f32 %v6478_v1, %v6478_v1 }
 0x778   :  { %v1177_v10 = vmul.f32 %v6480_v6, %v6480_v6 }
 0x779   :  { %v1188_v12 = vsel %vm363_vm0, %v1178_v7, 0.0  ;;  %v1350_v7 = vld [vmem:[%s7214_s18 + $0x38] sm:$0xff] }
 0x77a   :  { %1189 = vadd.xlane.f32.xlu0 %v1188_v12  ;;  %v1185_v24 = vsel %vm363_vm0, %v1177_v10, 0.0 }
 0x77b   :  { %1186 = vadd.xlane.f32.xlu1 %v1185_v24  ;;  %v1351_v24 = vld [vmem:[%s7214_s18 + $0x40] sm:$0xff] }
 0x77c   :  { %v4988_v26 = vpack.c.bf16 %v1352_v25, %v1351_v24 }
 0x800   :  { %v1184_v55 = vpop.xlane.xlu0 %1183 }
 0x801   :  { %v1192_v62 = vmul.f32 0.015625, %v1184_v55  ;;  %v1181_v0 = vpop.xlane.xlu1 %1180 }
 0x802   :  { %v1191_v9 = vmul.f32 0.015625, %v1181_v0 }
 0x803   :  { %v1196_v18 = vadd.f32 1e-05, %v1192_v62 }
 0x804   :  { %v1195_v19 = vadd.f32 1e-05, %v1191_v9 }
 0x805   :  { %5404 = vrsqrt.f32 %v1196_v18 }
 0x806   :  { %5406 = vrsqrt.f32 %v1195_v19 }
 0x807   :  { %v1190_v23 = vpop.xlane.xlu0 %1189 }
 0x808   :  { %v1194_v21 = vmul.f32 0.015625, %v1190_v23  ;;  %v1187_v22 = vpop.xlane.xlu1 %1186 }
 0x809   :  { %v1193_v28 = vmul.f32 0.015625, %v1187_v22 }
 0x80a   :  { %v1198_v4 = vadd.f32 1e-05, %v1194_v21 }
 0x80b   :  { %v1197_v27 = vadd.f32 1e-05, %v1193_v28  ;;  %v3559_v28 = vld [vmem:[#allocation20] ss:$0 sm:$0xff] }
 0x80c   :  { %5408 = vrsqrt.f32 %v1198_v4 }
 0x80d   :  { %5410 = vrsqrt.f32 %v1197_v27 }
 0x80f   :  { %v5405_v30 = vpop.eup %5404 }
 0x810   :  { %v5407_v31 = vpop.eup %5406  ;;  %v1204_v34 = vmul.f32 %v5405_v30, %v6468_v46 }
 0x811   :  { %v1203_v35 = vmul.f32 %v5407_v31, %v6470_v48  ;;  %v4976_v48 = vpack.c.bf16 %v1346_v40, %v1345_v41 }
 0x812   :  { %v1214_v39 = vmul.f32 %v3552_v59, %v1204_v34 }
 0x813   :  { %v1213_v52 = vmul.f32 %v3552_v59, %v1203_v35 }
 0x814   :  { %v6510_v46 = vadd.f32 %v3553_v38, %v1214_v39 }
 0x815   :  { %v6508_v47 = vadd.f32 %v3553_v38, %v1213_v52 }
 0x816   :  { %v5409_v45 = vpop.eup %5408 }
 0x817   :  { %v5411_v49 = vpop.eup %5410  ;;  %4287 = vmatprep.mubr.msk.f32.mxu0 %vm363_vm0, %v6508_v47  ;;  %v1206_v50 = vmul.f32 %v5409_v45, %v6478_v1  ;;  %v1349_v1 = vld [vmem:[%s7214_s18 + $0x30] sm:$0xff] }
 0x818   :  { %4288 = vmatmul.mubr.msk.f32.vlgmr.msra.gmra.mrb[16].mxu0 %vm363_vm0, %v6510_v46  ;;  %v1205_v57 = vmul.f32 %v5411_v49, %v6480_v6  ;;  %v4984_v6 = vpack.c.bf16 %v1350_v7, %v1349_v1 }
 0x819   :  { %v1216_v58 = vmul.f32 %v3552_v59, %v1206_v50  ;;  %4975 = vmatpush3.bf16.msra.mxu0 %v4972_v54 }
 0x81a   :  { %v1215_v60 = vmul.f32 %v3552_v59, %v1205_v57  ;;  %4977 = vmatprep.subr.bf16.mxu0 %v4976_v48 }
 0x81b   :  { %v1226_v12 = vadd.f32 %v3553_v38, %v1216_v58 }
 0x81c   :  { %v6530_v10 = vadd.f32 %v3553_v38, %v1215_v60 }
 0x81d   :  { %4979 = vmatpush3.bf16.msra.mxu0 %v4976_v48 }
 0x81e   :  { %4290 = vmatprep.mubr.msk.f32.mxu0 %vm363_vm0, %v6530_v10  ;;  %4981 = vmatprep.subr.bf16.mxu0 %v4980_v61 }
 0x81f   :  { %4291 = vmatmul.mubr.msk.f32.gmra.mrb[18].mxu0 %vm363_vm0, %v1226_v12 }
 0x821   :  { %4983 = vmatpush3.bf16.msra.mxu0 %v4980_v61 }
 0x822   :  { %4985 = vmatprep.subr.bf16.mxu0 %v4984_v6 }
 0x825   :  { %4987 = vmatpush3.bf16.msra.mxu0 %v4984_v6 }
 0x826   :  { %4989 = vmatprep.subr.bf16.mxu0 %v4988_v26 }
 0x829   :  { %4991 = vmatpush3.bf16.msra.mxu0 %v4988_v26 }
 0x82a   :  { %4993 = vmatprep.subr.bf16.mxu0 %v4992_v33 }
 0x82d   :  { %4995 = vmatpush3.bf16.msra.mxu0 %v4992_v33 }
 0x82e   :  { %4997 = vmatprep.subr.bf16.mxu0 %v4996_v13 }
 0x831   :  { %4999 = vmatpush3.bf16.msra.mxu0 %v4996_v13  ;;  %v1531_v13 = vld [vmem:[#allocation8 + $0x48] sm:$0xff] }
 0x832   :  { %5001 = vmatprep.subr.bf16.mxu0 %v5000_v43  ;;  %v5004_v15 = vpack.c.bf16 %v1531_v13, %v1530_v37 }
 0x835   :  { %5003 = vmatpush3.bf16.msra.mxu0 %v5000_v43  ;;  %v1747_v43 = vld [vmem:[#allocation11 + $0x48] sm:$0xff] }
 0x836   :  { %5005 = vmatprep.subr.bf16.mxu0 %v5004_v15 }
 0x8eb   :  { %v4289_v44 = vpop.f32.mrb[16].mxu0 }
 0x8ec   :  { %v1326_v51 = vadd.f32 %v4289_v44, %v3554_v16  ;;  %v1320_v54 = vpop.f32.mrb[17].mxu0  ;;  %v1532_v44 = vld [vmem:[#allocation8 + $0x50] sm:$0xff] }
 0x8ed   :  { %v1321_v55 = vadd.f32 %v3554_v16, %v1320_v54 }
 0x8ee   :  { %v1340_v0 = vmax.f32 %v1326_v51, 0.0  ;;  %v1533_v51 = vld [vmem:[#allocation8 + $0x58] sm:$0xff] }
 0x8ef   :  { %v1339_v62 = vmax.f32 %v1321_v55, 0.0  ;;  %v5008_v54 = vpack.c.bf16 %v1533_v51, %v1532_v44  ;;  %v1748_v55 = vld [vmem:[#allocation11 + $0x50] sm:$0xff] }
 0x8f1   :  { %4325 = vmatprep.mubr.f32.mxu0 %v1339_v62  ;;  %v1749_v62 = vld [vmem:[#allocation11 + $0x58] sm:$0xff] }
 0x8f2   :  { %v4292_v9 = vpop.f32.mrb[18].mxu0  ;;  %4326 = vmatmul.mubr.f32.vlgmr.msra.gmra.mrb[20].mxu0 %v1340_v0  ;;  %v5040_v0 = vpack.c.bf16 %v1749_v62, %v1748_v55 }
 0x8f3   :  { %v1336_v18 = vadd.f32 %v4292_v9, %v3554_v16  ;;  %v1330_v19 = vpop.f32.mrb[19].mxu0  ;;  %5007 = vmatpush3.bf16.msra.mxu0 %v5004_v15  ;;  %v1534_v9 = vld [vmem:[#allocation8 + $0x60] sm:$0xff] }
 0x8f4   :  { %v1331_v23 = vadd.f32 %v3554_v16, %v1330_v19  ;;  %v5036_v16 = vpack.c.bf16 %v1747_v43, %v1746_v42  ;;  %5009 = vmatprep.subr.bf16.mxu0 %v5008_v54  ;;  %v1648_v42 = vld [vmem:[#allocation10 + $0x60] sm:$0xff]  ;;  %v1649_v43 = vld [vmem:[#allocation10 + $0x68] sm:$0xff] }
 0x8f5   :  { %v1342_v22 = vmax.f32 %v1336_v18, 0.0  ;;  %v1535_v18 = vld [vmem:[#allocation8 + $0x68] sm:$0xff]  ;;  %v5028_v51 = vpack.c.bf16 %v1649_v43, %v1648_v42  ;;  %v5467_v43 = vld [vmem:[%s7260_s25 + $0x70] sm:$0xff] }
 0x8f6   :  { %v1341_v21 = vmax.f32 %v1331_v23, 0.0  ;;  %5037 = vmatprep.subr.bf16.mxu1 %v5036_v16  ;;  %v5012_v19 = vpack.c.bf16 %v1535_v18, %v1534_v9  ;;  %v1750_v23 = vld [vmem:[#allocation11 + $0x60] sm:$0xff] }
 0x8f7   :  { %5039 = vmatpush3.bf16.msra.mxu1 %v5036_v16  ;;  %5011 = vmatpush3.bf16.msra.mxu0 %v5008_v54  ;;  %v1651_v54 = vld [vmem:[#allocation10 + $0x78] sm:$0xff] }
 0x8f8   :  { %4328 = vmatprep.mubr.f32.mxu0 %v1341_v21  ;;  %5041 = vmatprep.subr.bf16.mxu1 %v5040_v0  ;;  %v1751_v21 = vld [vmem:[#allocation11 + $0x68] sm:$0xff] }
 0x8f9   :  { %4329 = vmatmul.mubr.f32.gmra.mrb[22].mxu0 %v1342_v22  ;;  %v1536_v22 = vld [vmem:[#allocation8 + $0x70] sm:$0xff]  ;;  %5013 = vmatprep.subr.bf16.mxu0 %v5012_v19 }
 0x8fb   :  { %5043 = vmatpush3.bf16.msra.mxu1 %v5040_v0  ;;  %5015 = vmatpush3.bf16.msra.mxu0 %v5012_v19 }
 0x9c5   :  { %v4327_v4 = vpop.f32.mrb[20].mxu0 }
 0x9c6   :  { %v1438_v27 = vadd.f32 %v4327_v4, %v3559_v28  ;;  %v1432_v30 = vpop.f32.mrb[21].mxu0  ;;  %v1537_v4 = vld [vmem:[#allocation8 + $0x78] sm:$0xff] }
 0x9c7   :  { %v1433_v59 = vadd.f32 %v3559_v28, %v1432_v30  ;;  %v1753_v30 = vld [vmem:[#allocation11 + $0x78] sm:$0xff] }
 0x9c8   :  { %v1452_v31 = vadd.f32 %v1438_v27, %v6510_v46  ;;  %v1752_v27 = vld [vmem:[#allocation11 + $0x70] sm:$0xff] }
 0x9c9   :  { %v1451_v34 = vadd.f32 %v1433_v59, %v6508_v47  ;;  %v5016_v59 = vpack.c.bf16 %v1537_v4, %v1536_v22  ;;  %v5454_v22 = vld [vmem:[%s7260_s25 + $0x48] sm:$0xff] }
 0x9ca   :  { %v1460_v35 = vsel %vm363_vm0, %v1452_v31, 0.0  ;;  %v5455_v4 = vld [vmem:[%s7260_s25 + $0x68] sm:$0xff] }
 0x9cb   :  { %1461 = vadd.xlane.f32.xlu0 %v1460_v35  ;;  %v1457_v38 = vsel %vm363_vm0, %v1451_v34, 0.0  ;;  %5017 = vmatprep.subr.bf16.mxu0 %v5016_v59  ;;  %v1645_v35 = vld [vmem:[#allocation10 + $0x48] sm:$0xff] }
 0x9cc   :  { %1458 = vadd.xlane.f32.xlu1 %v1457_v38  ;;  %v4330_v39 = vpop.f32.mrb[22].mxu0  ;;  %5019 = vmatpush3.bf16.msra.mxu0 %v5016_v59 }
 0x9cd   :  { %v1448_v52 = vadd.f32 %v4330_v39, %v3559_v28  ;;  %v1442_v41 = vpop.f32.mrb[23].mxu0 }
 0x9ce   :  { %v1443_v40 = vadd.f32 %v3559_v28, %v1442_v41  ;;  %v5044_v28 = vpack.c.bf16 %v1751_v21, %v1750_v23 }
 0x9cf   :  { %v1454_v45 = vadd.f32 %v1448_v52, %v1226_v12 }
 0x9d0   :  { %v1453_v48 = vadd.f32 %v1443_v40, %v6530_v10  ;;  %5045 = vmatprep.subr.bf16.mxu1 %v5044_v28 }
 0x9d1   :  { %v1466_v49 = vsel %vm363_vm0, %v1454_v45, 0.0  ;;  %5047 = vmatpush3.bf16.msra.mxu1 %v5044_v28 }
 0x9d2   :  { %1467 = vadd.xlane.f32.xlu0 %v1466_v49  ;;  %v1463_v46 = vsel %vm363_vm0, %v1453_v48, 0.0 }
 0x9d3   :  { %1464 = vadd.xlane.f32.xlu1 %v1463_v46 }
 0xa58   :  { %v1462_v47 = vpop.xlane.xlu0 %1461 }
 0xa59   :  { %v1470_v50 = vmul.f32 0.015625, %v1462_v47  ;;  %v1459_v56 = vpop.xlane.xlu1 %1458 }
 0xa5a   :  { %v1469_v53 = vmul.f32 0.015625, %v1459_v56 }
 0xa5b   :  { %v6566_v57 = vsub.f32 %v1452_v31, %v1470_v50  ;;  %v5048_v31 = vpack.c.bf16 %v1753_v30, %v1752_v27  ;;  %v5456_v30 = vld [vmem:[%s7260_s25] sm:$0xff] }
 0xa5c   :  { %v6568_v58 = vsub.f32 %v1451_v34, %v1469_v53  ;;  %v1644_v34 = vld [vmem:[#allocation10 + $0x40] sm:$0xff] }
 0xa5d   :  { %v1478_v60 = vmul.f32 %v6566_v57, %v6566_v57  ;;  %5049 = vmatprep.subr.bf16.mxu1 %v5048_v31  ;;  %v5020_v38 = vpack.c.bf16 %v1645_v35, %v1644_v34  ;;  %v5458_v35 = vld [vmem:[%s7260_s25 + $0x40] sm:$0xff] }
 0xa5e   :  { %v1477_v61 = vmul.f32 %v6568_v58, %v6568_v58  ;;  %5051 = vmatpush3.bf16.msra.mxu1 %v5048_v31  ;;  %v5457_v31 = vld [vmem:[%s7260_s25 + $0x20] sm:$0xff] }
 0xa5f   :  { %v1468_v1 = vpop.xlane.xlu0 %1467  ;;  %v1484_v7 = vsel %vm363_vm0, %v1478_v60, 0.0  ;;  %5101 = vmatprep.subr.bf16.mxu1 %v6249_v63  ;;  %5021 = vmatprep.subr.bf16.mxu0 %v5020_v38 }
 0xa60   :  { %v1472_v10 = vmul.f32 0.015625, %v1468_v1  ;;  %1485 = vadd.xlane.f32.xlu0 %v1484_v7  ;;  %v1465_v12 = vpop.xlane.xlu1 %1464  ;;  %v1481_v6 = vsel %vm363_vm0, %v1477_v61, 0.0  ;;  %v3560_v61 = vld [vmem:[%s7216_s20] ss:$0 sm:$0xff] }
 0xa61   :  { %v1471_v24 = vmul.f32 0.015625, %v1465_v12  ;;  %1482 = vadd.xlane.f32.xlu1 %v1481_v6  ;;  %v3561_v12 = vld [vmem:[%s7217_s21] ss:$0 sm:$0xff] }
 0xa62   :  { %v6576_v25 = vsub.f32 %v1454_v45, %v1472_v10 }
 0xa63   :  { %v6578_v26 = vsub.f32 %v1453_v48, %v1471_v24 }
 0xa64   :  { %v1480_v29 = vmul.f32 %v6576_v25, %v6576_v25 }
 0xa65   :  { %v1479_v32 = vmul.f32 %v6578_v26, %v6578_v26 }
 0xa66   :  { %v1490_v33 = vsel %vm363_vm0, %v1480_v29, 0.0  ;;  %v1646_v29 = vld [vmem:[#allocation10 + $0x50] sm:$0xff] }
 0xa67   :  { %1491 = vadd.xlane.f32.xlu0 %v1490_v33  ;;  %v1487_v36 = vsel %vm363_vm0, %v1479_v32, 0.0  ;;  %v1647_v32 = vld [vmem:[#allocation10 + $0x58] sm:$0xff] }
 0xa68   :  { %1488 = vadd.xlane.f32.xlu1 %v1487_v36  ;;  %v5024_v13 = vpack.c.bf16 %v1647_v32, %v1646_v29  ;;  %v5463_v29 = vld [vmem:[%s7260_s25 + $0x78] sm:$0xff] }
 0xaed   :  { %v1486_v39 = vpop.xlane.xlu0 %1485 }
 0xaee   :  { %v1494_v52 = vmul.f32 0.015625, %v1486_v39  ;;  %v1483_v41 = vpop.xlane.xlu1 %1482  ;;  %v5459_v39 = vld [vmem:[%s7260_s25 + $0x60] sm:$0xff] }
 0xaef   :  { %v1493_v40 = vmul.f32 0.015625, %v1483_v41 }
 0xaf0   :  { %v1498_v45 = vadd.f32 1e-05, %v1494_v52 }
 0xaf1   :  { %v1497_v48 = vadd.f32 1e-05, %v1493_v40 }
 0xaf2   :  { %5412 = vrsqrt.f32 %v1498_v45 }
 0xaf3   :  { %5414 = vrsqrt.f32 %v1497_v48 }
 0xaf4   :  { %v1492_v49 = vpop.xlane.xlu0 %1491 }
 0xaf5   :  { %v1496_v46 = vmul.f32 0.015625, %v1492_v49  ;;  %v1489_v47 = vpop.xlane.xlu1 %1488 }
 0xaf6   :  { %v1495_v50 = vmul.f32 0.015625, %v1489_v47 }
 0xaf7   :  { %v1500_v56 = vadd.f32 1e-05, %v1496_v46 }
 0xaf8   :  { %v1499_v53 = vadd.f32 1e-05, %v1495_v50 }
 0xaf9   :  { %5416 = vrsqrt.f32 %v1500_v56 }
 0xafa   :  { %5418 = vrsqrt.f32 %v1499_v53 }
 0xafc   :  { %v5413_v60 = vpop.eup %5412 }
 0xafd   :  { %v5415_v1 = vpop.eup %5414  ;;  %v1506_v7 = vmul.f32 %v5413_v60, %v6566_v57 }
 0xafe   :  { %v1505_v10 = vmul.f32 %v5415_v1, %v6568_v58  ;;  %v5460_v1 = vld [vmem:[%s7260_s25 + $0x18] sm:$0xff] }
 0xaff   :  { %v1516_v6 = vmul.f32 %v3560_v61, %v1506_v7 }
 0xb00   :  { %v1515_v24 = vmul.f32 %v3560_v61, %v1505_v10  ;;  %v5461_v10 = vld [vmem:[%s7260_s25 + $0x38] sm:$0xff] }
 0xb01   :  { %v6597_v37 = vadd.f32 %v3561_v12, %v1516_v6  ;;  %v5462_v6 = vld [vmem:[%s7260_s25 + $0x58] sm:$0xff] }
 0xb02   :  { %v6595_v33 = vadd.f32 %v3561_v12, %v1515_v24 }
 0xb03   :  { %v5417_v36 = vpop.eup %5416 }
 0xb04   :  { %v5419_v15 = vpop.eup %5418  ;;  %4347 = vmatprep.mubr.msk.f32.mxu0 %vm363_vm0, %v6595_v33  ;;  %4391 = vmatprep.mubr.msk.f32.mxu1 %vm363_vm0, %v6595_v33  ;;  %v1508_v57 = vmul.f32 %v5417_v36, %v6576_v25  ;;  %v1650_v25 = vld [vmem:[#allocation10 + $0x70] sm:$0xff] }
 0xb05   :  { %4348 = vmatmul.mubr.msk.f32.vlgmr.msra.gmra.mrb[24].mxu0 %vm363_vm0, %v6597_v37  ;;  %4392 = vmatmul.mubr.msk.f32.vlgmr.msra.gmra.mrb[12].mxu1 %vm363_vm0, %v6597_v37  ;;  %v1507_v58 = vmul.f32 %v5419_v15, %v6578_v26  ;;  %v5464_v36 = vld [vmem:[%s7260_s25 + $0x10] sm:$0xff] }
 0xb06   :  { %5023 = vmatpush3.bf16.msra.mxu0 %v5020_v38  ;;  %v1518_v16 = vmul.f32 %v3560_v61, %v1508_v57  ;;  %5103 = vmatpush3.bf16.msra.mxu1 %v6249_v63  ;;  %v5032_v63 = vpack.c.bf16 %v1651_v54, %v1650_v25  ;;  %v5465_v15 = vld [vmem:[%s7260_s25 + $0x30] sm:$0xff] }
 0xb07   :  { %5025 = vmatprep.subr.bf16.mxu0 %v5024_v13  ;;  %v1517_v44 = vmul.f32 %v3560_v61, %v1507_v58  ;;  %5105 = vmatprep.subr.bf16.mxu1 %v6252_v2  ;;  %v5466_v58 = vld [vmem:[%s7260_s25 + $0x50] sm:$0xff] }
 0xb08   :  { %v6613_v62 = vadd.f32 %v3561_v12, %v1518_v16 }
 0xb09   :  { %v6611_v55 = vadd.f32 %v3561_v12, %v1517_v44  ;;  %v3569_v44 = vld [vmem:[%s7259_s24 + $0x1] ss:$0 sm:$0xff] }
 0xb0a   :  { %5027 = vmatpush3.bf16.msra.mxu0 %v5024_v13  ;;  %5107 = vmatpush3.bf16.msra.mxu1 %v6252_v2  ;;  %v3563_v2 = vld [vmem:[%s7258_s28 + $0x1] ss:$0 sm:$0xff] }
 0xb0b   :  { %4350 = vmatprep.mubr.msk.f32.mxu0 %vm363_vm0, %v6611_v55  ;;  %4394 = vmatprep.mubr.msk.f32.mxu1 %vm363_vm0, %v6611_v55 }
 0xb0c   :  { %4351 = vmatmul.mubr.msk.f32.gmra.mrb[26].mxu0 %vm363_vm0, %v6613_v62  ;;  %5029 = vmatprep.subr.bf16.mxu0 %v5028_v51 }
 0xb0d   :  { %4395 = vmatmul.mubr.msk.f32.gmra.mrb[14].mxu1 %vm363_vm0, %v6613_v62  ;;  %4369 = vmatprep.mubr.msk.f32.mxu0 %vm363_vm0, %v6595_v33 }
 0xb0e   :  { %5031 = vmatpush3.bf16.msra.mxu0 %v5028_v51  ;;  %5109 = vmatprep.subr.bf16.mxu1 %v6263_v5 }
 0xb0f   :  { %5033 = vmatprep.subr.bf16.mxu0 %v5032_v63  ;;  %5111 = vmatpush3.bf16.msra.mxu1 %v6263_v5  ;;  %v3574_v5 = vld [vmem:[#allocation13 + $0x1] ss:$0 sm:$0xff] }
 0xb10   :  { %5113 = vmatprep.subr.bf16.mxu1 %v6267_v8 }
 0xb12   :  { %5035 = vmatpush3.bf16.msra.mxu0 %v5032_v63 }
 0xb13   :  { %5115 = vmatpush3.bf16.msra.mxu1 %v6267_v8 }
 0xb14   :  { %5117 = vmatprep.subr.bf16.mxu1 %v6271_v11 }
 0xb15   :  { %4370 = vmatmul.mubr.msk.f32.vlgmr.msra.gmra.mrb[28].mxu0 %vm363_vm0, %v6597_v37 }
 0xb16   :  { %4372 = vmatprep.mubr.msk.f32.mxu0 %vm363_vm0, %v6611_v55 }
 0xb17   :  { %5119 = vmatpush3.bf16.msra.mxu1 %v6271_v11 }
 0xb18   :  { %5121 = vmatprep.subr.bf16.mxu1 %v6274_v14 }
 0xb19   :  { %4373 = vmatmul.mubr.msk.f32.gmra.mrb[30].mxu0 %vm363_vm0, %v6613_v62 }
 0xb1b   :  { %5123 = vmatpush3.bf16.msra.mxu1 %v6274_v14 }
 0xb1c   :  { %5125 = vmatprep.subr.bf16.mxu1 %v6278_v17 }
 0xb1f   :  { %5127 = vmatpush3.bf16.msra.mxu1 %v6278_v17  ;;  %v5452_v17 = vld [vmem:[%s7260_s25 + $0x8] sm:$0xff] }
 0xb20   :  { %5129 = vmatprep.subr.bf16.mxu1 %v6282_v20 }
 0xb23   :  { %5131 = vmatpush3.bf16.msra.mxu1 %v6282_v20  ;;  %v5453_v20 = vld [vmem:[%s7260_s25 + $0x28] sm:$0xff] }
 0xbd8   :  { %v4349_v8 = vpop.f32.mrb[24].mxu0  ;;  %v4393_v11 = vpop.f32.mrb[12].mxu1 }
 0xbd9   :  { %v6647_v26 = vadd.f32 %v4349_v8, %v3563_v2  ;;  %v1834_v0 = vadd.f32 %v4393_v11, %v3574_v5  ;;  %v1624_v9 = vpop.f32.mrb[25].mxu0  ;;  %v1828_v14 = vpop.f32.mrb[13].mxu1 }
 0xbda   :  { %v1625_v18 = vadd.f32 %v3563_v2, %v1624_v9  ;;  %v1829_v19 = vadd.f32 %v3574_v5, %v1828_v14 }
 0xbdb   :  { %v1864_v23 = vmul.f32 %v5452_v17, %v1834_v0  ;;  %v1868_v21 = vmul.f32 %v5453_v20, %v1834_v0  ;;  %v1872_v28 = vmul.f32 %v5454_v22, %v1834_v0  ;;  %v1876_v27 = vmul.f32 %v5455_v4, %v1834_v0 }
 0xbdc   :  { %4429 = vmatprep.mubr.msk.f32.mxu0 %vm363_vm0, %v1625_v18  ;;  %v1863_v59 = vmul.f32 %v5456_v30, %v1829_v19  ;;  %v1867_v34 = vmul.f32 %v5457_v31, %v1829_v19  ;;  %v1871_v38 = vmul.f32 %v5458_v35, %v1829_v19  ;;  %v1875_v52 = vmul.f32 %v5459_v39, %v1829_v19 }
 0xbde   :  { %v6674_v41 = vpack.c.bf16 %v1864_v23, %v1863_v59  ;;  %v6676_v40 = vpack.c.bf16 %v1868_v21, %v1867_v34  ;;  %v6678_v45 = vpack.c.bf16 %v1872_v28, %v1871_v38  ;;  %v6680_v48 = vpack.c.bf16 %v1876_v27, %v1875_v52 }
 0xbdf   :  { %v4352_v49 = vpop.f32.mrb[26].mxu0 }
 0xbe0   :  { %v6682_v46 = vadd.f32 %v4352_v49, %v3563_v2  ;;  %v4396_v47 = vpop.f32.mrb[14].mxu1  ;;  %v1634_v50 = vpop.f32.mrb[27].mxu0  ;;  %5133 = vmatprep.subr.bf16.mxu1 %v6674_v41 }
 0xbe1   :  { %v1844_v56 = vadd.f32 %v4396_v47, %v3574_v5  ;;  %v6685_v53 = vadd.f32 %v3563_v2, %v1634_v50  ;;  %v1838_v60 = vpop.f32.mrb[15].mxu1 }
 0xbe2   :  { %v1839_v61 = vadd.f32 %v3574_v5, %v1838_v60 }
 0xbe3   :  { %v1866_v7 = vmul.f32 %v5460_v1, %v1844_v56  ;;  %v1870_v12 = vmul.f32 %v5461_v10, %v1844_v56  ;;  %v1874_v24 = vmul.f32 %v5462_v6, %v1844_v56  ;;  %v1878_v32 = vmul.f32 %v5463_v29, %v1844_v56 }
 0xbe4   :  { %v1865_v13 = vmul.f32 %v5464_v36, %v1839_v61  ;;  %v1869_v57 = vmul.f32 %v5465_v15, %v1839_v61  ;;  %v1873_v42 = vmul.f32 %v5466_v58, %v1839_v61  ;;  %v1877_v16 = vmul.f32 %v5467_v43, %v1839_v61 }
 0xbe6   :  { %v6714_v51 = vpack.c.bf16 %v1866_v7, %v1865_v13  ;;  %v6716_v25 = vpack.c.bf16 %v1870_v12, %v1869_v57  ;;  %v6718_v54 = vpack.c.bf16 %v1874_v24, %v1873_v42  ;;  %v6720_v63 = vpack.c.bf16 %v1878_v32, %v1877_v16  ;;  %v5469_v24 = vld [vmem:[#allocation5] sm:$0xff] }
 0xbe8   :  { %v4371_v2 = vpop.f32.mrb[28].mxu0 }
 0xbe9   :  { %v1732_v5 = vadd.f32 %v4371_v2, %v3569_v44  ;;  %v1726_v8 = vpop.f32.mrb[29].mxu0 }
 0xbea   :  { %v1727_v11 = vadd.f32 %v3569_v44, %v1726_v8 }
 0xbeb   :  { %v1848_v0 = vmul.f32 %v5452_v17, %v1732_v5  ;;  %v1852_v9 = vmul.f32 %v5453_v20, %v1732_v5  ;;  %v1856_v14 = vmul.f32 %v5454_v22, %v1732_v5  ;;  %v1860_v28 = vmul.f32 %v5455_v4, %v1732_v5 }
 0xbec   :  { %v1847_v18 = vmul.f32 %v5456_v30, %v1727_v11  ;;  %v1851_v19 = vmul.f32 %v5457_v31, %v1727_v11  ;;  %v1855_v23 = vmul.f32 %v5458_v35, %v1727_v11  ;;  %v4374_v21 = vpop.f32.mrb[30].mxu0  ;;  %v1859_v27 = vmul.f32 %v5459_v39, %v1727_v11 }
 0xbed   :  { %v1742_v59 = vadd.f32 %v4374_v21, %v3569_v44  ;;  %v1736_v34 = vpop.f32.mrb[31].mxu0  ;;  %v2227_v21 = vld [vmem:[#allocation14 + $0x60] sm:$0xff] }
 0xbee   :  { %v1737_v38 = vadd.f32 %v3569_v44, %v1736_v34  ;;  %v5052_v52 = vpack.c.bf16 %v1848_v0, %v1847_v18  ;;  %v5064_v49 = vpack.c.bf16 %v1852_v9, %v1851_v19  ;;  %v5076_v47 = vpack.c.bf16 %v1856_v14, %v1855_v23  ;;  %v2226_v19 = vld [vmem:[#allocation14 + $0x58] sm:$0xff] }
 0xbef   :  { %v1850_v50 = vmul.f32 %v5460_v1, %v1742_v59  ;;  %v1854_v56 = vmul.f32 %v5461_v10, %v1742_v59  ;;  %v1858_v60 = vmul.f32 %v5462_v6, %v1742_v59  ;;  %v1862_v61 = vmul.f32 %v5463_v29, %v1742_v59  ;;  %v5468_v10 = vld [vmem:[#allocation5 + $0x8] sm:$0xff] }
 0xbf0   :  { %v1849_v7 = vmul.f32 %v5464_v36, %v1737_v38  ;;  %v1853_v17 = vmul.f32 %v5465_v15, %v1737_v38  ;;  %v1857_v20 = vmul.f32 %v5466_v58, %v1737_v38  ;;  %v1861_v22 = vmul.f32 %v5467_v43, %v1737_v38  ;;  %5054 = vmatprep.subr.msk.bf16.mxu0 %vm6374_vm1, %v5052_v52  ;;  %v5471_v15 = vld [vmem:[#allocation5 + $0x10] sm:$0xff] }
 0xbf1   :  { %5057 = vmatpush3.bf16.xpose.msk.msra.mxu0 %vm6374_vm1, %v5052_v52  ;;  %v5088_v4 = vpack.c.bf16 %v1860_v28, %v1859_v27  ;;  %v2229_v28 = vld [vmem:[#allocation14 + $0x70] sm:$0xff]  ;;  %v2230_v27 = vld [vmem:[#allocation14 + $0x78] sm:$0xff] }
 0xbf2   :  { %v5058_v30 = vpack.c.bf16 %v1850_v50, %v1849_v7  ;;  %v5070_v31 = vpack.c.bf16 %v1854_v56, %v1853_v17  ;;  %v5082_v35 = vpack.c.bf16 %v1858_v60, %v1857_v20  ;;  %v5094_v39 = vpack.c.bf16 %v1862_v61, %v1861_v22 }
 0xbf4   :  { %5060 = vmatprep.subr.msk.bf16.mxu0 %vm6374_vm1, %v5058_v30 }
 0xbf9   :  { %5063 = vmatpush3.bf16.xpose.msk.msra.mxu0 %vm6374_vm1, %v5058_v30  ;;  %v3599_v30 = vld [vmem:[#allocation16 + $0x1] ss:$0 sm:$0xff] }
 0xbfa   :  { %5066 = vmatprep.subr.msk.bf16.mxu0 %vm6374_vm1, %v5064_v49 }
 0xc01   :  { %5069 = vmatpush3.bf16.xpose.msk.msra.mxu0 %vm6374_vm1, %v5064_v49 }
 0xc02   :  { %5072 = vmatprep.subr.msk.bf16.mxu0 %vm6374_vm1, %v5070_v31 }
 0xc09   :  { %5075 = vmatpush3.bf16.xpose.msk.msra.mxu0 %vm6374_vm1, %v5070_v31 }
 0xc0a   :  { %5078 = vmatprep.subr.msk.bf16.mxu0 %vm6374_vm1, %v5076_v47 }
 0xc11   :  { %5081 = vmatpush3.bf16.xpose.msk.msra.mxu0 %vm6374_vm1, %v5076_v47 }
 0xc12   :  { %5084 = vmatprep.subr.msk.bf16.mxu0 %vm6374_vm1, %v5082_v35 }
 0xc19   :  { %5087 = vmatpush3.bf16.xpose.msk.msra.mxu0 %vm6374_vm1, %v5082_v35 }
 0xc1a   :  { %5090 = vmatprep.subr.msk.bf16.mxu0 %vm6374_vm1, %v5088_v4 }
 0xc21   :  { %5093 = vmatpush3.bf16.xpose.msk.msra.mxu0 %vm6374_vm1, %v5088_v4 }
 0xc22   :  { %5096 = vmatprep.subr.msk.bf16.mxu0 %vm6374_vm1, %v5094_v39 }
 0xc29   :  { %5099 = vmatpush3.bf16.xpose.msk.msra.mxu0 %vm6374_vm1, %v5094_v39 }
 0xc30   :  { %4430 = vmatmul.mubr.msk.f32.vlgmr.msra.gmra.mrb[32].mxu0 %vm363_vm0, %v6647_v26 }
 0xc31   :  { %4432 = vmatprep.mubr.msk.f32.mxu0 %vm363_vm0, %v6685_v53 }
 0xc34   :  { %4433 = vmatmul.mubr.msk.f32.gmra.mrb[34].mxu0 %vm363_vm0, %v6682_v46 }
 0xd03   :  { %v4431_v1 = vpop.f32.mrb[32].mxu0 }
 0xd04   :  { %v2011_v12 = vadd.f32 %v5468_v10, %v4431_v1  ;;  %v2005_v6 = vpop.f32.mrb[33].mxu0 }
 0xd05   :  { %v2006_v29 = vadd.f32 %v5469_v24, %v2005_v6 }
 0xd06   :  { %2026 = vmax.xlane.f32.xlu0 %v2011_v12 }
 0xd07   :  { %2024 = vmax.xlane.f32.xlu1 %v2006_v29  ;;  %v4434_v32 = vpop.f32.mrb[34].mxu0 }
 0xd08   :  { %v2021_v36 = vadd.f32 %v5470_v3, %v4434_v32  ;;  %v2015_v13 = vpop.f32.mrb[35].mxu0 }
 0xd09   :  { %v2016_v26 = vadd.f32 %v5471_v15, %v2015_v13 }
 0xd0a   :  { %2030 = vmax.xlane.f32.xlu0 %v2021_v36 }
 0xd0b   :  { %2028 = vmax.xlane.f32.xlu1 %v2016_v26 }
 0xd93   :  { %v2027_v53 = vpop.xlane.xlu0 %2026 }
 0xd94   :  { %v2033_v57 = vsub.f32 %v2011_v12, %v2027_v53  ;;  %v2025_v58 = vpop.xlane.xlu1 %2024 }
 0xd95   :  { %v2032_v46 = vsub.f32 %v2006_v29, %v2025_v58 }
 0xd96   :  { %v2038_v42 = vmul.f32 1.442695, %v2033_v57 }
 0xd97   :  { %v2036_v43 = vmul.f32 1.442695, %v2032_v46  ;;  %v2031_v16 = vpop.xlane.xlu0 %2030 }
 0xd98   :  { %v2035_v44 = vsub.f32 %v2021_v36, %v2031_v16  ;;  %v2029_v2 = vpop.xlane.xlu1 %2028 }
 0xd99   :  { %5420 = vpow2.f32 %v2036_v43  ;;  %v2034_v5 = vsub.f32 %v2016_v26, %v2029_v2 }
 0xd9a   :  { %5422 = vpow2.f32 %v2038_v42  ;;  %v2042_v8 = vmul.f32 1.442695, %v2035_v44 }
 0xd9b   :  { %v2040_v11 = vmul.f32 1.442695, %v2034_v5 }
 0xd9d   :  { %5424 = vpow2.f32 %v2040_v11 }
 0xd9e   :  { %5426 = vpow2.f32 %v2042_v8 }
 0xda3   :  { %v5421_v0 = vpop.eup %5420 }
 0xda4   :  { %v5423_v9 = vpop.eup %5422  ;;  %4467 = vmatprep.mubr.f32.mxu1 %v5421_v0 }
 0xda5   :  { %4468 = vmatmul.mubr.f32.vlgmr.msra.gmra.mrb[16].mxu1 %v5423_v9 }
 0xda6   :  { %5135 = vmatpush3.bf16.msra.mxu1 %v6674_v41  ;;  %v2223_v41 = vld [vmem:[#allocation14 + $0x40] sm:$0xff] }
 0xda7   :  { %v5425_v14 = vpop.eup %5424  ;;  %5137 = vmatprep.subr.bf16.mxu1 %v6714_v51 }
 0xda8   :  { %v5427_v18 = vpop.eup %5426  ;;  %4470 = vmatprep.mubr.f32.mxu1 %v5425_v14 }
 0xda9   :  { %4471 = vmatmul.mubr.f32.gmra.mrb[18].mxu1 %v5427_v18 }
 0xdaa   :  { %5139 = vmatpush3.bf16.msra.mxu1 %v6714_v51  ;;  %v2225_v51 = vld [vmem:[#allocation14 + $0x50] sm:$0xff] }
 0xdab   :  { %5141 = vmatprep.subr.bf16.mxu1 %v6676_v40  ;;  %v5168_v23 = vpack.c.bf16 %v2226_v19, %v2225_v51  ;;  %v2418_v51 = vld [vmem:[#allocation17 + $0x48] sm:$0xff]  ;;  %v2419_v19 = vld [vmem:[#allocation17 + $0x50] sm:$0xff] }
 0xdae   :  { %5143 = vmatpush3.bf16.msra.mxu1 %v6676_v40  ;;  %v2224_v40 = vld [vmem:[#allocation14 + $0x48] sm:$0xff] }
 0xdaf   :  { %5145 = vmatprep.subr.bf16.mxu1 %v6716_v25 }
 0xdb2   :  { %5147 = vmatpush3.bf16.msra.mxu1 %v6716_v25  ;;  %v5164_v25 = vpack.c.bf16 %v2224_v40, %v2223_v41  ;;  %v2417_v40 = vld [vmem:[#allocation17 + $0x40] sm:$0xff] }
 0xdb3   :  { %5149 = vmatprep.subr.bf16.mxu1 %v6678_v45 }
 0xdb4   :  { %5165 = vmatprep.subr.bf16.mxu0 %v5164_v25 }
 0xdb5   :  { %5167 = vmatpush3.bf16.msra.mxu0 %v5164_v25  ;;  %v5180_v25 = vpack.c.bf16 %v2418_v51, %v2417_v40 }
 0xdb6   :  { %5151 = vmatpush3.bf16.msra.mxu1 %v6678_v45  ;;  %v2228_v45 = vld [vmem:[#allocation14 + $0x68] sm:$0xff]  ;;  %5169 = vmatprep.subr.bf16.mxu0 %v5168_v23 }
 0xdb7   :  { %5153 = vmatprep.subr.bf16.mxu1 %v6718_v54 }
 0xdb9   :  { %5171 = vmatpush3.bf16.msra.mxu0 %v5168_v23  ;;  %v2420_v23 = vld [vmem:[#allocation17 + $0x58] sm:$0xff] }
 0xdba   :  { %5155 = vmatpush3.bf16.msra.mxu1 %v6718_v54  ;;  %v5172_v54 = vpack.c.bf16 %v2228_v45, %v2227_v21  ;;  %v5184_v21 = vpack.c.bf16 %v2420_v23, %v2419_v19  ;;  %v2421_v45 = vld [vmem:[#allocation17 + $0x60] sm:$0xff] }
 0xdbb   :  { %5157 = vmatprep.subr.bf16.mxu1 %v6680_v48 }
 0xdbc   :  { %5173 = vmatprep.subr.bf16.mxu0 %v5172_v54 }
 0xdbd   :  { %5175 = vmatpush3.bf16.msra.mxu0 %v5172_v54  ;;  %v2422_v54 = vld [vmem:[#allocation17 + $0x68] sm:$0xff] }
 0xdbe   :  { %5159 = vmatpush3.bf16.msra.mxu1 %v6680_v48  ;;  %v5176_v48 = vpack.c.bf16 %v2230_v27, %v2229_v28  ;;  %v2423_v28 = vld [vmem:[#allocation17 + $0x70] sm:$0xff]  ;;  %v5188_v27 = vpack.c.bf16 %v2422_v54, %v2421_v45 }
 0xdbf   :  { %5161 = vmatprep.subr.bf16.mxu1 %v6720_v63 }
 0xdc0   :  { %5177 = vmatprep.subr.bf16.mxu0 %v5176_v48 }
 0xdc1   :  { %5179 = vmatpush3.bf16.msra.mxu0 %v5176_v48  ;;  %v2424_v48 = vld [vmem:[#allocation17 + $0x78] sm:$0xff] }
 0xdc2   :  { %5163 = vmatpush3.bf16.msra.mxu1 %v6720_v63 }
 0xdc3   :  { %5181 = vmatprep.subr.bf16.mxu1 %v5180_v25 }
 0xe78   :  { %v4469_v63 = vpop.f32.mrb[16].mxu1 }
 0xe79   :  { %5428 = vrcp.f32 %v4469_v63  ;;  %v2110_v59 = vpop.f32.mrb[17].mxu1  ;;  %v5192_v63 = vpack.c.bf16 %v2424_v48, %v2423_v28 }
 0xe7a   :  { %5430 = vrcp.f32 %v2110_v59  ;;  %v3613_v59 = vld [vmem:[%s7214_s18 + $0x80] sm:$0xff] }
 0xe7c   :  { %v4472_v34 = vpop.f32.mrb[18].mxu1 }
 0xe7d   :  { %5432 = vrcp.f32 %v4472_v34  ;;  %v2120_v38 = vpop.f32.mrb[19].mxu1  ;;  %v3614_v34 = vld [vmem:[%s7214_s18 + $0x88] sm:$0xff] }
 0xe7e   :  { %5434 = vrcp.f32 %v2120_v38  ;;  %v3615_v38 = vld [vmem:[%s7214_s18 + $0x90] sm:$0xff] }
 0xe83   :  { %v5429_v52 = vpop.eup %5428 }
 0xe84   :  { %v5431_v49 = vpop.eup %5430  ;;  %v2132_v50 = vmul.f32 %v5429_v52, %v5423_v9  ;;  %v5196_v52 = vpack.c.bf16 %v3614_v34, %v3613_v59 }
 0xe85   :  { %v2130_v47 = vmul.f32 %v5431_v49, %v5421_v0  ;;  %v3616_v49 = vld [vmem:[%s7214_s18 + $0x98] sm:$0xff] }
 0xe86   :  { %5197 = vmatprep.subr.bf16.mxu0 %v5196_v52 }
 0xe87   :  { %v5433_v56 = vpop.eup %5432  ;;  %4505 = vmatprep.mubr.f32.mxu1 %v2130_v47  ;;  %v5200_v47 = vpack.c.bf16 %v3616_v49, %v3615_v38 }
 0xe88   :  { %v5435_v60 = vpop.eup %5434  ;;  %4506 = vmatmul.mubr.f32.vlgmr.msra.gmra.mrb[20].mxu1 %v2132_v50  ;;  %v2136_v7 = vmul.f32 %v5433_v56, %v5427_v18  ;;  %v3617_v50 = vld [vmem:[%s7214_s18 + $0xa0] sm:$0xff]  ;;  %v3618_v56 = vld [vmem:[%s7214_s18 + $0xa8] sm:$0xff] }
 0xe89   :  { %v2134_v61 = vmul.f32 %v5435_v60, %v5425_v14  ;;  %5183 = vmatpush3.bf16.msra.mxu1 %v5180_v25  ;;  %v5204_v60 = vpack.c.bf16 %v3618_v56, %v3617_v50  ;;  %v3608_v25 = vld [vmem:[#allocation19 + $0x1] ss:$0 sm:$0xff] }
 0xe8a   :  { %5185 = vmatprep.subr.bf16.mxu1 %v5184_v21 }
 0xe8b   :  { %4508 = vmatprep.mubr.f32.mxu1 %v2134_v61  ;;  %v3619_v61 = vld [vmem:[%s7214_s18 + $0xb0] sm:$0xff] }
 0xe8c   :  { %4509 = vmatmul.mubr.f32.gmra.mrb[22].mxu1 %v2136_v7  ;;  %v3620_v7 = vld [vmem:[%s7214_s18 + $0xb8] sm:$0xff] }
 0xe8d   :  { %5187 = vmatpush3.bf16.msra.mxu1 %v5184_v21 }
 0xe8e   :  { %5189 = vmatprep.subr.bf16.mxu1 %v5188_v27 }
 0xe91   :  { %5191 = vmatpush3.bf16.msra.mxu1 %v5188_v27 }
 0xe92   :  { %5193 = vmatprep.subr.bf16.mxu1 %v5192_v63 }
 0xe95   :  { %5195 = vmatpush3.bf16.msra.mxu1 %v5192_v63 }
 0xf5b   :  { %v4507_v17 = vpop.f32.mrb[20].mxu1 }
 0xf5c   :  { %v2203_v20 = vpop.f32.mrb[21].mxu1 }
 0xf5d   :  { %4527 = vmatprep.mubr.msk.f32.mxu0 %vm363_vm0, %v2203_v20  ;;  %v3621_v20 = vld [vmem:[%s7214_s18 + $0xc0] sm:$0xff] }
 0xf5e   :  { %4528 = vmatmul.mubr.msk.f32.vlgmr.msra.gmra.mrb[36].mxu0 %vm363_vm0, %v4507_v17  ;;  %v5208_v17 = vpack.c.bf16 %v3620_v7, %v3619_v61 }
 0xf5f   :  { %v4510_v22 = vpop.f32.mrb[22].mxu1  ;;  %5199 = vmatpush3.bf16.msra.mxu0 %v5196_v52  ;;  %v3629_v52 = vld [vmem:[#allocation20 + $0x1] ss:$0 sm:$0xff] }
 0xf60   :  { %v2213_v4 = vpop.f32.mrb[23].mxu1  ;;  %5201 = vmatprep.subr.bf16.mxu0 %v5200_v47 }
 0xf61   :  { %4530 = vmatprep.mubr.msk.f32.mxu0 %vm363_vm0, %v2213_v4 }
 0xf62   :  { %4531 = vmatmul.mubr.msk.f32.gmra.mrb[38].mxu0 %vm363_vm0, %v4510_v22  ;;  %v3622_v22 = vld [vmem:[%s7214_s18 + $0xc8] sm:$0xff] }
 0xf63   :  { %5203 = vmatpush3.bf16.msra.mxu0 %v5200_v47  ;;  %v5212_v4 = vpack.c.bf16 %v3622_v22, %v3621_v20 }
 0xf64   :  { %5205 = vmatprep.subr.bf16.mxu0 %v5204_v60 }
 0xf67   :  { %5207 = vmatpush3.bf16.msra.mxu0 %v5204_v60 }
 0xf68   :  { %5209 = vmatprep.subr.bf16.mxu0 %v5208_v17 }
 0xf6b   :  { %5211 = vmatpush3.bf16.msra.mxu0 %v5208_v17 }
 0xf6c   :  { %5213 = vmatprep.subr.bf16.mxu0 %v5212_v4 }
 0xf6f   :  { %5215 = vmatpush3.bf16.msra.mxu0 %v5212_v4 }
0x1031   :  { %v4529_v31 = vpop.f32.mrb[36].mxu0 }
0x1032   :  { %v2323_v35 = vadd.f32 %v4529_v31, %v3599_v30  ;;  %v2317_v39 = vpop.f32.mrb[37].mxu0  ;;  %v3624_v31 = vld [vmem:[%s7214_s18 + $0xd8] sm:$0xff] }
0x1033   :  { %v2318_v1 = vadd.f32 %v3599_v30, %v2317_v39  ;;  %v3625_v39 = vld [vmem:[%s7214_s18 + $0xe0] sm:$0xff] }
0x1034   :  { %v2337_v10 = vadd.f32 %v2323_v35, %v6597_v37 }
0x1035   :  { %v4532_v12 = vpop.f32.mrb[38].mxu0  ;;  %v2336_v6 = vadd.f32 %v2318_v1, %v6595_v33  ;;  %v3626_v1 = vld [vmem:[%s7214_s18 + $0xe8] sm:$0xff] }
0x1036   :  { %v2333_v24 = vadd.f32 %v4532_v12, %v3599_v30  ;;  %v2327_v29 = vpop.f32.mrb[39].mxu0  ;;  %v2347_v32 = vsel %vm363_vm0, %v2337_v10, 0.0 }
0x1037   :  { %v2328_v3 = vadd.f32 %v3599_v30, %v2327_v29  ;;  %2348 = vadd.xlane.f32.xlu0 %v2347_v32  ;;  %v2344_v36 = vsel %vm363_vm0, %v2336_v6, 0.0  ;;  %v3623_v30 = vld [vmem:[%s7214_s18 + $0xd0] sm:$0xff] }
0x1038   :  { %2345 = vadd.xlane.f32.xlu1 %v2344_v36  ;;  %v2339_v13 = vadd.f32 %v2333_v24, %v6613_v62  ;;  %v5216_v35 = vpack.c.bf16 %v3624_v31, %v3623_v30 }
0x1039   :  { %v2338_v15 = vadd.f32 %v2328_v3, %v6611_v55 }
0x103a   :  { %v2353_v26 = vsel %vm363_vm0, %v2339_v13, 0.0  ;;  %5217 = vmatprep.subr.bf16.mxu0 %v5216_v35 }
0x103b   :  { %2354 = vadd.xlane.f32.xlu0 %v2353_v26  ;;  %v2350_v37 = vsel %vm363_vm0, %v2338_v15, 0.0  ;;  %5219 = vmatpush3.bf16.msra.mxu0 %v5216_v35 }
0x103c   :  { %2351 = vadd.xlane.f32.xlu1 %v2350_v37 }
0x10c4   :  { %v2349_v33 = vpop.xlane.xlu0 %2348 }
0x10c5   :  { %v2357_v53 = vmul.f32 0.015625, %v2349_v33  ;;  %v2346_v57 = vpop.xlane.xlu1 %2345 }
0x10c6   :  { %v2356_v58 = vmul.f32 0.015625, %v2346_v57  ;;  %v3606_v57 = vld [vmem:[%s7210_s14 + $0x1] ss:$0 sm:$0xff] }
0x10c7   :  { %v6787_v46 = vsub.f32 %v2337_v10, %v2357_v53  ;;  %v5220_v10 = vpack.c.bf16 %v3626_v1, %v3625_v39 }
0x10c8   :  { %v6789_v42 = vsub.f32 %v2336_v6, %v2356_v58  ;;  %v2355_v43 = vpop.xlane.xlu0 %2354 }
0x10c9   :  { %v2359_v16 = vmul.f32 0.015625, %v2355_v43  ;;  %v2352_v44 = vpop.xlane.xlu1 %2351  ;;  %v2365_v55 = vmul.f32 %v6787_v46, %v6787_v46  ;;  %5221 = vmatprep.subr.bf16.mxu0 %v5220_v10 }
0x10ca   :  { %v2358_v62 = vmul.f32 0.015625, %v2352_v44  ;;  %v2364_v2 = vmul.f32 %v6789_v42, %v6789_v42  ;;  %5223 = vmatpush3.bf16.msra.mxu0 %v5220_v10  ;;  %v3607_v44 = vld [vmem:[%s7211_s15 + $0x1] ss:$0 sm:$0xff] }
0x10cb   :  { %v6795_v5 = vsub.f32 %v2339_v13, %v2359_v16  ;;  %v2371_v8 = vsel %vm363_vm0, %v2365_v55, 0.0 }
0x10cc   :  { %v6798_v11 = vsub.f32 %v2338_v15, %v2358_v62  ;;  %2372 = vadd.xlane.f32.xlu0 %v2371_v8  ;;  %v2368_v0 = vsel %vm363_vm0, %v2364_v2, 0.0 }
0x10cd   :  { %2369 = vadd.xlane.f32.xlu1 %v2368_v0  ;;  %v2367_v9 = vmul.f32 %v6795_v5, %v6795_v5 }
0x10ce   :  { %v2366_v14 = vmul.f32 %v6798_v11, %v6798_v11 }
0x10cf   :  { %v2377_v18 = vsel %vm363_vm0, %v2367_v9, 0.0 }
0x10d0   :  { %2378 = vadd.xlane.f32.xlu0 %v2377_v18  ;;  %v2374_v41 = vsel %vm363_vm0, %v2366_v14, 0.0 }
0x10d1   :  { %2375 = vadd.xlane.f32.xlu1 %v2374_v41 }
0x1159   :  { %v2373_v12 = vpop.xlane.xlu0 %2372 }
0x115a   :  { %v2381_v6 = vmul.f32 0.015625, %v2373_v12  ;;  %v2370_v24 = vpop.xlane.xlu1 %2369 }
0x115b   :  { %v2380_v29 = vmul.f32 0.015625, %v2370_v24 }
0x115c   :  { %v2385_v32 = vadd.f32 1e-05, %v2381_v6 }
0x115d   :  { %v2384_v3 = vadd.f32 1e-05, %v2380_v29  ;;  %v2379_v36 = vpop.xlane.xlu0 %2378 }
0x115e   :  { %5436 = vrsqrt.f32 %v2385_v32  ;;  %v2383_v13 = vmul.f32 0.015625, %v2379_v36  ;;  %v2376_v15 = vpop.xlane.xlu1 %2375 }
0x115f   :  { %5438 = vrsqrt.f32 %v2384_v3  ;;  %v2382_v26 = vmul.f32 0.015625, %v2376_v15 }
0x1160   :  { %v2387_v37 = vadd.f32 1e-05, %v2383_v13 }
0x1161   :  { %v2386_v33 = vadd.f32 1e-05, %v2382_v26 }
0x1162   :  { %5440 = vrsqrt.f32 %v2387_v37 }
0x1163   :  { %5442 = vrsqrt.f32 %v2386_v33 }
0x1168   :  { %v5437_v53 = vpop.eup %5436 }
0x1169   :  { %v5439_v58 = vpop.eup %5438  ;;  %v2393_v43 = vmul.f32 %v5437_v53, %v6787_v46 }
0x116a   :  { %v2392_v16 = vmul.f32 %v5439_v58, %v6789_v42 }
0x116b   :  { %v2403_v55 = vmul.f32 %v3606_v57, %v2393_v43 }
0x116c   :  { %v5441_v62 = vpop.eup %5440  ;;  %v2402_v2 = vmul.f32 %v3606_v57, %v2392_v16 }
0x116d   :  { %v5443_v8 = vpop.eup %5442  ;;  %v2395_v0 = vmul.f32 %v5441_v62, %v6795_v5  ;;  %v2413_v18 = vadd.f32 %v3607_v44, %v2403_v55  ;;  %v3627_v5 = vld [vmem:[%s7214_s18 + $0xf0] sm:$0xff]  ;;  %v2732_v62 = vld [vmem:[%s7263_s13] sm:$0xff] }
0x116e   :  { %v2412_v9 = vadd.f32 %v3607_v44, %v2402_v2  ;;  %v2394_v14 = vmul.f32 %v5443_v8, %v6798_v11  ;;  %v3628_v11 = vld [vmem:[%s7214_s18 + $0xf8] sm:$0xff]  ;;  %v2733_v2 = vld [vmem:[%s7263_s13 + $0x8] sm:$0xff] }
0x116f   :  { %v2405_v41 = vmul.f32 %v3606_v57, %v2395_v0  ;;  %v5224_v51 = vpack.c.bf16 %v3628_v11, %v3627_v5  ;;  %v5229_v8 = vpack.c.bf16 %v2733_v2, %v2732_v62  ;;  %v5839_v0 = vmov 0.0|0.0   ;;  %v2739_v5 = vld [vmem:[%s7263_s13 + $0x38] sm:$0xff] }
0x1170   :  { %4549 = vmatprep.mubr.msk.f32.mxu1 %vm363_vm0, %v2412_v9  ;;  %v2404_v46 = vmul.f32 %v3606_v57, %v2394_v14  ;;  %5228 = vmatprep.subr.bf16.mxu1 %v5839_v0  ;;  %v2735_v14 = vld [vmem:[%s7263_s13 + $0x18] sm:$0xff] }
0x1171   :  { %4550 = vmatmul.mubr.msk.f32.vlgmr.msra.gmra.mrb[24].mxu1 %vm363_vm0, %v2413_v18  ;;  %v2415_v40 = vadd.f32 %v3607_v44, %v2405_v41  ;;  %5225 = vmatprep.subr.bf16.mxu0 %v5224_v51  ;;  %v2736_v41 = vld [vmem:[%s7263_s13 + $0x20] sm:$0xff] }
0x1172   :  { %v2414_v42 = vadd.f32 %v3607_v44, %v2404_v46  ;;  %5227 = vmatpush3.bf16.msra.mxu0 %v5224_v51  ;;  %5230 = vmatpush3.bf16.msra.mxu1 %v5229_v8  ;;  %v2737_v46 = vld [vmem:[%s7263_s13 + $0x28] sm:$0xff]  ;;  %v5841_v51 = vmov 0.0   ;;  %v3409_v8 = vld [vmem:[#allocation22 + $0x68] sm:$0xff] }
0x1173   :  { %5324 = vmatprep.subr.bf16.mxu0 %v5839_v0  ;;  %5231 = vmatprep.subr.bf16.mxu1 %v5839_v0 }
0x1174   :  { %4552 = vmatprep.mubr.msk.f32.mxu1 %vm363_vm0, %v2414_v42 }
0x1175   :  { %4553 = vmatmul.mubr.msk.f32.gmra.mrb[26].mxu1 %vm363_vm0, %v2415_v40 }
0x1176   :  { %4609 = vmatprep.mubr.msk.f32.mxu1 %vm5840_vm2, %v5841_v51 }
0x1244   :  { %v4551_v19 = vpop.f32.mrb[24].mxu1 }
0x1245   :  { %v2517_v23 = vadd.f32 %v4551_v19, %v3608_v25  ;;  %v2511_v21 = vpop.f32.mrb[25].mxu1 }
0x1246   :  { %v2512_v45 = vadd.f32 %v3608_v25, %v2511_v21 }
0x1247   :  { %v2531_v27 = vmax.f32 %v2517_v23, 0.0 }
0x1248   :  { %v2530_v54 = vmax.f32 %v2512_v45, 0.0  ;;  %v4554_v28 = vpop.f32.mrb[26].mxu1 }
0x1249   :  { %v2527_v48 = vadd.f32 %v4554_v28, %v3608_v25  ;;  %v2521_v63 = vpop.f32.mrb[27].mxu1  ;;  %v3396_v28 = vld [vmem:[#allocation22] sm:$0xff] }
0x124a   :  { %v2522_v59 = vadd.f32 %v3608_v25, %v2521_v63  ;;  %4587 = vmatprep.mubr.f32.mxu0 %v2530_v54 }
0x124b   :  { %4588 = vmatmul.mubr.f32.vlgmr.msra.gmra.mrb[40].mxu0 %v2531_v27  ;;  %v2533_v38 = vmax.f32 %v2527_v48, 0.0  ;;  %v3397_v27 = vld [vmem:[#allocation22 + $0x8] sm:$0xff]  ;;  %v3398_v48 = vld [vmem:[#allocation22 + $0x10] sm:$0xff] }
0x124c   :  { %v2532_v34 = vmax.f32 %v2522_v59, 0.0  ;;  %v5325_v59 = vpack.c.bf16 %v3397_v27, %v3396_v28  ;;  %v3650_v28 = vld [vmem:[%s7263_s13 + $0xa8] sm:$0xff] }
0x124e   :  { %4590 = vmatprep.mubr.f32.mxu0 %v2532_v34  ;;  %v3399_v34 = vld [vmem:[#allocation22 + $0x18] sm:$0xff]  ;;  %5326 = vmatpush3.bf16.msra.mxu0 %v5325_v59  ;;  %v3651_v59 = vld [vmem:[%s7263_s13 + $0xb0] sm:$0xff] }
0x124f   :  { %4591 = vmatmul.mubr.f32.gmra.mrb[42].mxu0 %v2533_v38  ;;  %5327 = vmatprep.subr.bf16.mxu0 %v5839_v0 }
0x1250   :  { %4777 = vmatprep.mubr.msk.f32.mxu0 %vm5840_vm2, %v5841_v51 }
0x131e   :  { %v4589_v49 = vpop.f32.mrb[40].mxu0 }
0x131f   :  { %v2631_v47 = vadd.f32 %v4589_v49, %v3629_v52  ;;  %v2625_v50 = vpop.f32.mrb[41].mxu0  ;;  %v5328_v49 = vpack.c.bf16 %v3399_v34, %v3398_v48  ;;  %v3652_v34 = vld [vmem:[%s7263_s13 + $0xb8] sm:$0xff] }
0x1320   :  { %v2626_v56 = vadd.f32 %v3629_v52, %v2625_v50  ;;  %v3401_v50 = vld [vmem:[#allocation22 + $0x28] sm:$0xff] }
0x1321   :  { %v2645_v60 = vadd.f32 %v2631_v47, %v2413_v18  ;;  %v3400_v47 = vld [vmem:[#allocation22 + $0x20] sm:$0xff]  ;;  %5329 = vmatpush3.bf16.msra.mxu0 %v5328_v49 }
0x1322   :  { %v4592_v61 = vpop.f32.mrb[42].mxu0  ;;  %v2644_v7 = vadd.f32 %v2626_v56, %v2412_v9  ;;  %v2734_v9 = vld [vmem:[%s7263_s13 + $0x10] sm:$0xff]  ;;  %5330 = vmatprep.subr.bf16.mxu0 %v5839_v0  ;;  %v3655_v49 = vld [vmem:[%s7263_s13 + $0xc8] sm:$0xff] }
0x1323   :  { %v2635_v17 = vpop.f32.mrb[43].mxu0  ;;  %v2655_v20 = vsel %vm363_vm0, %v2645_v60, 0.0  ;;  %v2641_v22 = vadd.f32 %v4592_v61, %v3629_v52  ;;  %v5232_v18 = vpack.c.bf16 %v2735_v14, %v2734_v9  ;;  %v3402_v61 = vld [vmem:[#allocation22 + $0x30] sm:$0xff] }
0x1324   :  { %v2636_v4 = vadd.f32 %v3629_v52, %v2635_v17  ;;  %2656 = vadd.xlane.f32.xlu0 %v2655_v20  ;;  %v2652_v30 = vsel %vm363_vm0, %v2644_v7, 0.0  ;;  %v6932_v20 = vld [vmem:[%s7216_s20 + $0x1] ss:$0 sm:$0xff] }
0x1325   :  { %2653 = vadd.xlane.f32.xlu1 %v2652_v30  ;;  %v2647_v39 = vadd.f32 %v2641_v22, %v2415_v40  ;;  %5233 = vmatpush3.bf16.msra.mxu1 %v5232_v18  ;;  %v2738_v40 = vld [vmem:[%s7263_s13 + $0x30] sm:$0xff]  ;;  %v3637_v30 = vld [vmem:[%s7263_s13 + $0x48] sm:$0xff] }
0x1326   :  { %v2646_v31 = vadd.f32 %v2636_v4, %v2414_v42  ;;  %5234 = vmatprep.subr.bf16.mxu1 %v5839_v0  ;;  %v5235_v42 = vpack.c.bf16 %v2737_v46, %v2736_v41  ;;  %v5238_v11 = vpack.c.bf16 %v2739_v5, %v2738_v40  ;;  %v3636_v4 = vld [vmem:[%s7263_s13 + $0x40] sm:$0xff]  ;;  %v3642_v18 = vld [vmem:[%s7263_s13 + $0x70] sm:$0xff]  ;;  %v3643_v41 = vld [vmem:[%s7263_s13 + $0x78] sm:$0xff] }
0x1327   :  { %v2661_v1 = vsel %vm363_vm0, %v2647_v39, 0.0  ;;  %v5250_v40 = vpack.c.bf16 %v3643_v41, %v3642_v18  ;;  %v3645_v5 = vld [vmem:[%s7263_s13 + $0x80] sm:$0xff] }
0x1328   :  { %v2658_v35 = vsel %vm363_vm0, %v2646_v31, 0.0 }
0x1329   :  { %2659 = vadd.xlane.f32.xlu1 %v2658_v35  ;;  %5236 = vmatpush3.bf16.msra.mxu1 %v5235_v42 }
0x132a   :  { %5237 = vmatprep.subr.bf16.mxu1 %v5839_v0 }
0x132d   :  { %2662 = vadd.xlane.f32.xlu1 %v2661_v1  ;;  %5239 = vmatpush3.bf16.msra.mxu1 %v5238_v11  ;;  %v3404_v1 = vld [vmem:[#allocation22 + $0x40] sm:$0xff] }
0x132e   :  { %5240 = vmatprep.subr.bf16.mxu1 %v5839_v0  ;;  %v3646_v11 = vld [vmem:[%s7263_s13 + $0x88] sm:$0xff] }
0x13b1   :  { %v2657_v10 = vpop.xlane.xlu0 %2656 }
0x13b2   :  { %v2665_v12 = vmul.f32 0.015625, %v2657_v10  ;;  %v2654_v6 = vpop.xlane.xlu1 %2653  ;;  %v3405_v10 = vld [vmem:[#allocation22 + $0x48] sm:$0xff] }
0x13b3   :  { %v2664_v24 = vmul.f32 0.015625, %v2654_v6 }
0x13b4   :  { %v6873_v29 = vsub.f32 %v2645_v60, %v2665_v12  ;;  %v5331_v60 = vpack.c.bf16 %v3401_v50, %v3400_v47  ;;  %v5241_v12 = vpack.c.bf16 %v3637_v30, %v3636_v4  ;;  %v3661_v4 = vld [vmem:[%s7263_s13 + $0xf8] sm:$0xff] }
0x13b5   :  { %v6875_v32 = vsub.f32 %v2644_v7, %v2664_v24  ;;  %v3403_v7 = vld [vmem:[#allocation22 + $0x38] sm:$0xff] }
0x13b6   :  { %v2660_v3 = vpop.xlane.xlu1 %2659  ;;  %v2673_v37 = vmul.f32 %v6873_v29, %v6873_v29  ;;  %5332 = vmatpush3.bf16.msra.mxu0 %v5331_v60  ;;  %v5334_v35 = vpack.c.bf16 %v3403_v7, %v3402_v61  ;;  %v3657_v60 = vld [vmem:[%s7263_s13 + $0xd8] sm:$0xff]  ;;  %v3658_v7 = vld [vmem:[%s7263_s13 + $0xe0] sm:$0xff] }
0x13b7   :  { %v2666_v36 = vmul.f32 0.015625, %v2660_v3  ;;  %v2672_v13 = vmul.f32 %v6875_v32, %v6875_v32  ;;  %5333 = vmatprep.subr.bf16.mxu0 %v5839_v0  ;;  %v3639_v3 = vld [vmem:[%s7263_s13 + $0x58] sm:$0xff] }
0x13b8   :  { %v2679_v43 = vsel %vm363_vm0, %v2673_v37, 0.0  ;;  %v3407_v37 = vld [vmem:[#allocation22 + $0x58] sm:$0xff] }
0x13b9   :  { %v6879_v15 = vsub.f32 %v2646_v31, %v2666_v36  ;;  %v2676_v26 = vsel %vm363_vm0, %v2672_v13, 0.0  ;;  %v6944_v31 = vld [vmem:[%s7217_s21 + $0x1] ss:$0 sm:$0xff]  ;;  %v5337_v13 = vpack.c.bf16 %v3405_v10, %v3404_v1  ;;  %v3665_v10 = vld [vmem:[%s7263_s13 + $0x110] sm:$0xff] }
0x13ba   :  { %2677 = vadd.xlane.f32.xlu0 %v2676_v26  ;;  %v2663_v33 = vpop.xlane.xlu1 %2662  ;;  %5335 = vmatpush3.bf16.msra.mxu0 %v5334_v35  ;;  %v3406_v26 = vld [vmem:[#allocation22 + $0x50] sm:$0xff]  ;;  %v3664_v35 = vld [vmem:[%s7263_s13 + $0x108] sm:$0xff] }
0x13bb   :  { %v2667_v53 = vmul.f32 0.015625, %v2663_v33  ;;  %v2674_v57 = vmul.f32 %v6879_v15, %v6879_v15  ;;  %5336 = vmatprep.subr.bf16.mxu0 %v5839_v0  ;;  %v5340_v62 = vpack.c.bf16 %v3407_v37, %v3406_v26  ;;  %v3672_v37 = vld [vmem:[%s7263_s13 + $0x140] sm:$0xff] }
0x13bd   :  { %v6886_v58 = vsub.f32 %v2647_v39, %v2667_v53  ;;  %v2682_v16 = vsel %vm363_vm0, %v2674_v57, 0.0 }
0x13be   :  { %2680 = vadd.xlane.f32.xlu0 %v2679_v43  ;;  %2683 = vadd.xlane.f32.xlu1 %v2682_v16 }
0x13bf   :  { %v2675_v44 = vmul.f32 %v6886_v58, %v6886_v58  ;;  %5338 = vmatpush3.bf16.msra.mxu0 %v5337_v13  ;;  %v3670_v13 = vld [vmem:[%s7263_s13 + $0x138] sm:$0xff] }
0x13c0   :  { %5339 = vmatprep.subr.bf16.mxu0 %v5839_v0 }
0x13c1   :  { %v2685_v55 = vsel %vm363_vm0, %v2675_v44, 0.0  ;;  %v3641_v44 = vld [vmem:[%s7263_s13 + $0x68] sm:$0xff] }
0x13c2   :  { %2686 = vadd.xlane.f32.xlu0 %v2685_v55 }
0x13c3   :  { %5341 = vmatpush3.bf16.msra.mxu0 %v5340_v62 }
0x13c4   :  { %5342 = vmatprep.subr.bf16.mxu0 %v5839_v0 }
0x1447   :  { %v2678_v25 = vpop.xlane.xlu0 %2677 }
0x1448   :  { %v2688_v19 = vmul.f32 0.015625, %v2678_v25  ;;  %v5253_v25 = vpack.c.bf16 %v3646_v11, %v3645_v5  ;;  %v3686_v11 = vld [vmem:[%s7263_s13 + $0x1a8] sm:$0xff] }
0x144a   :  { %v2692_v23 = vadd.f32 1e-05, %v2688_v19 }
0x144b   :  { %v2681_v21 = vpop.xlane.xlu0 %2680  ;;  %v2684_v45 = vpop.xlane.xlu1 %2683 }
0x144c   :  { %5444 = vrsqrt.f32 %v2692_v23  ;;  %v2690_v54 = vmul.f32 0.015625, %v2684_v45  ;;  %v2689_v53 = vmul.f32 0.015625, %v2681_v21  ;;  %v3647_v23 = vld [vmem:[%s7263_s13 + $0x90] sm:$0xff]  ;;  %v3648_v21 = vld [vmem:[%s7263_s13 + $0x98] sm:$0xff] }
0x144d   :  { %v5256_v45 = vpack.c.bf16 %v3648_v21, %v3647_v23  ;;  %v3688_v23 = vld [vmem:[%s7263_s13 + $0x1b8] sm:$0xff] }
0x144e   :  { %v2694_v63 = vadd.f32 1e-05, %v2690_v54  ;;  %v2693_v9 = vadd.f32 1e-05, %v2689_v53  ;;  %v3649_v54 = vld [vmem:[%s7263_s13 + $0xa0] sm:$0xff] }
0x144f   :  { %v2687_v38 = vpop.xlane.xlu0 %2686  ;;  %v5259_v48 = vpack.c.bf16 %v3650_v28, %v3649_v54  ;;  %v3691_v54 = vld [vmem:[%s7263_s13 + $0x1c8] sm:$0xff] }
0x1450   :  { %v2691_v52 = vmul.f32 0.015625, %v2687_v38  ;;  %5446 = vrsqrt.f32 %v2694_v63  ;;  %v5262_v38 = vpack.c.bf16 %v3652_v34, %v3651_v59  ;;  %v3694_v59 = vld [vmem:[%s7263_s13 + $0x1e0] sm:$0xff]  ;;  %v3695_v34 = vld [vmem:[%s7263_s13 + $0x1e8] sm:$0xff] }
0x1452   :  { %v2695_v56 = vadd.f32 1e-05, %v2691_v52 }
0x1454   :  { %5448 = vrsqrt.f32 %v2695_v56  ;;  %v3656_v56 = vld [vmem:[%s7263_s13 + $0xd0] sm:$0xff] }
0x1455   :  { %5450 = vrsqrt.f32 %v2693_v9  ;;  %v5268_v61 = vpack.c.bf16 %v3657_v60, %v3656_v56  ;;  %v3681_v9 = vld [vmem:[%s7263_s13 + $0x180] sm:$0xff] }
0x1456   :  { %v5445_v17 = vpop.eup %5444  ;;  %v3634_v60 = vld [vmem:[%s7264_s12] ss:$0 sm:$0xff] }
0x1457   :  { %v2700_v22 = vmul.f32 %v5445_v17, %v6875_v32  ;;  %v3638_v32 = vld [vmem:[%s7263_s13 + $0x50] sm:$0xff]  ;;  %v3659_v17 = vld [vmem:[%s7263_s13 + $0xe8] sm:$0xff] }
0x1458   :  { %v5244_v43 = vpack.c.bf16 %v3639_v3, %v3638_v32  ;;  %v3668_v32 = vld [vmem:[%s7263_s13 + $0x128] sm:$0xff] }
0x1459   :  { %v2710_v39 = vmul.f32 %v6932_v20, %v2700_v22  ;;  %v3660_v22 = vld [vmem:[%s7263_s13 + $0xf0] sm:$0xff] }
0x145a   :  { %v5447_v6 = vpop.eup %5446  ;;  %v5274_v30 = vpack.c.bf16 %v3661_v4, %v3660_v22  ;;  %v3699_v22 = vld [vmem:[#allocation23] ss:$0 sm:$0xff] }
0x145b   :  { %v2720_v24 = vadd.f32 %v6944_v31, %v2710_v39  ;;  %v2702_v36 = vmul.f32 %v5447_v6, %v6879_v15  ;;  %v3640_v15 = vld [vmem:[%s7263_s13 + $0x60] sm:$0xff] }
0x145c   :  { %v5247_v14 = vpack.c.bf16 %v3641_v44, %v3640_v15  ;;  %v3676_v15 = vld [vmem:[%s7263_s13 + $0x160] sm:$0xff]  ;;  %v3677_v44 = vld [vmem:[%s7263_s13 + $0x168] sm:$0xff] }
0x145d   :  { %4610 = vmatmul.mubr.msk.f32.vlgmr.msra.gmra.mrb[28].mxu1 %vm363_vm0, %v2720_v24  ;;  %v2712_v57 = vmul.f32 %v6932_v20, %v2702_v36  ;;  %v2823_v19 = vrot.slane %v2720_v24, 4  ;;  %v3667_v24 = vld [vmem:[%s7263_s13 + $0x120] sm:$0xff]  ;;  %v3669_v36 = vld [vmem:[%s7263_s13 + $0x130] sm:$0xff]  ;;  %v5295_v62 = vpack.c.bf16 %v3677_v44, %v3676_v15 }
0x145e   :  { %v5449_v33 = vpop.eup %5448  ;;  %5242 = vmatpush3.bf16.msra.mxu1 %v5241_v12  ;;  %4628 = vmatprep.mubr.msk.f32.mxu1 %vm5840_vm2, %v5841_v51  ;;  %v3666_v12 = vld [vmem:[%s7263_s13 + $0x118] sm:$0xff]  ;;  %v5283_v3 = vpack.c.bf16 %v3668_v32, %v3667_v24  ;;  %v5286_v26 = vpack.c.bf16 %v3670_v13, %v3669_v36 }
0x145f   :  { %v2703_v16 = vmul.f32 %v5449_v33, %v6886_v58  ;;  %5243 = vmatprep.subr.bf16.mxu1 %v5839_v0  ;;  %v6970_v55 = vadd.f32 %v6944_v31, %v2712_v57  ;;  %v3408_v58 = vld [vmem:[#allocation22 + $0x60] sm:$0xff]  ;;  %v5451_v27 = vpop.eup %5450  ;;  %v5280_v6 = vpack.c.bf16 %v3666_v12, %v3665_v10  ;;  %v3674_v57 = vld [vmem:[%s7263_s13 + $0x150] sm:$0xff] }
0x1460   :  { %v5343_v42 = vpack.c.bf16 %v3409_v8, %v3408_v58  ;;  %v2701_v63 = vmul.f32 %v5451_v27, %v6873_v29  ;;  %v3654_v29 = vld [vmem:[%s7263_s13 + $0xc0] sm:$0xff]  ;;  %v3673_v33 = vld [vmem:[%s7263_s13 + $0x148] sm:$0xff]  ;;  %v3679_v58 = vld [vmem:[%s7263_s13 + $0x178] sm:$0xff] }
0x1461   :  { %v2713_v2 = vmul.f32 %v6932_v20, %v2703_v16  ;;  %v5265_v47 = vpack.c.bf16 %v3655_v49, %v3654_v29  ;;  %v5289_v53 = vpack.c.bf16 %v3673_v33, %v3672_v37  ;;  %v3155_v41 = vrot.slane %v6970_v55, 4  ;;  %v3692_v27 = vld [vmem:[%s7263_s13 + $0x1d0] sm:$0xff] }
0x1462   :  { %5245 = vmatpush3.bf16.msra.mxu1 %v5244_v43  ;;  %5344 = vmatpush3.bf16.msra.mxu0 %v5343_v42  ;;  %v2711_v52 = vmul.f32 %v6932_v20, %v2701_v63  ;;  %v5271_v20 = vpack.c.bf16 %v3659_v17, %v3658_v7  ;;  %v3675_v43 = vld [vmem:[%s7263_s13 + $0x158] sm:$0xff]  ;;  %v3683_v42 = vld [vmem:[%s7263_s13 + $0x190] sm:$0xff] }
0x1463   :  { %5246 = vmatprep.subr.bf16.mxu1 %v5839_v0  ;;  %v6982_v46 = vadd.f32 %v6944_v31, %v2713_v2  ;;  %5345 = vmatprep.subr.bf16.mxu0 %v5839_v0  ;;  %v5292_v16 = vpack.c.bf16 %v3675_v43, %v3674_v57  ;;  %v3678_v2 = vld [vmem:[%s7263_s13 + $0x170] sm:$0xff] }
0x1464   :  { %v2721_v50 = vadd.f32 %v6944_v31, %v2711_v52  ;;  %v3663_v31 = vld [vmem:[%s7263_s13 + $0x100] sm:$0xff]  ;;  %v5298_v8 = vpack.c.bf16 %v3679_v58, %v3678_v2  ;;  %v3696_v52 = vld [vmem:[%s7263_s13 + $0x1f0] sm:$0xff] }
0x1465   :  { %v5277_v39 = vpack.c.bf16 %v3664_v35, %v3663_v31  ;;  %v3321_v49 = vrot.slane %v6982_v46, 4 }
0x1466   :  { %5248 = vmatpush3.bf16.msra.mxu1 %v5247_v14  ;;  %v2989_v1 = vrot.slane %v2721_v50, 4  ;;  %v3682_v14 = vld [vmem:[%s7263_s13 + $0x188] sm:$0xff] }
0x1467   :  { %5249 = vmatprep.subr.bf16.mxu1 %v5839_v0  ;;  %v5301_v18 = vpack.c.bf16 %v3682_v14, %v3681_v9 }
0x146a   :  { %5251 = vmatpush3.bf16.msra.mxu1 %v5250_v40  ;;  %v3684_v40 = vld [vmem:[%s7263_s13 + $0x198] sm:$0xff] }
0x146b   :  { %5252 = vmatprep.subr.bf16.mxu1 %v5839_v0  ;;  %v5304_v5 = vpack.c.bf16 %v3684_v40, %v3683_v42 }
0x146d   :  { %4629 = vmatmul.mubr.msk.f32.vlgmr.msra.gmra.mrb[28].mxu1 %vm363_vm0, %v2823_v19  ;;  %v3687_v19 = vld [vmem:[%s7263_s13 + $0x1b0] sm:$0xff] }
0x146e   :  { %5254 = vmatpush3.bf16.msra.mxu1 %v5253_v25  ;;  %4647 = vmatprep.mubr.msk.f32.mxu1 %vm5840_vm2, %v5841_v51  ;;  %v5310_v21 = vpack.c.bf16 %v3688_v23, %v3687_v19 }
0x146f   :  { %5255 = vmatprep.subr.bf16.mxu1 %v5839_v0 }
0x1472   :  { %5257 = vmatpush3.bf16.msra.mxu1 %v5256_v45  ;;  %v3690_v45 = vld [vmem:[%s7263_s13 + $0x1c0] sm:$0xff] }
0x1473   :  { %5258 = vmatprep.subr.bf16.mxu1 %v5839_v0  ;;  %v5313_v28 = vpack.c.bf16 %v3691_v54, %v3690_v45 }
0x1476   :  { %5260 = vmatpush3.bf16.msra.mxu1 %v5259_v48  ;;  %v3693_v48 = vld [vmem:[%s7263_s13 + $0x1d8] sm:$0xff] }
0x1477   :  { %5261 = vmatprep.subr.bf16.mxu1 %v5839_v0  ;;  %v5316_v63 = vpack.c.bf16 %v3693_v48, %v3692_v27 }
0x147a   :  { %5263 = vmatpush3.bf16.msra.mxu1 %v5262_v38  ;;  %v5319_v38 = vpack.c.bf16 %v3695_v34, %v3694_v59 }
0x147b   :  { %5264 = vmatprep.subr.bf16.mxu1 %v5839_v0 }
0x147d   :  { %4648 = vmatmul.mubr.msk.f32.vlgmr.msra.gmra.mrb[28].mxu1 %vm363_vm0, %v2721_v50  ;;  %v3411_v50 = vld [vmem:[#allocation22 + $0x78] sm:$0xff] }
0x147e   :  { %5266 = vmatpush3.bf16.msra.mxu1 %v5265_v47  ;;  %4666 = vmatprep.mubr.msk.f32.mxu1 %vm5840_vm2, %v5841_v51  ;;  %v3410_v47 = vld [vmem:[#allocation22 + $0x70] sm:$0xff] }
0x147f   :  { %5267 = vmatprep.subr.bf16.mxu1 %v5839_v0  ;;  %v5346_v56 = vpack.c.bf16 %v3411_v50, %v3410_v47 }
0x1481   :  { %5347 = vmatpush3.bf16.msra.mxu0 %v5346_v56 }
0x1482   :  { %5269 = vmatpush3.bf16.msra.mxu1 %v5268_v61 }
0x1483   :  { %5270 = vmatprep.subr.bf16.mxu1 %v5839_v0 }
0x1486   :  { %5272 = vmatpush3.bf16.msra.mxu1 %v5271_v20 }
0x1487   :  { %5273 = vmatprep.subr.bf16.mxu1 %v5839_v0 }
0x148a   :  { %5275 = vmatpush3.bf16.msra.mxu1 %v5274_v30 }
0x148b   :  { %5276 = vmatprep.subr.bf16.mxu1 %v5839_v0 }
0x148d   :  { %4667 = vmatmul.mubr.msk.f32.vlgmr.msra.gmra.mrb[28].mxu1 %vm363_vm0, %v2989_v1 }
0x148e   :  { %5278 = vmatpush3.bf16.msra.mxu1 %v5277_v39  ;;  %4685 = vmatprep.mubr.msk.f32.mxu1 %vm5840_vm2, %v5841_v51 }
0x148f   :  { %5279 = vmatprep.subr.bf16.mxu1 %v5839_v0 }
0x1492   :  { %5281 = vmatpush3.bf16.msra.mxu1 %v5280_v6 }
0x1493   :  { %5282 = vmatprep.subr.bf16.mxu1 %v5839_v0 }
0x1496   :  { %5284 = vmatpush3.bf16.msra.mxu1 %v5283_v3 }
0x1497   :  { %5285 = vmatprep.subr.bf16.mxu1 %v5839_v0 }
0x149a   :  { %5287 = vmatpush3.bf16.msra.mxu1 %v5286_v26 }
0x149b   :  { %5288 = vmatprep.subr.bf16.mxu1 %v5839_v0 }
0x149d   :  { %4686 = vmatmul.mubr.msk.f32.vlgmr.msra.gmra.mrb[28].mxu1 %vm363_vm0, %v6970_v55  ;;  %v3685_v55 = vld [vmem:[%s7263_s13 + $0x1a0] sm:$0xff] }
0x149e   :  { %5290 = vmatpush3.bf16.msra.mxu1 %v5289_v53  ;;  %4704 = vmatprep.mubr.msk.f32.mxu1 %vm5840_vm2, %v5841_v51  ;;  %v5307_v25 = vpack.c.bf16 %v3686_v11, %v3685_v55 }
0x149f   :  { %5291 = vmatprep.subr.bf16.mxu1 %v5839_v0 }
0x14a2   :  { %5293 = vmatpush3.bf16.msra.mxu1 %v5292_v16 }
0x14a3   :  { %5294 = vmatprep.subr.bf16.mxu1 %v5839_v0 }
0x14a6   :  { %5296 = vmatpush3.bf16.msra.mxu1 %v5295_v62 }
0x14a7   :  { %5297 = vmatprep.subr.bf16.mxu1 %v5839_v0 }
0x14aa   :  { %5299 = vmatpush3.bf16.msra.mxu1 %v5298_v8 }
0x14ab   :  { %5300 = vmatprep.subr.bf16.mxu1 %v5839_v0 }
0x14ad   :  { %4705 = vmatmul.mubr.msk.f32.vlgmr.msra.gmra.mrb[28].mxu1 %vm363_vm0, %v3155_v41 }
0x14ae   :  { %5302 = vmatpush3.bf16.msra.mxu1 %v5301_v18  ;;  %4723 = vmatprep.mubr.msk.f32.mxu1 %vm5840_vm2, %v5841_v51 }
0x14af   :  { %5303 = vmatprep.subr.bf16.mxu1 %v5839_v0 }
0x14b2   :  { %5305 = vmatpush3.bf16.msra.mxu1 %v5304_v5 }
0x14b3   :  { %5306 = vmatprep.subr.bf16.mxu1 %v5839_v0 }
0x14b6   :  { %5308 = vmatpush3.bf16.msra.mxu1 %v5307_v25 }
0x14b7   :  { %5309 = vmatprep.subr.bf16.mxu1 %v5839_v0 }
0x14ba   :  { %5311 = vmatpush3.bf16.msra.mxu1 %v5310_v21 }
0x14bb   :  { %5312 = vmatprep.subr.bf16.mxu1 %v5839_v0 }
0x14bd   :  { %4724 = vmatmul.mubr.msk.f32.vlgmr.msra.gmra.mrb[28].mxu1 %vm363_vm0, %v6982_v46 }
0x14be   :  { %5314 = vmatpush3.bf16.msra.mxu1 %v5313_v28  ;;  %4742 = vmatprep.mubr.msk.f32.mxu1 %vm5840_vm2, %v5841_v51  ;;  %v3697_v51 = vld [vmem:[%s7263_s13 + $0x1f8] sm:$0xff]  ;;  %s5842_s13 = smov [#allocation25]  }
0x14bf   :  { %5315 = vmatprep.subr.bf16.mxu1 %v5839_v0  ;;  %v5322_v29 = vpack.c.bf16 %v3697_v51, %v3696_v52  ;;  %s3496_s23 = sshll.u32 %s5842_s13, 4  ;;  %s3497_s23 = int_to_ptr.vmem [resolvable:$true] %s3496_s23 }
0x14c0   :  { %s5780_s17 = scalar_lea.vmem %s3497_s23, 64  ;;  %p5785_p1 = scmp.lt.s32.totalorder %s3497_s23, %s3497_s23 }
0x14c1   :  { %p5781_p0 = scmp.ne.s32.totalorder %s3497_s23, %s5780_s17  ;;  %p5786_p2 = scmp.lt.s32.totalorder %s5780_s17, %s5780_s17 }
0x14c2   :  { %5317 = vmatpush3.bf16.msra.mxu1 %v5316_v63 }
0x14c3   :  { %5318 = vmatprep.subr.bf16.mxu1 %v5839_v0  ;;  %p5787_p3 = por %p5786_p2, %p5785_p1 }
0x14c5   :  { %p5788_p4 = pnand %p5787_p3, %p5781_p0 }
0x14c6   :  { %5320 = vmatpush3.bf16.msra.mxu1 %v5319_v38 }
0x14c7   :  { %5321 = vmatprep.subr.bf16.mxu1 %v5839_v0 }
0x14ca   :  { %5323 = vmatpush3.bf16.msra.mxu1 %v5322_v29 }
0x14cd   :  { %4743 = vmatmul.mubr.msk.f32.vlgmr.msra.gmra.mrb[28].mxu1 %vm363_vm0, %v3321_v49 }
0x15a0   :  { %v3390_v61 = vpop.f32.mrb[28].mxu1 }
0x15a1   :  { %v5348_v7 = vadd.f32 %v3634_v60, %v3390_v61  ;;  %v4744_v17 = vpop.f32.mrb[29].mxu1 }
0x15a3   :  { %v3395_v20 = vmax.f32 %v5348_v7, 0.0 }
0x15a5   :  { %4778 = vmatmul.mubr.f32.vlgmr.msra.gmra.mrb[44].mxu0 %v3395_v20 }
0x1678   :  { %v3485_v0 = vpop.f32.mrb[44].mxu0 }
0x1679   :  { %v3486_v46 = vadd.f32 %v3699_v22, %v3485_v0  ;;  %v4779_v4 = vpop.f32.mrb[45].mxu0 }
0x167b   :  { %3489 = vst [vmem:[#allocation25] sm:$0xf] %v3486_v46 }
0x167c   :  { %5791 = shalt.err (!%p5788_p4)
}
0x167d   :  { %s7265_s25 = sld [smem:[#allocation48_spill]] }
0x1683   :  { %s5792_s22 = scalar_lea.hbm %s7265_s25, 64 }
0x1684   :  { %p5793_p5 = scmp.ne.s32.totalorder %s7265_s25, %s5792_s22  ;;  %p5796_p6 = scmp.lt.u32.totalorder %s5792_s22, %s7265_s25 }
0x1686   :  { %p5798_p7 = pnand %p5796_p6, %p5793_p5 }
0x1688   :  { %5801 = shalt.err (!%p5798_p7)
}
0x1689   :  { %3499 = dma.vmem_to_hbm [thread:$0]  %s3497_s23, 64, %s7265_s25, [#allocation4]  }
0x168a   :  { %5818 = dma.done.wait [#allocation4], 64  }
0x168b   :  { %5819 = vsyncadd [#allocation4], 4294967232 }
0x168c   :  { %3503 = vsyncpa [#allocation3], 1 }
0x168d   :  { %3504 = vsyncpa [#allocation6], 1 }
0x168e   :  { %3505 = vsyncpa [#allocation9], 1 }
0x168f   :  { %3506 = vsyncpa [#allocation12], 1 }
0x1690   :  { %3507 = vsyncpa [#allocation15], 1 }
0x1691   :  { %3508 = vsyncpa [#allocation18], 1 }
0x1692   :  { %3509 = vsyncpa [#allocation21], 1 }
0x1693   :  { %3510 = vsyncpa [#allocation24], 1 }
0x1694   :  { %3511 = vsyncpa [#allocation4], 1 }

</bundles_post_ra>
